<compile_context>
chip_gen: v7x
topology: tpu7x:2x2x1
jax: 0.10.0
libtpu: 0.0.40
codegen_flags: <defaults>
</compile_context>

<pallas_src>
import jax
import jax.numpy as jnp
from jax import lax
from jax.experimental import pallas as pl
from jax.experimental.pallas import tpu as pltpu


def _bilstm_kernel(emb_ref, len_ref,
                   wih_f_ref, wih_b_ref, b_f_ref, b_b_ref,
                   whh_f_ref, whh_b_ref,
                   wfc_f_ref, wfc_b_ref, bfc_ref,
                   out_ref, hid_ref, cell_ref,
                   xp_f_ref, xp_b_ref):
    T, TB, E = emb_ref.shape
    H = whh_f_ref.shape[0]

    lens = len_ref[...]                                    # [TB, 1] int32

    # ---- hoisted input projection (both directions), bias folded in; bf16 MXU, f32 acc ----
    emb2 = emb_ref[...].reshape(T * TB, E)                 # bf16
    xpf = jnp.dot(emb2, wih_f_ref[...], preferred_element_type=jnp.float32) + b_f_ref[...]
    xpb = jnp.dot(emb2, wih_b_ref[...], preferred_element_type=jnp.float32) + b_b_ref[...]
    xp_f_ref[...] = xpf.astype(jnp.bfloat16).reshape(T, TB, 4 * H)
    xp_b_ref[...] = xpb.astype(jnp.bfloat16).reshape(T, TB, 4 * H)

    # recurrent weights loaded once (loop constants), pre-transposed [H, 4H], bf16
    whh_f = whh_f_ref[...]
    whh_b = whh_b_ref[...]

    def sigm(x):
        # single EUP pass (tanh) + VPU mul/add; exact rewrite of logistic sigmoid
        return 0.5 * jnp.tanh(0.5 * x) + 0.5

    def gates_to_hc(gates, c):
        # PyTorch LSTM gate order: i, f, g, o  (all math f32)
        i = sigm(gates[:, 0 * H:1 * H])
        f = sigm(gates[:, 1 * H:2 * H])
        g = jnp.tanh(gates[:, 2 * H:3 * H])
        o = sigm(gates[:, 3 * H:4 * H])
        c_new = f * c + i * g
        h_new = o * jnp.tanh(c_new)
        return h_new, c_new

    zeros = jnp.zeros((TB, H), jnp.float32)

    # ---- fused fwd+bwd recurrence: the only serial work per step is h @ whh ----
    def body(t, carry):
        h_f, c_f, h_b, c_b = carry
        tb = T - 1 - t

        # forward direction, step t
        gf = (jnp.dot(h_f.astype(jnp.bfloat16), whh_f, preferred_element_type=jnp.float32)
              + xp_f_ref[t, :, :].astype(jnp.float32))
        hf_new, cf_new = gates_to_hc(gf, c_f)

        # backward direction, step T-1-t (independent chain -> interleaves with fwd)
        gb = (jnp.dot(h_b.astype(jnp.bfloat16), whh_b, preferred_element_type=jnp.float32)
              + xp_b_ref[tb, :, :].astype(jnp.float32))
        hb_new, cb_new = gates_to_hc(gb, c_b)

        # packed-sequence masks: broadcast once per direction, reused by wheres + store
        mf = jnp.broadcast_to(t < lens, (TB, H))
        mb = jnp.broadcast_to(tb < lens, (TB, H))

        h_f = jnp.where(mf, hf_new, h_f)
        c_f = jnp.where(mf, cf_new, c_f)
        h_b = jnp.where(mb, hb_new, h_b)
        c_b = jnp.where(mb, cb_new, c_b)

        # single fused [T, TB, 2H] output: fwd half / bwd half; padded steps -> 0
        # (lane-dense when H is a multiple of 128; accepted masked vst for small H)
        out_ref[t, :, pl.ds(0, H)] = jnp.where(mf, hf_new, 0.0)
        out_ref[tb, :, pl.ds(H, H)] = jnp.where(mb, hb_new, 0.0)
        return h_f, c_f, h_b, c_b

    h_f, c_f, h_b, c_b = lax.fori_loop(0, T, body, (zeros, zeros, zeros, zeros),
                                       unroll=min(T, 8))

    # ---- hidden = tanh(fc(cat(h_f,h_b))), cell = tanh(fc(cat(c_f,c_b))) ----
    # folded: stack h/c along sublanes -> two [2TB,H]@[H,D] matmuls, split rows afterwards
    hc_f = jnp.concatenate([h_f, c_f], axis=0).astype(jnp.bfloat16)   # [2TB, H]
    hc_b = jnp.concatenate([h_b, c_b], axis=0).astype(jnp.bfloat16)
    res = jnp.tanh(
        jnp.dot(hc_f, wfc_f_ref[...], preferred_element_type=jnp.float32)
        + jnp.dot(hc_b, wfc_b_ref[...], preferred_element_type=jnp.float32)
        + bfc_ref[...])
    hid_ref[...] = res[:TB]
    cell_ref[...] = res[TB:]


def _round_up(x, m):
    return ((x + m - 1) // m) * m


def _choose_batch_tile(batch):
    """Batch tile: multiple of 8, <=128, and >=2 grid tiles whenever the batch allows it."""
    b8 = _round_up(max(batch, 1), 8)
    tb = min(128, b8)
    if b8 >= 16 and b8 // tb < 2:
        tb = _round_up((b8 + 1) // 2, 8)
    return tb, _round_up(b8, tb)


def encoder_padded_attention_forward(src, src_len, params, *, batch_tile=None):
    # glue: embedding lookup (dropout is identity in eval mode)
    embedded = jnp.take(params["embedding"], src, axis=0)          # [T, B, E] f32
    T, B, E = embedded.shape
    H = params["whh_f"].shape[1]
    D = params["wfc"].shape[0]

    # ---- bf16 MXU operands, pre-transposed (lane-dense RHS); biases stay f32 ----
    bf16 = jnp.bfloat16
    wih_f_t = params["wih_f"].T.astype(bf16)                       # [E, 4H]
    wih_b_t = params["wih_b"].T.astype(bf16)
    whh_f_t = params["whh_f"].T.astype(bf16)                       # [H, 4H]
    whh_b_t = params["whh_b"].T.astype(bf16)
    wfc_t = params["wfc"].T                                        # [2H, D]
    wfc_f = wfc_t[:H].astype(bf16)                                 # [H, D]
    wfc_b = wfc_t[H:].astype(bf16)
    b_f = params["b_f"].astype(jnp.float32)                        # [1, 4H] (b_ih + b_hh)
    b_b = params["b_b"].astype(jnp.float32)
    bfc = params["bfc"].astype(jnp.float32)                        # [1, D]

    if batch_tile is None:
        TB, B_pad = _choose_batch_tile(B)
    else:
        TB = _round_up(batch_tile, 8)
        B_pad = _round_up(B, TB)

    lens = src_len.astype(jnp.int32)
    emb = embedded.astype(bf16)
    if B_pad != B:
        emb = jnp.pad(emb, ((0, 0), (0, B_pad - B), (0, 0)))
        lens = jnp.pad(lens, (0, B_pad - B))                       # padded rows: len 0 -> masked
    lens = lens.reshape(B_pad, 1)

    full2d = lambda a: pl.BlockSpec(a.shape, lambda b: (0, 0))

    # explicit VMEM budget: blocks (double-buffered) + weights + xp scratch
    vmem_bytes = (
        2 * T * TB * E * 2                                          # embedded block (bf16)
        + 2 * T * TB * 2 * H * 4                                    # output block (f32)
        + 2 * 2 * TB * D * 4                                        # hidden + cell blocks
        + 2 * (2 * E * 4 * H * 2 + 2 * H * 4 * H * 2 + 2 * H * D * 2)  # bf16 weights
        + 2 * (2 * 4 * H + D) * 4                                   # biases
        + 2 * T * TB * 4 * H * 2                                    # xp_f + xp_b scratch (bf16)
        + 2 * TB * 4                                                # lengths
    )
    vmem_limit = max(32 << 20, min(int(vmem_bytes * 1.25) + (2 << 20), 100 << 20))

    out_shapes = (
        jax.ShapeDtypeStruct((T, B_pad, 2 * H), jnp.float32),       # fused fwd||bwd outputs
        jax.ShapeDtypeStruct((B_pad, D), jnp.float32),              # hidden
        jax.ShapeDtypeStruct((B_pad, D), jnp.float32),              # cell
    )
    grid_spec = pltpu.PrefetchScalarGridSpec(
        num_scalar_prefetch=0,
        grid=(B_pad // TB,),
        in_specs=[
            pl.BlockSpec((T, TB, E), lambda b: (0, b, 0)),          # embedded
            pl.BlockSpec((TB, 1), lambda b: (b, 0)),                # lengths
            full2d(wih_f_t), full2d(wih_b_t), full2d(b_f), full2d(b_b),
            full2d(whh_f_t), full2d(whh_b_t),
            full2d(wfc_f), full2d(wfc_b), full2d(bfc),
        ],
        out_specs=(
            pl.BlockSpec((T, TB, 2 * H), lambda b: (0, b, 0)),
            pl.BlockSpec((TB, D), lambda b: (b, 0)),
            pl.BlockSpec((TB, D), lambda b: (b, 0)),
        ),
        scratch_shapes=[
            pltpu.VMEM((T, TB, 4 * H), jnp.bfloat16),               # xp forward
            pltpu.VMEM((T, TB, 4 * H), jnp.bfloat16),               # xp backward
        ],
    )
    outputs, hidden, cell = pl.pallas_call(
        _bilstm_kernel,
        out_shape=out_shapes,
        grid_spec=grid_spec,
        compiler_params=pltpu.CompilerParams(
            dimension_semantics=("parallel",),
            vmem_limit_bytes=vmem_limit),
    )(emb, lens, wih_f_t, wih_b_t, b_f, b_b, whh_f_t, whh_b_t, wfc_f, wfc_b, bfc)

    return outputs[:, :B], hidden[:B][None], cell[:B][None]


def reference_forward(src, src_len, params):
    # pure-JAX f32 reference of the same math (packed bi-LSTM + fc/tanh) for verification
    emb = jnp.take(params["embedding"], src, axis=0).astype(jnp.float32)
    T, B, _ = emb.shape
    H = params["whh_f"].shape[1]
    lens = src_len.astype(jnp.int32)

    def step(x, h, c, wih, whh, b):
        g = x @ wih.T + h @ whh.T + b
        i, f, gg, o = jnp.split(g, 4, axis=1)
        c_new = jax.nn.sigmoid(f) * c + jax.nn.sigmoid(i) * jnp.tanh(gg)
        h_new = jax.nn.sigmoid(o) * jnp.tanh(c_new)
        return h_new, c_new

    h = c = jnp.zeros((B, H), jnp.float32)
    outs_f = []
    for t in range(T):
        h_new, c_new = step(emb[t], h, c, params["wih_f"], params["whh_f"], params["b_f"])
        m = (t < lens)[:, None]
        h = jnp.where(m, h_new, h)
        c = jnp.where(m, c_new, c)
        outs_f.append(jnp.where(m, h_new, 0.0))
    h_f, c_f = h, c

    h = c = jnp.zeros((B, H), jnp.float32)
    outs_b = [None] * T
    for t in range(T - 1, -1, -1):
        h_new, c_new = step(emb[t], h, c, params["wih_b"], params["whh_b"], params["b_b"])
        m = (t < lens)[:, None]
        h = jnp.where(m, h_new, h)
        c = jnp.where(m, c_new, c)
        outs_b[t] = jnp.where(m, h_new, 0.0)
    h_b, c_b = h, c

    outputs = jnp.concatenate([jnp.stack(outs_f), jnp.stack(outs_b)], axis=-1)
    hid = jnp.tanh(jnp.concatenate([h_f, h_b], 1) @ params["wfc"].T + params["bfc"])
    cel = jnp.tanh(jnp.concatenate([c_f, c_b], 1) @ params["wfc"].T + params["bfc"])
    return outputs, hid[None], cel[None]


def init_params(key, input_dim, emb_dim, enc_hid_dim, dec_hid_dim):
    ks = jax.random.split(key, 8)
    s = 1.0 / jnp.sqrt(enc_hid_dim)
    u = lambda k, shp, sc: jax.random.uniform(k, shp, jnp.float32, -sc, sc)
    return {
        "embedding": u(ks[0], (input_dim, emb_dim), 1.0),
        "wih_f": u(ks[1], (4 * enc_hid_dim, emb_dim), s),
        "whh_f": u(ks[2], (4 * enc_hid_dim, enc_hid_dim), s),
        "b_f":   u(ks[3], (1, 4 * enc_hid_dim), s),       # b_ih + b_hh combined
        "wih_b": u(ks[4], (4 * enc_hid_dim, emb_dim), s),
        "whh_b": u(ks[5], (4 * enc_hid_dim, enc_hid_dim), s),
        "b_b":   u(ks[6], (1, 4 * enc_hid_dim), s),
        "wfc":   u(ks[7], (dec_hid_dim, 2 * enc_hid_dim), 1.0 / jnp.sqrt(2 * enc_hid_dim)),
        "bfc":   jnp.zeros((1, dec_hid_dim), jnp.float32),
    }


if __name__ == "__main__":
    INPUT_DIM, EMB_DIM, ENC_HID, DEC_HID = 16, 32, 32, 32
    T, B = 8, 2

    key = jax.random.PRNGKey(0)
    k_src, k_par = jax.random.split(key)
    src = jax.random.randint(k_src, (T, B), 0, INPUT_DIM, dtype=jnp.int32)   # [T, B] token ids
    # pack_padded_sequence expects descending lengths; max length == T so padded output has T steps
    src_len = jnp.array([T, 5], dtype=jnp.int32)
    params = init_params(k_par, INPUT_DIM, EMB_DIM, ENC_HID, DEC_HID)

    outputs, hidden, cell = encoder_padded_attention_forward(src, src_len, params)
    jax.block_until_ready((outputs, hidden, cell))

    ref_out, ref_hid, ref_cell = reference_forward(src, src_len, params)
    assert outputs.shape == (T, B, 2 * ENC_HID)
    assert hidden.shape == (1, B, DEC_HID) and cell.shape == (1, B, DEC_HID)
    # bf16 MXU operands vs f32 reference -> slightly looser tolerance
    assert jnp.allclose(outputs, ref_out, atol=2e-2, rtol=2e-2)
    assert jnp.allclose(hidden, ref_hid, atol=2e-2, rtol=2e-2)
    assert jnp.allclose(cell, ref_cell, atol=2e-2, rtol=2e-2)

    print("KERNEL_OK")
</pallas_src>

<mosaic_0001>
module attributes {stable_mosaic.version = 11 : i64} {
  func.func @_bilstm_kernel(%arg0: i32, %arg1: memref<8x8x32xbf16, #tpu.memory_space<vmem>>, %arg2: memref<8x1xi32, #tpu.memory_space<vmem>>, %arg3: memref<32x128xbf16, #tpu.memory_space<vmem>>, %arg4: memref<32x128xbf16, #tpu.memory_space<vmem>>, %arg5: memref<1x128xf32, #tpu.memory_space<vmem>>, %arg6: memref<1x128xf32, #tpu.memory_space<vmem>>, %arg7: memref<32x128xbf16, #tpu.memory_space<vmem>>, %arg8: memref<32x128xbf16, #tpu.memory_space<vmem>>, %arg9: memref<32x32xbf16, #tpu.memory_space<vmem>>, %arg10: memref<32x32xbf16, #tpu.memory_space<vmem>>, %arg11: memref<1x32xf32, #tpu.memory_space<vmem>>, %arg12: memref<8x8x64xf32, #tpu.memory_space<vmem>>, %arg13: memref<8x32xf32, #tpu.memory_space<vmem>>, %arg14: memref<8x32xf32, #tpu.memory_space<vmem>>, %arg15: memref<8x8x128xbf16, #tpu.memory_space<vmem>>, %arg16: memref<8x8x128xbf16, #tpu.memory_space<vmem>>) attributes {dimension_semantics = [#tpu.dimension_semantics<parallel>], iteration_bounds = array<i64: 1>, scalar_prefetch = 0 : i64, scratch_operands = 2 : i64, tpu.core_type = #tpu.core_type<tc>, window_params = [{transform_indices = @transform_0, window_bounds = array<i64: 8, 8, 32>}, {transform_indices = @transform_1, window_bounds = array<i64: 8, 1>}, {pipeline_mode = #tpu.pipeline_mode<synchronous>, transform_indices = @transform_2, window_bounds = array<i64: 32, 128>}, {pipeline_mode = #tpu.pipeline_mode<synchronous>, transform_indices = @transform_3, window_bounds = array<i64: 32, 128>}, {pipeline_mode = #tpu.pipeline_mode<synchronous>, transform_indices = @transform_4, window_bounds = array<i64: 1, 128>}, {pipeline_mode = #tpu.pipeline_mode<synchronous>, transform_indices = @transform_5, window_bounds = array<i64: 1, 128>}, {pipeline_mode = #tpu.pipeline_mode<synchronous>, transform_indices = @transform_6, window_bounds = array<i64: 32, 128>}, {pipeline_mode = #tpu.pipeline_mode<synchronous>, transform_indices = @transform_7, window_bounds = array<i64: 32, 128>}, {pipeline_mode = #tpu.pipeline_mode<synchronous>, transform_indices = @transform_8, window_bounds = array<i64: 32, 32>}, {pipeline_mode = #tpu.pipeline_mode<synchronous>, transform_indices = @transform_9, window_bounds = array<i64: 32, 32>}, {pipeline_mode = #tpu.pipeline_mode<synchronous>, transform_indices = @transform_10, window_bounds = array<i64: 1, 32>}, {transform_indices = @transform_11, window_bounds = array<i64: 8, 8, 64>}, {transform_indices = @transform_12, window_bounds = array<i64: 8, 32>}, {transform_indices = @transform_13, window_bounds = array<i64: 8, 32>}]} {
    %c0 = arith.constant 0 : index
    %c0_0 = arith.constant 0 : index
    %0 = vector.load %arg2[%c0, %c0_0] : memref<8x1xi32, #tpu.memory_space<vmem>>, vector<8x1xi32>
    %c0_1 = arith.constant 0 : index
    %c0_2 = arith.constant 0 : index
    %c0_3 = arith.constant 0 : index
    %1 = vector.load %arg1[%c0_1, %c0_2, %c0_3] : memref<8x8x32xbf16, #tpu.memory_space<vmem>>, vector<8x8x32xbf16>
    %2 = vector.shape_cast %1 : vector<8x8x32xbf16> to vector<64x32xbf16>
    %c0_4 = arith.constant 0 : index
    %c0_5 = arith.constant 0 : index
    %3 = vector.load %arg3[%c0_4, %c0_5] : memref<32x128xbf16, #tpu.memory_space<vmem>>, vector<32x128xbf16>
    %cst = arith.constant dense<0.000000e+00> : vector<64x128xf32>
    %4 = tpu.matmul %2, %3, %cst {dimension_numbers = #tpu.dot_dimension_numbers<[1], [0], [0], [1], [0, 0, 1, 1], [], []>} : vector<64x32xbf16>, vector<32x128xbf16>, vector<64x128xf32> -> vector<64x128xf32>
    %c0_6 = arith.constant 0 : index
    %c0_7 = arith.constant 0 : index
    %5 = vector.load %arg5[%c0_6, %c0_7] : memref<1x128xf32, #tpu.memory_space<vmem>>, vector<1x128xf32>
    %6 = vector.broadcast %5 : vector<1x128xf32> to vector<64x128xf32>
    %7 = arith.addf %4, %6 : vector<64x128xf32>
    %c0_8 = arith.constant 0 : index
    %c0_9 = arith.constant 0 : index
    %8 = vector.load %arg4[%c0_8, %c0_9] : memref<32x128xbf16, #tpu.memory_space<vmem>>, vector<32x128xbf16>
    %cst_10 = arith.constant dense<0.000000e+00> : vector<64x128xf32>
    %9 = tpu.matmul %2, %8, %cst_10 {dimension_numbers = #tpu.dot_dimension_numbers<[1], [0], [0], [1], [0, 0, 1, 1], [], []>} : vector<64x32xbf16>, vector<32x128xbf16>, vector<64x128xf32> -> vector<64x128xf32>
    %c0_11 = arith.constant 0 : index
    %c0_12 = arith.constant 0 : index
    %10 = vector.load %arg6[%c0_11, %c0_12] : memref<1x128xf32, #tpu.memory_space<vmem>>, vector<1x128xf32>
    %11 = vector.broadcast %10 : vector<1x128xf32> to vector<64x128xf32>
    %12 = arith.addf %9, %11 : vector<64x128xf32>
    %13 = arith.truncf %7 : vector<64x128xf32> to vector<64x128xbf16>
    %14 = vector.shape_cast %13 : vector<64x128xbf16> to vector<8x8x128xbf16>
    %c0_13 = arith.constant 0 : index
    %c0_14 = arith.constant 0 : index
    %c0_15 = arith.constant 0 : index
    %15 = vector.load %arg15[%c0_13, %c0_14, %c0_15] : memref<8x8x128xbf16, #tpu.memory_space<vmem>>, vector<8x8x128xbf16>
    tpu.vector_store %arg15[%c0_13, %c0_14, %c0_15], %14 {strides = array<i32>} : memref<8x8x128xbf16, #tpu.memory_space<vmem>>, vector<8x8x128xbf16>,
    %16 = arith.truncf %12 : vector<64x128xf32> to vector<64x128xbf16>
    %17 = vector.shape_cast %16 : vector<64x128xbf16> to vector<8x8x128xbf16>
    %c0_16 = arith.constant 0 : index
    %c0_17 = arith.constant 0 : index
    %c0_18 = arith.constant 0 : index
    %18 = vector.load %arg16[%c0_16, %c0_17, %c0_18] : memref<8x8x128xbf16, #tpu.memory_space<vmem>>, vector<8x8x128xbf16>
    tpu.vector_store %arg16[%c0_16, %c0_17, %c0_18], %17 {strides = array<i32>} : memref<8x8x128xbf16, #tpu.memory_space<vmem>>, vector<8x8x128xbf16>,
    %c0_19 = arith.constant 0 : index
    %c0_20 = arith.constant 0 : index
    %19 = vector.load %arg7[%c0_19, %c0_20] : memref<32x128xbf16, #tpu.memory_space<vmem>>, vector<32x128xbf16>
    %c0_21 = arith.constant 0 : index
    %c0_22 = arith.constant 0 : index
    %20 = vector.load %arg8[%c0_21, %c0_22] : memref<32x128xbf16, #tpu.memory_space<vmem>>, vector<32x128xbf16>
    %cst_23 = arith.constant 0.000000e+00 : f32
    %21 = vector.broadcast %cst_23 : f32 to vector<8x32xf32>
    %c0_i32 = arith.constant 0 : i32
    %c7_i32 = arith.constant 7 : i32
    %22 = arith.subi %c7_i32, %c0_i32 : i32
    %23 = arith.truncf %21 : vector<8x32xf32> to vector<8x32xbf16>
    %cst_24 = arith.constant dense<0.000000e+00> : vector<8x128xf32>
    %24 = tpu.matmul %23, %19, %cst_24 {dimension_numbers = #tpu.dot_dimension_numbers<[1], [0], [0], [1], [0, 0, 1, 1], [], []>} : vector<8x32xbf16>, vector<32x128xbf16>, vector<8x128xf32> -> vector<8x128xf32>
    %25 = arith.index_cast %c0_i32 : i32 to index
    %c0_25 = arith.constant 0 : index
    %c0_26 = arith.constant 0 : index
    %26 = vector.load %arg15[%25, %c0_25, %c0_26] : memref<8x8x128xbf16, #tpu.memory_space<vmem>>, vector<1x8x128xbf16>
    %27 = vector.shape_cast %26 : vector<1x8x128xbf16> to vector<8x128xbf16>
    %28 = arith.extf %27 : vector<8x128xbf16> to vector<8x128xf32>
    %29 = arith.addf %24, %28 : vector<8x128xf32>
    %30 = vector.extract_strided_slice %29 {offsets = [0, 0], sizes = [8, 32], strides = [1, 1]} : vector<8x128xf32> to vector<8x32xf32>
    %cst_27 = arith.constant 5.000000e-01 : f32
    %31 = vector.broadcast %cst_27 : f32 to vector<8x32xf32>
    %32 = arith.mulf %31, %30 : vector<8x32xf32>
    %33 = math.tanh %32 : vector<8x32xf32>
    %cst_28 = arith.constant 5.000000e-01 : f32
    %34 = vector.broadcast %cst_28 : f32 to vector<8x32xf32>
    %35 = arith.mulf %34, %33 : vector<8x32xf32>
    %cst_29 = arith.constant 5.000000e-01 : f32
    %36 = vector.broadcast %cst_29 : f32 to vector<8x32xf32>
    %37 = arith.addf %35, %36 : vector<8x32xf32>
    %38 = vector.extract_strided_slice %29 {offsets = [0, 32], sizes = [8, 32], strides = [1, 1]} : vector<8x128xf32> to vector<8x32xf32>
    %cst_30 = arith.constant 5.000000e-01 : f32
    %39 = vector.broadcast %cst_30 : f32 to vector<8x32xf32>
    %40 = arith.mulf %39, %38 : vector<8x32xf32>
    %41 = math.tanh %40 : vector<8x32xf32>
    %cst_31 = arith.constant 5.000000e-01 : f32
    %42 = vector.broadcast %cst_31 : f32 to vector<8x32xf32>
    %43 = arith.mulf %42, %41 : vector<8x32xf32>
    %cst_32 = arith.constant 5.000000e-01 : f32
    %44 = vector.broadcast %cst_32 : f32 to vector<8x32xf32>
    %45 = arith.addf %43, %44 : vector<8x32xf32>
    %46 = vector.extract_strided_slice %29 {offsets = [0, 64], sizes = [8, 32], strides = [1, 1]} : vector<8x128xf32> to vector<8x32xf32>
    %47 = math.tanh %46 : vector<8x32xf32>
    %48 = vector.extract_strided_slice %29 {offsets = [0, 96], sizes = [8, 32], strides = [1, 1]} : vector<8x128xf32> to vector<8x32xf32>
    %cst_33 = arith.constant 5.000000e-01 : f32
    %49 = vector.broadcast %cst_33 : f32 to vector<8x32xf32>
    %50 = arith.mulf %49, %48 : vector<8x32xf32>
    %51 = math.tanh %50 : vector<8x32xf32>
    %cst_34 = arith.constant 5.000000e-01 : f32
    %52 = vector.broadcast %cst_34 : f32 to vector<8x32xf32>
    %53 = arith.mulf %52, %51 : vector<8x32xf32>
    %cst_35 = arith.constant 5.000000e-01 : f32
    %54 = vector.broadcast %cst_35 : f32 to vector<8x32xf32>
    %55 = arith.addf %53, %54 : vector<8x32xf32>
    %56 = arith.mulf %45, %21 : vector<8x32xf32>
    %57 = arith.mulf %37, %47 : vector<8x32xf32>
    %58 = arith.addf %56, %57 : vector<8x32xf32>
    %59 = math.tanh %58 : vector<8x32xf32>
    %60 = arith.mulf %55, %59 : vector<8x32xf32>
    %61 = arith.truncf %21 : vector<8x32xf32> to vector<8x32xbf16>
    %cst_36 = arith.constant dense<0.000000e+00> : vector<8x128xf32>
    %62 = tpu.matmul %61, %20, %cst_36 {dimension_numbers = #tpu.dot_dimension_numbers<[1], [0], [0], [1], [0, 0, 1, 1], [], []>} : vector<8x32xbf16>, vector<32x128xbf16>, vector<8x128xf32> -> vector<8x128xf32>
    %63 = arith.index_cast %22 : i32 to index
    %c0_37 = arith.constant 0 : index
    %c0_38 = arith.constant 0 : index
    %64 = vector.load %arg16[%63, %c0_37, %c0_38] : memref<8x8x128xbf16, #tpu.memory_space<vmem>>, vector<1x8x128xbf16>
    %65 = vector.shape_cast %64 : vector<1x8x128xbf16> to vector<8x128xbf16>
    %66 = arith.extf %65 : vector<8x128xbf16> to vector<8x128xf32>
    %67 = arith.addf %62, %66 : vector<8x128xf32>
    %68 = vector.extract_strided_slice %67 {offsets = [0, 0], sizes = [8, 32], strides = [1, 1]} : vector<8x128xf32> to vector<8x32xf32>
    %cst_39 = arith.constant 5.000000e-01 : f32
    %69 = vector.broadcast %cst_39 : f32 to vector<8x32xf32>
    %70 = arith.mulf %69, %68 : vector<8x32xf32>
    %71 = math.tanh %70 : vector<8x32xf32>
    %cst_40 = arith.constant 5.000000e-01 : f32
    %72 = vector.broadcast %cst_40 : f32 to vector<8x32xf32>
    %73 = arith.mulf %72, %71 : vector<8x32xf32>
    %cst_41 = arith.constant 5.000000e-01 : f32
    %74 = vector.broadcast %cst_41 : f32 to vector<8x32xf32>
    %75 = arith.addf %73, %74 : vector<8x32xf32>
    %76 = vector.extract_strided_slice %67 {offsets = [0, 32], sizes = [8, 32], strides = [1, 1]} : vector<8x128xf32> to vector<8x32xf32>
    %cst_42 = arith.constant 5.000000e-01 : f32
    %77 = vector.broadcast %cst_42 : f32 to vector<8x32xf32>
    %78 = arith.mulf %77, %76 : vector<8x32xf32>
    %79 = math.tanh %78 : vector<8x32xf32>
    %cst_43 = arith.constant 5.000000e-01 : f32
    %80 = vector.broadcast %cst_43 : f32 to vector<8x32xf32>
    %81 = arith.mulf %80, %79 : vector<8x32xf32>
    %cst_44 = arith.constant 5.000000e-01 : f32
    %82 = vector.broadcast %cst_44 : f32 to vector<8x32xf32>
    %83 = arith.addf %81, %82 : vector<8x32xf32>
    %84 = vector.extract_strided_slice %67 {offsets = [0, 64], sizes = [8, 32], strides = [1, 1]} : vector<8x128xf32> to vector<8x32xf32>
    %85 = math.tanh %84 : vector<8x32xf32>
    %86 = vector.extract_strided_slice %67 {offsets = [0, 96], sizes = [8, 32], strides = [1, 1]} : vector<8x128xf32> to vector<8x32xf32>
    %cst_45 = arith.constant 5.000000e-01 : f32
    %87 = vector.broadcast %cst_45 : f32 to vector<8x32xf32>
    %88 = arith.mulf %87, %86 : vector<8x32xf32>
    %89 = math.tanh %88 : vector<8x32xf32>
    %cst_46 = arith.constant 5.000000e-01 : f32
    %90 = vector.broadcast %cst_46 : f32 to vector<8x32xf32>
    %91 = arith.mulf %90, %89 : vector<8x32xf32>
    %cst_47 = arith.constant 5.000000e-01 : f32
    %92 = vector.broadcast %cst_47 : f32 to vector<8x32xf32>
    %93 = arith.addf %91, %92 : vector<8x32xf32>
    %94 = arith.mulf %83, %21 : vector<8x32xf32>
    %95 = arith.mulf %75, %85 : vector<8x32xf32>
    %96 = arith.addf %94, %95 : vector<8x32xf32>
    %97 = math.tanh %96 : vector<8x32xf32>
    %98 = arith.mulf %93, %97 : vector<8x32xf32>
    %99 = vector.broadcast %c0_i32 : i32 to vector<8x1xi32>
    %100 = arith.cmpi slt, %99, %0 : vector<8x1xi32>
    %101 = vector.shape_cast %100 : vector<8x1xi1> to vector<8x1xi1>
    %102 = vector.broadcast %101 : vector<8x1xi1> to vector<8x32xi1>
    %103 = vector.broadcast %22 : i32 to vector<8x1xi32>
    %104 = arith.cmpi slt, %103, %0 : vector<8x1xi32>
    %105 = vector.shape_cast %104 : vector<8x1xi1> to vector<8x1xi1>
    %106 = vector.broadcast %105 : vector<8x1xi1> to vector<8x32xi1>
    %107 = arith.select %102, %60, %21 : vector<8x32xi1>, vector<8x32xf32>
    %108 = arith.select %102, %58, %21 : vector<8x32xi1>, vector<8x32xf32>
    %109 = arith.select %106, %98, %21 : vector<8x32xi1>, vector<8x32xf32>
    %110 = arith.select %106, %96, %21 : vector<8x32xi1>, vector<8x32xf32>
    %cst_48 = arith.constant 0.000000e+00 : f32
    %111 = vector.broadcast %cst_48 : f32 to vector<8x32xf32>
    %112 = arith.select %102, %60, %111 : vector<8x32xi1>, vector<8x32xf32>
    %113 = arith.index_cast %c0_i32 : i32 to index
    %c0_49 = arith.constant 0 : index
    %c0_50 = arith.constant 0 : index
    %114 = vector.load %arg12[%113, %c0_49, %c0_50] : memref<8x8x64xf32, #tpu.memory_space<vmem>>, vector<1x8x32xf32>
    %115 = vector.shape_cast %114 : vector<1x8x32xf32> to vector<8x32xf32>
    %116 = vector.shape_cast %112 : vector<8x32xf32> to vector<1x8x32xf32>
    tpu.vector_store %arg12[%113, %c0_49, %c0_50], %116 {strides = array<i32>} : memref<8x8x64xf32, #tpu.memory_space<vmem>>, vector<1x8x32xf32>,
    %cst_51 = arith.constant 0.000000e+00 : f32
    %117 = vector.broadcast %cst_51 : f32 to vector<8x32xf32>
    %118 = arith.select %106, %98, %117 : vector<8x32xi1>, vector<8x32xf32>
    %119 = arith.index_cast %22 : i32 to index
    %c0_52 = arith.constant 0 : index
    %c32 = arith.constant 32 : index
    %120 = vector.load %arg12[%119, %c0_52, %c32] : memref<8x8x64xf32, #tpu.memory_space<vmem>>, vector<1x8x32xf32>
    %121 = vector.shape_cast %120 : vector<1x8x32xf32> to vector<8x32xf32>
    %122 = vector.shape_cast %118 : vector<8x32xf32> to vector<1x8x32xf32>
    tpu.vector_store %arg12[%119, %c0_52, %c32], %122 {strides = array<i32>} : memref<8x8x64xf32, #tpu.memory_space<vmem>>, vector<1x8x32xf32>,
    %c1_i32 = arith.constant 1 : i32
    %c7_i32_53 = arith.constant 7 : i32
    %123 = arith.subi %c7_i32_53, %c1_i32 : i32
    %124 = arith.truncf %107 : vector<8x32xf32> to vector<8x32xbf16>
    %cst_54 = arith.constant dense<0.000000e+00> : vector<8x128xf32>
    %125 = tpu.matmul %124, %19, %cst_54 {dimension_numbers = #tpu.dot_dimension_numbers<[1], [0], [0], [1], [0, 0, 1, 1], [], []>} : vector<8x32xbf16>, vector<32x128xbf16>, vector<8x128xf32> -> vector<8x128xf32>
    %126 = arith.index_cast %c1_i32 : i32 to index
    %c0_55 = arith.constant 0 : index
    %c0_56 = arith.constant 0 : index
    %127 = vector.load %arg15[%126, %c0_55, %c0_56] : memref<8x8x128xbf16, #tpu.memory_space<vmem>>, vector<1x8x128xbf16>
    %128 = vector.shape_cast %127 : vector<1x8x128xbf16> to vector<8x128xbf16>
    %129 = arith.extf %128 : vector<8x128xbf16> to vector<8x128xf32>
    %130 = arith.addf %125, %129 : vector<8x128xf32>
    %131 = vector.extract_strided_slice %130 {offsets = [0, 0], sizes = [8, 32], strides = [1, 1]} : vector<8x128xf32> to vector<8x32xf32>
    %cst_57 = arith.constant 5.000000e-01 : f32
    %132 = vector.broadcast %cst_57 : f32 to vector<8x32xf32>
    %133 = arith.mulf %132, %131 : vector<8x32xf32>
    %134 = math.tanh %133 : vector<8x32xf32>
    %cst_58 = arith.constant 5.000000e-01 : f32
    %135 = vector.broadcast %cst_58 : f32 to vector<8x32xf32>
    %136 = arith.mulf %135, %134 : vector<8x32xf32>
    %cst_59 = arith.constant 5.000000e-01 : f32
    %137 = vector.broadcast %cst_59 : f32 to vector<8x32xf32>
    %138 = arith.addf %136, %137 : vector<8x32xf32>
    %139 = vector.extract_strided_slice %130 {offsets = [0, 32], sizes = [8, 32], strides = [1, 1]} : vector<8x128xf32> to vector<8x32xf32>
    %cst_60 = arith.constant 5.000000e-01 : f32
    %140 = vector.broadcast %cst_60 : f32 to vector<8x32xf32>
    %141 = arith.mulf %140, %139 : vector<8x32xf32>
    %142 = math.tanh %141 : vector<8x32xf32>
    %cst_61 = arith.constant 5.000000e-01 : f32
    %143 = vector.broadcast %cst_61 : f32 to vector<8x32xf32>
    %144 = arith.mulf %143, %142 : vector<8x32xf32>
    %cst_62 = arith.constant 5.000000e-01 : f32
    %145 = vector.broadcast %cst_62 : f32 to vector<8x32xf32>
    %146 = arith.addf %144, %145 : vector<8x32xf32>
    %147 = vector.extract_strided_slice %130 {offsets = [0, 64], sizes = [8, 32], strides = [1, 1]} : vector<8x128xf32> to vector<8x32xf32>
    %148 = math.tanh %147 : vector<8x32xf32>
    %149 = vector.extract_strided_slice %130 {offsets = [0, 96], sizes = [8, 32], strides = [1, 1]} : vector<8x128xf32> to vector<8x32xf32>
    %cst_63 = arith.constant 5.000000e-01 : f32
    %150 = vector.broadcast %cst_63 : f32 to vector<8x32xf32>
    %151 = arith.mulf %150, %149 : vector<8x32xf32>
    %152 = math.tanh %151 : vector<8x32xf32>
    %cst_64 = arith.constant 5.000000e-01 : f32
    %153 = vector.broadcast %cst_64 : f32 to vector<8x32xf32>
    %154 = arith.mulf %153, %152 : vector<8x32xf32>
    %cst_65 = arith.constant 5.000000e-01 : f32
    %155 = vector.broadcast %cst_65 : f32 to vector<8x32xf32>
    %156 = arith.addf %154, %155 : vector<8x32xf32>
    %157 = arith.mulf %146, %108 : vector<8x32xf32>
    %158 = arith.mulf %138, %148 : vector<8x32xf32>
    %159 = arith.addf %157, %158 : vector<8x32xf32>
    %160 = math.tanh %159 : vector<8x32xf32>
    %161 = arith.mulf %156, %160 : vector<8x32xf32>
    %162 = arith.truncf %109 : vector<8x32xf32> to vector<8x32xbf16>
    %cst_66 = arith.constant dense<0.000000e+00> : vector<8x128xf32>
    %163 = tpu.matmul %162, %20, %cst_66 {dimension_numbers = #tpu.dot_dimension_numbers<[1], [0], [0], [1], [0, 0, 1, 1], [], []>} : vector<8x32xbf16>, vector<32x128xbf16>, vector<8x128xf32> -> vector<8x128xf32>
    %164 = arith.index_cast %123 : i32 to index
    %c0_67 = arith.constant 0 : index
    %c0_68 = arith.constant 0 : index
    %165 = vector.load %arg16[%164, %c0_67, %c0_68] : memref<8x8x128xbf16, #tpu.memory_space<vmem>>, vector<1x8x128xbf16>
    %166 = vector.shape_cast %165 : vector<1x8x128xbf16> to vector<8x128xbf16>
    %167 = arith.extf %166 : vector<8x128xbf16> to vector<8x128xf32>
    %168 = arith.addf %163, %167 : vector<8x128xf32>
    %169 = vector.extract_strided_slice %168 {offsets = [0, 0], sizes = [8, 32], strides = [1, 1]} : vector<8x128xf32> to vector<8x32xf32>
    %cst_69 = arith.constant 5.000000e-01 : f32
    %170 = vector.broadcast %cst_69 : f32 to vector<8x32xf32>
    %171 = arith.mulf %170, %169 : vector<8x32xf32>
    %172 = math.tanh %171 : vector<8x32xf32>
    %cst_70 = arith.constant 5.000000e-01 : f32
    %173 = vector.broadcast %cst_70 : f32 to vector<8x32xf32>
    %174 = arith.mulf %173, %172 : vector<8x32xf32>
    %cst_71 = arith.constant 5.000000e-01 : f32
    %175 = vector.broadcast %cst_71 : f32 to vector<8x32xf32>
    %176 = arith.addf %174, %175 : vector<8x32xf32>
    %177 = vector.extract_strided_slice %168 {offsets = [0, 32], sizes = [8, 32], strides = [1, 1]} : vector<8x128xf32> to vector<8x32xf32>
    %cst_72 = arith.constant 5.000000e-01 : f32
    %178 = vector.broadcast %cst_72 : f32 to vector<8x32xf32>
    %179 = arith.mulf %178, %177 : vector<8x32xf32>
    %180 = math.tanh %179 : vector<8x32xf32>
    %cst_73 = arith.constant 5.000000e-01 : f32
    %181 = vector.broadcast %cst_73 : f32 to vector<8x32xf32>
    %182 = arith.mulf %181, %180 : vector<8x32xf32>
    %cst_74 = arith.constant 5.000000e-01 : f32
    %183 = vector.broadcast %cst_74 : f32 to vector<8x32xf32>
    %184 = arith.addf %182, %183 : vector<8x32xf32>
    %185 = vector.extract_strided_slice %168 {offsets = [0, 64], sizes = [8, 32], strides = [1, 1]} : vector<8x128xf32> to vector<8x32xf32>
    %186 = math.tanh %185 : vector<8x32xf32>
    %187 = vector.extract_strided_slice %168 {offsets = [0, 96], sizes = [8, 32], strides = [1, 1]} : vector<8x128xf32> to vector<8x32xf32>
    %cst_75 = arith.constant 5.000000e-01 : f32
    %188 = vector.broadcast %cst_75 : f32 to vector<8x32xf32>
    %189 = arith.mulf %188, %187 : vector<8x32xf32>
    %190 = math.tanh %189 : vector<8x32xf32>
    %cst_76 = arith.constant 5.000000e-01 : f32
    %191 = vector.broadcast %cst_76 : f32 to vector<8x32xf32>
    %192 = arith.mulf %191, %190 : vector<8x32xf32>
    %cst_77 = arith.constant 5.000000e-01 : f32
    %193 = vector.broadcast %cst_77 : f32 to vector<8x32xf32>
    %194 = arith.addf %192, %193 : vector<8x32xf32>
    %195 = arith.mulf %184, %110 : vector<8x32xf32>
    %196 = arith.mulf %176, %186 : vector<8x32xf32>
    %197 = arith.addf %195, %196 : vector<8x32xf32>
    %198 = math.tanh %197 : vector<8x32xf32>
    %199 = arith.mulf %194, %198 : vector<8x32xf32>
    %200 = vector.broadcast %c1_i32 : i32 to vector<8x1xi32>
    %201 = arith.cmpi slt, %200, %0 : vector<8x1xi32>
    %202 = vector.shape_cast %201 : vector<8x1xi1> to vector<8x1xi1>
    %203 = vector.broadcast %202 : vector<8x1xi1> to vector<8x32xi1>
    %204 = vector.broadcast %123 : i32 to vector<8x1xi32>
    %205 = arith.cmpi slt, %204, %0 : vector<8x1xi32>
    %206 = vector.shape_cast %205 : vector<8x1xi1> to vector<8x1xi1>
    %207 = vector.broadcast %206 : vector<8x1xi1> to vector<8x32xi1>
    %208 = arith.select %203, %161, %107 : vector<8x32xi1>, vector<8x32xf32>
    %209 = arith.select %203, %159, %108 : vector<8x32xi1>, vector<8x32xf32>
    %210 = arith.select %207, %199, %109 : vector<8x32xi1>, vector<8x32xf32>
    %211 = arith.select %207, %197, %110 : vector<8x32xi1>, vector<8x32xf32>
    %cst_78 = arith.constant 0.000000e+00 : f32
    %212 = vector.broadcast %cst_78 : f32 to vector<8x32xf32>
    %213 = arith.select %203, %161, %212 : vector<8x32xi1>, vector<8x32xf32>
    %214 = arith.index_cast %c1_i32 : i32 to index
    %c0_79 = arith.constant 0 : index
    %c0_80 = arith.constant 0 : index
    %215 = vector.load %arg12[%214, %c0_79, %c0_80] : memref<8x8x64xf32, #tpu.memory_space<vmem>>, vector<1x8x32xf32>
    %216 = vector.shape_cast %215 : vector<1x8x32xf32> to vector<8x32xf32>
    %217 = vector.shape_cast %213 : vector<8x32xf32> to vector<1x8x32xf32>
    tpu.vector_store %arg12[%214, %c0_79, %c0_80], %217 {strides = array<i32>} : memref<8x8x64xf32, #tpu.memory_space<vmem>>, vector<1x8x32xf32>,
    %cst_81 = arith.constant 0.000000e+00 : f32
    %218 = vector.broadcast %cst_81 : f32 to vector<8x32xf32>
    %219 = arith.select %207, %199, %218 : vector<8x32xi1>, vector<8x32xf32>
    %220 = arith.index_cast %123 : i32 to index
    %c0_82 = arith.constant 0 : index
    %c32_83 = arith.constant 32 : index
    %221 = vector.load %arg12[%220, %c0_82, %c32_83] : memref<8x8x64xf32, #tpu.memory_space<vmem>>, vector<1x8x32xf32>
    %222 = vector.shape_cast %221 : vector<1x8x32xf32> to vector<8x32xf32>
    %223 = vector.shape_cast %219 : vector<8x32xf32> to vector<1x8x32xf32>
    tpu.vector_store %arg12[%220, %c0_82, %c32_83], %223 {strides = array<i32>} : memref<8x8x64xf32, #tpu.memory_space<vmem>>, vector<1x8x32xf32>,
    %c2_i32 = arith.constant 2 : i32
    %c7_i32_84 = arith.constant 7 : i32
    %224 = arith.subi %c7_i32_84, %c2_i32 : i32
    %225 = arith.truncf %208 : vector<8x32xf32> to vector<8x32xbf16>
    %cst_85 = arith.constant dense<0.000000e+00> : vector<8x128xf32>
    %226 = tpu.matmul %225, %19, %cst_85 {dimension_numbers = #tpu.dot_dimension_numbers<[1], [0], [0], [1], [0, 0, 1, 1], [], []>} : vector<8x32xbf16>, vector<32x128xbf16>, vector<8x128xf32> -> vector<8x128xf32>
    %227 = arith.index_cast %c2_i32 : i32 to index
    %c0_86 = arith.constant 0 : index
    %c0_87 = arith.constant 0 : index
    %228 = vector.load %arg15[%227, %c0_86, %c0_87] : memref<8x8x128xbf16, #tpu.memory_space<vmem>>, vector<1x8x128xbf16>
    %229 = vector.shape_cast %228 : vector<1x8x128xbf16> to vector<8x128xbf16>
    %230 = arith.extf %229 : vector<8x128xbf16> to vector<8x128xf32>
    %231 = arith.addf %226, %230 : vector<8x128xf32>
    %232 = vector.extract_strided_slice %231 {offsets = [0, 0], sizes = [8, 32], strides = [1, 1]} : vector<8x128xf32> to vector<8x32xf32>
    %cst_88 = arith.constant 5.000000e-01 : f32
    %233 = vector.broadcast %cst_88 : f32 to vector<8x32xf32>
    %234 = arith.mulf %233, %232 : vector<8x32xf32>
    %235 = math.tanh %234 : vector<8x32xf32>
    %cst_89 = arith.constant 5.000000e-01 : f32
    %236 = vector.broadcast %cst_89 : f32 to vector<8x32xf32>
    %237 = arith.mulf %236, %235 : vector<8x32xf32>
    %cst_90 = arith.constant 5.000000e-01 : f32
    %238 = vector.broadcast %cst_90 : f32 to vector<8x32xf32>
    %239 = arith.addf %237, %238 : vector<8x32xf32>
    %240 = vector.extract_strided_slice %231 {offsets = [0, 32], sizes = [8, 32], strides = [1, 1]} : vector<8x128xf32> to vector<8x32xf32>
    %cst_91 = arith.constant 5.000000e-01 : f32
    %241 = vector.broadcast %cst_91 : f32 to vector<8x32xf32>
    %242 = arith.mulf %241, %240 : vector<8x32xf32>
    %243 = math.tanh %242 : vector<8x32xf32>
    %cst_92 = arith.constant 5.000000e-01 : f32
    %244 = vector.broadcast %cst_92 : f32 to vector<8x32xf32>
    %245 = arith.mulf %244, %243 : vector<8x32xf32>
    %cst_93 = arith.constant 5.000000e-01 : f32
    %246 = vector.broadcast %cst_93 : f32 to vector<8x32xf32>
    %247 = arith.addf %245, %246 : vector<8x32xf32>
    %248 = vector.extract_strided_slice %231 {offsets = [0, 64], sizes = [8, 32], strides = [1, 1]} : vector<8x128xf32> to vector<8x32xf32>
    %249 = math.tanh %248 : vector<8x32xf32>
    %250 = vector.extract_strided_slice %231 {offsets = [0, 96], sizes = [8, 32], strides = [1, 1]} : vector<8x128xf32> to vector<8x32xf32>
    %cst_94 = arith.constant 5.000000e-01 : f32
    %251 = vector.broadcast %cst_94 : f32 to vector<8x32xf32>
    %252 = arith.mulf %251, %250 : vector<8x32xf32>
    %253 = math.tanh %252 : vector<8x32xf32>
    %cst_95 = arith.constant 5.000000e-01 : f32
    %254 = vector.broadcast %cst_95 : f32 to vector<8x32xf32>
    %255 = arith.mulf %254, %253 : vector<8x32xf32>
    %cst_96 = arith.constant 5.000000e-01 : f32
    %256 = vector.broadcast %cst_96 : f32 to vector<8x32xf32>
    %257 = arith.addf %255, %256 : vector<8x32xf32>
    %258 = arith.mulf %247, %209 : vector<8x32xf32>
    %259 = arith.mulf %239, %249 : vector<8x32xf32>
    %260 = arith.addf %258, %259 : vector<8x32xf32>
    %261 = math.tanh %260 : vector<8x32xf32>
    %262 = arith.mulf %257, %261 : vector<8x32xf32>
    %263 = arith.truncf %210 : vector<8x32xf32> to vector<8x32xbf16>
    %cst_97 = arith.constant dense<0.000000e+00> : vector<8x128xf32>
    %264 = tpu.matmul %263, %20, %cst_97 {dimension_numbers = #tpu.dot_dimension_numbers<[1], [0], [0], [1], [0, 0, 1, 1], [], []>} : vector<8x32xbf16>, vector<32x128xbf16>, vector<8x128xf32> -> vector<8x128xf32>
    %265 = arith.index_cast %224 : i32 to index
    %c0_98 = arith.constant 0 : index
    %c0_99 = arith.constant 0 : index
    %266 = vector.load %arg16[%265, %c0_98, %c0_99] : memref<8x8x128xbf16, #tpu.memory_space<vmem>>, vector<1x8x128xbf16>
    %267 = vector.shape_cast %266 : vector<1x8x128xbf16> to vector<8x128xbf16>
    %268 = arith.extf %267 : vector<8x128xbf16> to vector<8x128xf32>
    %269 = arith.addf %264, %268 : vector<8x128xf32>
    %270 = vector.extract_strided_slice %269 {offsets = [0, 0], sizes = [8, 32], strides = [1, 1]} : vector<8x128xf32> to vector<8x32xf32>
    %cst_100 = arith.constant 5.000000e-01 : f32
    %271 = vector.broadcast %cst_100 : f32 to vector<8x32xf32>
    %272 = arith.mulf %271, %270 : vector<8x32xf32>
    %273 = math.tanh %272 : vector<8x32xf32>
    %cst_101 = arith.constant 5.000000e-01 : f32
    %274 = vector.broadcast %cst_101 : f32 to vector<8x32xf32>
    %275 = arith.mulf %274, %273 : vector<8x32xf32>
    %cst_102 = arith.constant 5.000000e-01 : f32
    %276 = vector.broadcast %cst_102 : f32 to vector<8x32xf32>
    %277 = arith.addf %275, %276 : vector<8x32xf32>
    %278 = vector.extract_strided_slice %269 {offsets = [0, 32], sizes = [8, 32], strides = [1, 1]} : vector<8x128xf32> to vector<8x32xf32>
    %cst_103 = arith.constant 5.000000e-01 : f32
    %279 = vector.broadcast %cst_103 : f32 to vector<8x32xf32>
    %280 = arith.mulf %279, %278 : vector<8x32xf32>
    %281 = math.tanh %280 : vector<8x32xf32>
    %cst_104 = arith.constant 5.000000e-01 : f32
    %282 = vector.broadcast %cst_104 : f32 to vector<8x32xf32>
    %283 = arith.mulf %282, %281 : vector<8x32xf32>
    %cst_105 = arith.constant 5.000000e-01 : f32
    %284 = vector.broadcast %cst_105 : f32 to vector<8x32xf32>
    %285 = arith.addf %283, %284 : vector<8x32xf32>
    %286 = vector.extract_strided_slice %269 {offsets = [0, 64], sizes = [8, 32], strides = [1, 1]} : vector<8x128xf32> to vector<8x32xf32>
    %287 = math.tanh %286 : vector<8x32xf32>
    %288 = vector.extract_strided_slice %269 {offsets = [0, 96], sizes = [8, 32], strides = [1, 1]} : vector<8x128xf32> to vector<8x32xf32>
    %cst_106 = arith.constant 5.000000e-01 : f32
    %289 = vector.broadcast %cst_106 : f32 to vector<8x32xf32>
    %290 = arith.mulf %289, %288 : vector<8x32xf32>
    %291 = math.tanh %290 : vector<8x32xf32>
    %cst_107 = arith.constant 5.000000e-01 : f32
    %292 = vector.broadcast %cst_107 : f32 to vector<8x32xf32>
    %293 = arith.mulf %292, %291 : vector<8x32xf32>
    %cst_108 = arith.constant 5.000000e-01 : f32
    %294 = vector.broadcast %cst_108 : f32 to vector<8x32xf32>
    %295 = arith.addf %293, %294 : vector<8x32xf32>
    %296 = arith.mulf %285, %211 : vector<8x32xf32>
    %297 = arith.mulf %277, %287 : vector<8x32xf32>
    %298 = arith.addf %296, %297 : vector<8x32xf32>
    %299 = math.tanh %298 : vector<8x32xf32>
    %300 = arith.mulf %295, %299 : vector<8x32xf32>
    %301 = vector.broadcast %c2_i32 : i32 to vector<8x1xi32>
    %302 = arith.cmpi slt, %301, %0 : vector<8x1xi32>
    %303 = vector.shape_cast %302 : vector<8x1xi1> to vector<8x1xi1>
    %304 = vector.broadcast %303 : vector<8x1xi1> to vector<8x32xi1>
    %305 = vector.broadcast %224 : i32 to vector<8x1xi32>
    %306 = arith.cmpi slt, %305, %0 : vector<8x1xi32>
    %307 = vector.shape_cast %306 : vector<8x1xi1> to vector<8x1xi1>
    %308 = vector.broadcast %307 : vector<8x1xi1> to vector<8x32xi1>
    %309 = arith.select %304, %262, %208 : vector<8x32xi1>, vector<8x32xf32>
    %310 = arith.select %304, %260, %209 : vector<8x32xi1>, vector<8x32xf32>
    %311 = arith.select %308, %300, %210 : vector<8x32xi1>, vector<8x32xf32>
    %312 = arith.select %308, %298, %211 : vector<8x32xi1>, vector<8x32xf32>
    %cst_109 = arith.constant 0.000000e+00 : f32
    %313 = vector.broadcast %cst_109 : f32 to vector<8x32xf32>
    %314 = arith.select %304, %262, %313 : vector<8x32xi1>, vector<8x32xf32>
    %315 = arith.index_cast %c2_i32 : i32 to index
    %c0_110 = arith.constant 0 : index
    %c0_111 = arith.constant 0 : index
    %316 = vector.load %arg12[%315, %c0_110, %c0_111] : memref<8x8x64xf32, #tpu.memory_space<vmem>>, vector<1x8x32xf32>
    %317 = vector.shape_cast %316 : vector<1x8x32xf32> to vector<8x32xf32>
    %318 = vector.shape_cast %314 : vector<8x32xf32> to vector<1x8x32xf32>
    tpu.vector_store %arg12[%315, %c0_110, %c0_111], %318 {strides = array<i32>} : memref<8x8x64xf32, #tpu.memory_space<vmem>>, vector<1x8x32xf32>,
    %cst_112 = arith.constant 0.000000e+00 : f32
    %319 = vector.broadcast %cst_112 : f32 to vector<8x32xf32>
    %320 = arith.select %308, %300, %319 : vector<8x32xi1>, vector<8x32xf32>
    %321 = arith.index_cast %224 : i32 to index
    %c0_113 = arith.constant 0 : index
    %c32_114 = arith.constant 32 : index
    %322 = vector.load %arg12[%321, %c0_113, %c32_114] : memref<8x8x64xf32, #tpu.memory_space<vmem>>, vector<1x8x32xf32>
    %323 = vector.shape_cast %322 : vector<1x8x32xf32> to vector<8x32xf32>
    %324 = vector.shape_cast %320 : vector<8x32xf32> to vector<1x8x32xf32>
    tpu.vector_store %arg12[%321, %c0_113, %c32_114], %324 {strides = array<i32>} : memref<8x8x64xf32, #tpu.memory_space<vmem>>, vector<1x8x32xf32>,
    %c3_i32 = arith.constant 3 : i32
    %c7_i32_115 = arith.constant 7 : i32
    %325 = arith.subi %c7_i32_115, %c3_i32 : i32
    %326 = arith.truncf %309 : vector<8x32xf32> to vector<8x32xbf16>
    %cst_116 = arith.constant dense<0.000000e+00> : vector<8x128xf32>
    %327 = tpu.matmul %326, %19, %cst_116 {dimension_numbers = #tpu.dot_dimension_numbers<[1], [0], [0], [1], [0, 0, 1, 1], [], []>} : vector<8x32xbf16>, vector<32x128xbf16>, vector<8x128xf32> -> vector<8x128xf32>
    %328 = arith.index_cast %c3_i32 : i32 to index
    %c0_117 = arith.constant 0 : index
    %c0_118 = arith.constant 0 : index
    %329 = vector.load %arg15[%328, %c0_117, %c0_118] : memref<8x8x128xbf16, #tpu.memory_space<vmem>>, vector<1x8x128xbf16>
    %330 = vector.shape_cast %329 : vector<1x8x128xbf16> to vector<8x128xbf16>
    %331 = arith.extf %330 : vector<8x128xbf16> to vector<8x128xf32>
    %332 = arith.addf %327, %331 : vector<8x128xf32>
    %333 = vector.extract_strided_slice %332 {offsets = [0, 0], sizes = [8, 32], strides = [1, 1]} : vector<8x128xf32> to vector<8x32xf32>
    %cst_119 = arith.constant 5.000000e-01 : f32
    %334 = vector.broadcast %cst_119 : f32 to vector<8x32xf32>
    %335 = arith.mulf %334, %333 : vector<8x32xf32>
    %336 = math.tanh %335 : vector<8x32xf32>
    %cst_120 = arith.constant 5.000000e-01 : f32
    %337 = vector.broadcast %cst_120 : f32 to vector<8x32xf32>
    %338 = arith.mulf %337, %336 : vector<8x32xf32>
    %cst_121 = arith.constant 5.000000e-01 : f32
    %339 = vector.broadcast %cst_121 : f32 to vector<8x32xf32>
    %340 = arith.addf %338, %339 : vector<8x32xf32>
    %341 = vector.extract_strided_slice %332 {offsets = [0, 32], sizes = [8, 32], strides = [1, 1]} : vector<8x128xf32> to vector<8x32xf32>
    %cst_122 = arith.constant 5.000000e-01 : f32
    %342 = vector.broadcast %cst_122 : f32 to vector<8x32xf32>
    %343 = arith.mulf %342, %341 : vector<8x32xf32>
    %344 = math.tanh %343 : vector<8x32xf32>
    %cst_123 = arith.constant 5.000000e-01 : f32
    %345 = vector.broadcast %cst_123 : f32 to vector<8x32xf32>
    %346 = arith.mulf %345, %344 : vector<8x32xf32>
    %cst_124 = arith.constant 5.000000e-01 : f32
    %347 = vector.broadcast %cst_124 : f32 to vector<8x32xf32>
    %348 = arith.addf %346, %347 : vector<8x32xf32>
    %349 = vector.extract_strided_slice %332 {offsets = [0, 64], sizes = [8, 32], strides = [1, 1]} : vector<8x128xf32> to vector<8x32xf32>
    %350 = math.tanh %349 : vector<8x32xf32>
    %351 = vector.extract_strided_slice %332 {offsets = [0, 96], sizes = [8, 32], strides = [1, 1]} : vector<8x128xf32> to vector<8x32xf32>
    %cst_125 = arith.constant 5.000000e-01 : f32
    %352 = vector.broadcast %cst_125 : f32 to vector<8x32xf32>
    %353 = arith.mulf %352, %351 : vector<8x32xf32>
    %354 = math.tanh %353 : vector<8x32xf32>
    %cst_126 = arith.constant 5.000000e-01 : f32
    %355 = vector.broadcast %cst_126 : f32 to vector<8x32xf32>
    %356 = arith.mulf %355, %354 : vector<8x32xf32>
    %cst_127 = arith.constant 5.000000e-01 : f32
    %357 = vector.broadcast %cst_127 : f32 to vector<8x32xf32>
    %358 = arith.addf %356, %357 : vector<8x32xf32>
    %359 = arith.mulf %348, %310 : vector<8x32xf32>
    %360 = arith.mulf %340, %350 : vector<8x32xf32>
    %361 = arith.addf %359, %360 : vector<8x32xf32>
    %362 = math.tanh %361 : vector<8x32xf32>
    %363 = arith.mulf %358, %362 : vector<8x32xf32>
    %364 = arith.truncf %311 : vector<8x32xf32> to vector<8x32xbf16>
    %cst_128 = arith.constant dense<0.000000e+00> : vector<8x128xf32>
    %365 = tpu.matmul %364, %20, %cst_128 {dimension_numbers = #tpu.dot_dimension_numbers<[1], [0], [0], [1], [0, 0, 1, 1], [], []>} : vector<8x32xbf16>, vector<32x128xbf16>, vector<8x128xf32> -> vector<8x128xf32>
    %366 = arith.index_cast %325 : i32 to index
    %c0_129 = arith.constant 0 : index
    %c0_130 = arith.constant 0 : index
    %367 = vector.load %arg16[%366, %c0_129, %c0_130] : memref<8x8x128xbf16, #tpu.memory_space<vmem>>, vector<1x8x128xbf16>
    %368 = vector.shape_cast %367 : vector<1x8x128xbf16> to vector<8x128xbf16>
    %369 = arith.extf %368 : vector<8x128xbf16> to vector<8x128xf32>
    %370 = arith.addf %365, %369 : vector<8x128xf32>
    %371 = vector.extract_strided_slice %370 {offsets = [0, 0], sizes = [8, 32], strides = [1, 1]} : vector<8x128xf32> to vector<8x32xf32>
    %cst_131 = arith.constant 5.000000e-01 : f32
    %372 = vector.broadcast %cst_131 : f32 to vector<8x32xf32>
    %373 = arith.mulf %372, %371 : vector<8x32xf32>
    %374 = math.tanh %373 : vector<8x32xf32>
    %cst_132 = arith.constant 5.000000e-01 : f32
    %375 = vector.broadcast %cst_132 : f32 to vector<8x32xf32>
    %376 = arith.mulf %375, %374 : vector<8x32xf32>
    %cst_133 = arith.constant 5.000000e-01 : f32
    %377 = vector.broadcast %cst_133 : f32 to vector<8x32xf32>
    %378 = arith.addf %376, %377 : vector<8x32xf32>
    %379 = vector.extract_strided_slice %370 {offsets = [0, 32], sizes = [8, 32], strides = [1, 1]} : vector<8x128xf32> to vector<8x32xf32>
    %cst_134 = arith.constant 5.000000e-01 : f32
    %380 = vector.broadcast %cst_134 : f32 to vector<8x32xf32>
    %381 = arith.mulf %380, %379 : vector<8x32xf32>
    %382 = math.tanh %381 : vector<8x32xf32>
    %cst_135 = arith.constant 5.000000e-01 : f32
    %383 = vector.broadcast %cst_135 : f32 to vector<8x32xf32>
    %384 = arith.mulf %383, %382 : vector<8x32xf32>
    %cst_136 = arith.constant 5.000000e-01 : f32
    %385 = vector.broadcast %cst_136 : f32 to vector<8x32xf32>
    %386 = arith.addf %384, %385 : vector<8x32xf32>
    %387 = vector.extract_strided_slice %370 {offsets = [0, 64], sizes = [8, 32], strides = [1, 1]} : vector<8x128xf32> to vector<8x32xf32>
    %388 = math.tanh %387 : vector<8x32xf32>
    %389 = vector.extract_strided_slice %370 {offsets = [0, 96], sizes = [8, 32], strides = [1, 1]} : vector<8x128xf32> to vector<8x32xf32>
    %cst_137 = arith.constant 5.000000e-01 : f32
    %390 = vector.broadcast %cst_137 : f32 to vector<8x32xf32>
    %391 = arith.mulf %390, %389 : vector<8x32xf32>
    %392 = math.tanh %391 : vector<8x32xf32>
    %cst_138 = arith.constant 5.000000e-01 : f32
    %393 = vector.broadcast %cst_138 : f32 to vector<8x32xf32>
    %394 = arith.mulf %393, %392 : vector<8x32xf32>
    %cst_139 = arith.constant 5.000000e-01 : f32
    %395 = vector.broadcast %cst_139 : f32 to vector<8x32xf32>
    %396 = arith.addf %394, %395 : vector<8x32xf32>
    %397 = arith.mulf %386, %312 : vector<8x32xf32>
    %398 = arith.mulf %378, %388 : vector<8x32xf32>
    %399 = arith.addf %397, %398 : vector<8x32xf32>
    %400 = math.tanh %399 : vector<8x32xf32>
    %401 = arith.mulf %396, %400 : vector<8x32xf32>
    %402 = vector.broadcast %c3_i32 : i32 to vector<8x1xi32>
    %403 = arith.cmpi slt, %402, %0 : vector<8x1xi32>
    %404 = vector.shape_cast %403 : vector<8x1xi1> to vector<8x1xi1>
    %405 = vector.broadcast %404 : vector<8x1xi1> to vector<8x32xi1>
    %406 = vector.broadcast %325 : i32 to vector<8x1xi32>
    %407 = arith.cmpi slt, %406, %0 : vector<8x1xi32>
    %408 = vector.shape_cast %407 : vector<8x1xi1> to vector<8x1xi1>
    %409 = vector.broadcast %408 : vector<8x1xi1> to vector<8x32xi1>
    %410 = arith.select %405, %363, %309 : vector<8x32xi1>, vector<8x32xf32>
    %411 = arith.select %405, %361, %310 : vector<8x32xi1>, vector<8x32xf32>
    %412 = arith.select %409, %401, %311 : vector<8x32xi1>, vector<8x32xf32>
    %413 = arith.select %409, %399, %312 : vector<8x32xi1>, vector<8x32xf32>
    %cst_140 = arith.constant 0.000000e+00 : f32
    %414 = vector.broadcast %cst_140 : f32 to vector<8x32xf32>
    %415 = arith.select %405, %363, %414 : vector<8x32xi1>, vector<8x32xf32>
    %416 = arith.index_cast %c3_i32 : i32 to index
    %c0_141 = arith.constant 0 : index
    %c0_142 = arith.constant 0 : index
    %417 = vector.load %arg12[%416, %c0_141, %c0_142] : memref<8x8x64xf32, #tpu.memory_space<vmem>>, vector<1x8x32xf32>
    %418 = vector.shape_cast %417 : vector<1x8x32xf32> to vector<8x32xf32>
    %419 = vector.shape_cast %415 : vector<8x32xf32> to vector<1x8x32xf32>
    tpu.vector_store %arg12[%416, %c0_141, %c0_142], %419 {strides = array<i32>} : memref<8x8x64xf32, #tpu.memory_space<vmem>>, vector<1x8x32xf32>,
    %cst_143 = arith.constant 0.000000e+00 : f32
    %420 = vector.broadcast %cst_143 : f32 to vector<8x32xf32>
    %421 = arith.select %409, %401, %420 : vector<8x32xi1>, vector<8x32xf32>
    %422 = arith.index_cast %325 : i32 to index
    %c0_144 = arith.constant 0 : index
    %c32_145 = arith.constant 32 : index
    %423 = vector.load %arg12[%422, %c0_144, %c32_145] : memref<8x8x64xf32, #tpu.memory_space<vmem>>, vector<1x8x32xf32>
    %424 = vector.shape_cast %423 : vector<1x8x32xf32> to vector<8x32xf32>
    %425 = vector.shape_cast %421 : vector<8x32xf32> to vector<1x8x32xf32>
    tpu.vector_store %arg12[%422, %c0_144, %c32_145], %425 {strides = array<i32>} : memref<8x8x64xf32, #tpu.memory_space<vmem>>, vector<1x8x32xf32>,
    %c4_i32 = arith.constant 4 : i32
    %c7_i32_146 = arith.constant 7 : i32
    %426 = arith.subi %c7_i32_146, %c4_i32 : i32
    %427 = arith.truncf %410 : vector<8x32xf32> to vector<8x32xbf16>
    %cst_147 = arith.constant dense<0.000000e+00> : vector<8x128xf32>
    %428 = tpu.matmul %427, %19, %cst_147 {dimension_numbers = #tpu.dot_dimension_numbers<[1], [0], [0], [1], [0, 0, 1, 1], [], []>} : vector<8x32xbf16>, vector<32x128xbf16>, vector<8x128xf32> -> vector<8x128xf32>
    %429 = arith.index_cast %c4_i32 : i32 to index
    %c0_148 = arith.constant 0 : index
    %c0_149 = arith.constant 0 : index
    %430 = vector.load %arg15[%429, %c0_148, %c0_149] : memref<8x8x128xbf16, #tpu.memory_space<vmem>>, vector<1x8x128xbf16>
    %431 = vector.shape_cast %430 : vector<1x8x128xbf16> to vector<8x128xbf16>
    %432 = arith.extf %431 : vector<8x128xbf16> to vector<8x128xf32>
    %433 = arith.addf %428, %432 : vector<8x128xf32>
    %434 = vector.extract_strided_slice %433 {offsets = [0, 0], sizes = [8, 32], strides = [1, 1]} : vector<8x128xf32> to vector<8x32xf32>
    %cst_150 = arith.constant 5.000000e-01 : f32
    %435 = vector.broadcast %cst_150 : f32 to vector<8x32xf32>
    %436 = arith.mulf %435, %434 : vector<8x32xf32>
    %437 = math.tanh %436 : vector<8x32xf32>
    %cst_151 = arith.constant 5.000000e-01 : f32
    %438 = vector.broadcast %cst_151 : f32 to vector<8x32xf32>
    %439 = arith.mulf %438, %437 : vector<8x32xf32>
    %cst_152 = arith.constant 5.000000e-01 : f32
    %440 = vector.broadcast %cst_152 : f32 to vector<8x32xf32>
    %441 = arith.addf %439, %440 : vector<8x32xf32>
    %442 = vector.extract_strided_slice %433 {offsets = [0, 32], sizes = [8, 32], strides = [1, 1]} : vector<8x128xf32> to vector<8x32xf32>
    %cst_153 = arith.constant 5.000000e-01 : f32
    %443 = vector.broadcast %cst_153 : f32 to vector<8x32xf32>
    %444 = arith.mulf %443, %442 : vector<8x32xf32>
    %445 = math.tanh %444 : vector<8x32xf32>
    %cst_154 = arith.constant 5.000000e-01 : f32
    %446 = vector.broadcast %cst_154 : f32 to vector<8x32xf32>
    %447 = arith.mulf %446, %445 : vector<8x32xf32>
    %cst_155 = arith.constant 5.000000e-01 : f32
    %448 = vector.broadcast %cst_155 : f32 to vector<8x32xf32>
    %449 = arith.addf %447, %448 : vector<8x32xf32>
    %450 = vector.extract_strided_slice %433 {offsets = [0, 64], sizes = [8, 32], strides = [1, 1]} : vector<8x128xf32> to vector<8x32xf32>
    %451 = math.tanh %450 : vector<8x32xf32>
    %452 = vector.extract_strided_slice %433 {offsets = [0, 96], sizes = [8, 32], strides = [1, 1]} : vector<8x128xf32> to vector<8x32xf32>
    %cst_156 = arith.constant 5.000000e-01 : f32
    %453 = vector.broadcast %cst_156 : f32 to vector<8x32xf32>
    %454 = arith.mulf %453, %452 : vector<8x32xf32>
    %455 = math.tanh %454 : vector<8x32xf32>
    %cst_157 = arith.constant 5.000000e-01 : f32
    %456 = vector.broadcast %cst_157 : f32 to vector<8x32xf32>
    %457 = arith.mulf %456, %455 : vector<8x32xf32>
    %cst_158 = arith.constant 5.000000e-01 : f32
    %458 = vector.broadcast %cst_158 : f32 to vector<8x32xf32>
    %459 = arith.addf %457, %458 : vector<8x32xf32>
    %460 = arith.mulf %449, %411 : vector<8x32xf32>
    %461 = arith.mulf %441, %451 : vector<8x32xf32>
    %462 = arith.addf %460, %461 : vector<8x32xf32>
    %463 = math.tanh %462 : vector<8x32xf32>
    %464 = arith.mulf %459, %463 : vector<8x32xf32>
    %465 = arith.truncf %412 : vector<8x32xf32> to vector<8x32xbf16>
    %cst_159 = arith.constant dense<0.000000e+00> : vector<8x128xf32>
    %466 = tpu.matmul %465, %20, %cst_159 {dimension_numbers = #tpu.dot_dimension_numbers<[1], [0], [0], [1], [0, 0, 1, 1], [], []>} : vector<8x32xbf16>, vector<32x128xbf16>, vector<8x128xf32> -> vector<8x128xf32>
    %467 = arith.index_cast %426 : i32 to index
    %c0_160 = arith.constant 0 : index
    %c0_161 = arith.constant 0 : index
    %468 = vector.load %arg16[%467, %c0_160, %c0_161] : memref<8x8x128xbf16, #tpu.memory_space<vmem>>, vector<1x8x128xbf16>
    %469 = vector.shape_cast %468 : vector<1x8x128xbf16> to vector<8x128xbf16>
    %470 = arith.extf %469 : vector<8x128xbf16> to vector<8x128xf32>
    %471 = arith.addf %466, %470 : vector<8x128xf32>
    %472 = vector.extract_strided_slice %471 {offsets = [0, 0], sizes = [8, 32], strides = [1, 1]} : vector<8x128xf32> to vector<8x32xf32>
    %cst_162 = arith.constant 5.000000e-01 : f32
    %473 = vector.broadcast %cst_162 : f32 to vector<8x32xf32>
    %474 = arith.mulf %473, %472 : vector<8x32xf32>
    %475 = math.tanh %474 : vector<8x32xf32>
    %cst_163 = arith.constant 5.000000e-01 : f32
    %476 = vector.broadcast %cst_163 : f32 to vector<8x32xf32>
    %477 = arith.mulf %476, %475 : vector<8x32xf32>
    %cst_164 = arith.constant 5.000000e-01 : f32
    %478 = vector.broadcast %cst_164 : f32 to vector<8x32xf32>
    %479 = arith.addf %477, %478 : vector<8x32xf32>
    %480 = vector.extract_strided_slice %471 {offsets = [0, 32], sizes = [8, 32], strides = [1, 1]} : vector<8x128xf32> to vector<8x32xf32>
    %cst_165 = arith.constant 5.000000e-01 : f32
    %481 = vector.broadcast %cst_165 : f32 to vector<8x32xf32>
    %482 = arith.mulf %481, %480 : vector<8x32xf32>
    %483 = math.tanh %482 : vector<8x32xf32>
    %cst_166 = arith.constant 5.000000e-01 : f32
    %484 = vector.broadcast %cst_166 : f32 to vector<8x32xf32>
    %485 = arith.mulf %484, %483 : vector<8x32xf32>
    %cst_167 = arith.constant 5.000000e-01 : f32
    %486 = vector.broadcast %cst_167 : f32 to vector<8x32xf32>
    %487 = arith.addf %485, %486 : vector<8x32xf32>
    %488 = vector.extract_strided_slice %471 {offsets = [0, 64], sizes = [8, 32], strides = [1, 1]} : vector<8x128xf32> to vector<8x32xf32>
    %489 = math.tanh %488 : vector<8x32xf32>
    %490 = vector.extract_strided_slice %471 {offsets = [0, 96], sizes = [8, 32], strides = [1, 1]} : vector<8x128xf32> to vector<8x32xf32>
    %cst_168 = arith.constant 5.000000e-01 : f32
    %491 = vector.broadcast %cst_168 : f32 to vector<8x32xf32>
    %492 = arith.mulf %491, %490 : vector<8x32xf32>
    %493 = math.tanh %492 : vector<8x32xf32>
    %cst_169 = arith.constant 5.000000e-01 : f32
    %494 = vector.broadcast %cst_169 : f32 to vector<8x32xf32>
    %495 = arith.mulf %494, %493 : vector<8x32xf32>
    %cst_170 = arith.constant 5.000000e-01 : f32
    %496 = vector.broadcast %cst_170 : f32 to vector<8x32xf32>
    %497 = arith.addf %495, %496 : vector<8x32xf32>
    %498 = arith.mulf %487, %413 : vector<8x32xf32>
    %499 = arith.mulf %479, %489 : vector<8x32xf32>
    %500 = arith.addf %498, %499 : vector<8x32xf32>
    %501 = math.tanh %500 : vector<8x32xf32>
    %502 = arith.mulf %497, %501 : vector<8x32xf32>
    %503 = vector.broadcast %c4_i32 : i32 to vector<8x1xi32>
    %504 = arith.cmpi slt, %503, %0 : vector<8x1xi32>
    %505 = vector.shape_cast %504 : vector<8x1xi1> to vector<8x1xi1>
    %506 = vector.broadcast %505 : vector<8x1xi1> to vector<8x32xi1>
    %507 = vector.broadcast %426 : i32 to vector<8x1xi32>
    %508 = arith.cmpi slt, %507, %0 : vector<8x1xi32>
    %509 = vector.shape_cast %508 : vector<8x1xi1> to vector<8x1xi1>
    %510 = vector.broadcast %509 : vector<8x1xi1> to vector<8x32xi1>
    %511 = arith.select %506, %464, %410 : vector<8x32xi1>, vector<8x32xf32>
    %512 = arith.select %506, %462, %411 : vector<8x32xi1>, vector<8x32xf32>
    %513 = arith.select %510, %502, %412 : vector<8x32xi1>, vector<8x32xf32>
    %514 = arith.select %510, %500, %413 : vector<8x32xi1>, vector<8x32xf32>
    %cst_171 = arith.constant 0.000000e+00 : f32
    %515 = vector.broadcast %cst_171 : f32 to vector<8x32xf32>
    %516 = arith.select %506, %464, %515 : vector<8x32xi1>, vector<8x32xf32>
    %517 = arith.index_cast %c4_i32 : i32 to index
    %c0_172 = arith.constant 0 : index
    %c0_173 = arith.constant 0 : index
    %518 = vector.load %arg12[%517, %c0_172, %c0_173] : memref<8x8x64xf32, #tpu.memory_space<vmem>>, vector<1x8x32xf32>
    %519 = vector.shape_cast %518 : vector<1x8x32xf32> to vector<8x32xf32>
    %520 = vector.shape_cast %516 : vector<8x32xf32> to vector<1x8x32xf32>
    tpu.vector_store %arg12[%517, %c0_172, %c0_173], %520 {strides = array<i32>} : memref<8x8x64xf32, #tpu.memory_space<vmem>>, vector<1x8x32xf32>,
    %cst_174 = arith.constant 0.000000e+00 : f32
    %521 = vector.broadcast %cst_174 : f32 to vector<8x32xf32>
    %522 = arith.select %510, %502, %521 : vector<8x32xi1>, vector<8x32xf32>
    %523 = arith.index_cast %426 : i32 to index
    %c0_175 = arith.constant 0 : index
    %c32_176 = arith.constant 32 : index
    %524 = vector.load %arg12[%523, %c0_175, %c32_176] : memref<8x8x64xf32, #tpu.memory_space<vmem>>, vector<1x8x32xf32>
    %525 = vector.shape_cast %524 : vector<1x8x32xf32> to vector<8x32xf32>
    %526 = vector.shape_cast %522 : vector<8x32xf32> to vector<1x8x32xf32>
    tpu.vector_store %arg12[%523, %c0_175, %c32_176], %526 {strides = array<i32>} : memref<8x8x64xf32, #tpu.memory_space<vmem>>, vector<1x8x32xf32>,
    %c5_i32 = arith.constant 5 : i32
    %c7_i32_177 = arith.constant 7 : i32
    %527 = arith.subi %c7_i32_177, %c5_i32 : i32
    %528 = arith.truncf %511 : vector<8x32xf32> to vector<8x32xbf16>
    %cst_178 = arith.constant dense<0.000000e+00> : vector<8x128xf32>
    %529 = tpu.matmul %528, %19, %cst_178 {dimension_numbers = #tpu.dot_dimension_numbers<[1], [0], [0], [1], [0, 0, 1, 1], [], []>} : vector<8x32xbf16>, vector<32x128xbf16>, vector<8x128xf32> -> vector<8x128xf32>
    %530 = arith.index_cast %c5_i32 : i32 to index
    %c0_179 = arith.constant 0 : index
    %c0_180 = arith.constant 0 : index
    %531 = vector.load %arg15[%530, %c0_179, %c0_180] : memref<8x8x128xbf16, #tpu.memory_space<vmem>>, vector<1x8x128xbf16>
    %532 = vector.shape_cast %531 : vector<1x8x128xbf16> to vector<8x128xbf16>
    %533 = arith.extf %532 : vector<8x128xbf16> to vector<8x128xf32>
    %534 = arith.addf %529, %533 : vector<8x128xf32>
    %535 = vector.extract_strided_slice %534 {offsets = [0, 0], sizes = [8, 32], strides = [1, 1]} : vector<8x128xf32> to vector<8x32xf32>
    %cst_181 = arith.constant 5.000000e-01 : f32
    %536 = vector.broadcast %cst_181 : f32 to vector<8x32xf32>
    %537 = arith.mulf %536, %535 : vector<8x32xf32>
    %538 = math.tanh %537 : vector<8x32xf32>
    %cst_182 = arith.constant 5.000000e-01 : f32
    %539 = vector.broadcast %cst_182 : f32 to vector<8x32xf32>
    %540 = arith.mulf %539, %538 : vector<8x32xf32>
    %cst_183 = arith.constant 5.000000e-01 : f32
    %541 = vector.broadcast %cst_183 : f32 to vector<8x32xf32>
    %542 = arith.addf %540, %541 : vector<8x32xf32>
    %543 = vector.extract_strided_slice %534 {offsets = [0, 32], sizes = [8, 32], strides = [1, 1]} : vector<8x128xf32> to vector<8x32xf32>
    %cst_184 = arith.constant 5.000000e-01 : f32
    %544 = vector.broadcast %cst_184 : f32 to vector<8x32xf32>
    %545 = arith.mulf %544, %543 : vector<8x32xf32>
    %546 = math.tanh %545 : vector<8x32xf32>
    %cst_185 = arith.constant 5.000000e-01 : f32
    %547 = vector.broadcast %cst_185 : f32 to vector<8x32xf32>
    %548 = arith.mulf %547, %546 : vector<8x32xf32>
    %cst_186 = arith.constant 5.000000e-01 : f32
    %549 = vector.broadcast %cst_186 : f32 to vector<8x32xf32>
    %550 = arith.addf %548, %549 : vector<8x32xf32>
    %551 = vector.extract_strided_slice %534 {offsets = [0, 64], sizes = [8, 32], strides = [1, 1]} : vector<8x128xf32> to vector<8x32xf32>
    %552 = math.tanh %551 : vector<8x32xf32>
    %553 = vector.extract_strided_slice %534 {offsets = [0, 96], sizes = [8, 32], strides = [1, 1]} : vector<8x128xf32> to vector<8x32xf32>
    %cst_187 = arith.constant 5.000000e-01 : f32
    %554 = vector.broadcast %cst_187 : f32 to vector<8x32xf32>
    %555 = arith.mulf %554, %553 : vector<8x32xf32>
    %556 = math.tanh %555 : vector<8x32xf32>
    %cst_188 = arith.constant 5.000000e-01 : f32
    %557 = vector.broadcast %cst_188 : f32 to vector<8x32xf32>
    %558 = arith.mulf %557, %556 : vector<8x32xf32>
    %cst_189 = arith.constant 5.000000e-01 : f32
    %559 = vector.broadcast %cst_189 : f32 to vector<8x32xf32>
    %560 = arith.addf %558, %559 : vector<8x32xf32>
    %561 = arith.mulf %550, %512 : vector<8x32xf32>
    %562 = arith.mulf %542, %552 : vector<8x32xf32>
    %563 = arith.addf %561, %562 : vector<8x32xf32>
    %564 = math.tanh %563 : vector<8x32xf32>
    %565 = arith.mulf %560, %564 : vector<8x32xf32>
    %566 = arith.truncf %513 : vector<8x32xf32> to vector<8x32xbf16>
    %cst_190 = arith.constant dense<0.000000e+00> : vector<8x128xf32>
    %567 = tpu.matmul %566, %20, %cst_190 {dimension_numbers = #tpu.dot_dimension_numbers<[1], [0], [0], [1], [0, 0, 1, 1], [], []>} : vector<8x32xbf16>, vector<32x128xbf16>, vector<8x128xf32> -> vector<8x128xf32>
    %568 = arith.index_cast %527 : i32 to index
    %c0_191 = arith.constant 0 : index
    %c0_192 = arith.constant 0 : index
    %569 = vector.load %arg16[%568, %c0_191, %c0_192] : memref<8x8x128xbf16, #tpu.memory_space<vmem>>, vector<1x8x128xbf16>
    %570 = vector.shape_cast %569 : vector<1x8x128xbf16> to vector<8x128xbf16>
    %571 = arith.extf %570 : vector<8x128xbf16> to vector<8x128xf32>
    %572 = arith.addf %567, %571 : vector<8x128xf32>
    %573 = vector.extract_strided_slice %572 {offsets = [0, 0], sizes = [8, 32], strides = [1, 1]} : vector<8x128xf32> to vector<8x32xf32>
    %cst_193 = arith.constant 5.000000e-01 : f32
    %574 = vector.broadcast %cst_193 : f32 to vector<8x32xf32>
    %575 = arith.mulf %574, %573 : vector<8x32xf32>
    %576 = math.tanh %575 : vector<8x32xf32>
    %cst_194 = arith.constant 5.000000e-01 : f32
    %577 = vector.broadcast %cst_194 : f32 to vector<8x32xf32>
    %578 = arith.mulf %577, %576 : vector<8x32xf32>
    %cst_195 = arith.constant 5.000000e-01 : f32
    %579 = vector.broadcast %cst_195 : f32 to vector<8x32xf32>
    %580 = arith.addf %578, %579 : vector<8x32xf32>
    %581 = vector.extract_strided_slice %572 {offsets = [0, 32], sizes = [8, 32], strides = [1, 1]} : vector<8x128xf32> to vector<8x32xf32>
    %cst_196 = arith.constant 5.000000e-01 : f32
    %582 = vector.broadcast %cst_196 : f32 to vector<8x32xf32>
    %583 = arith.mulf %582, %581 : vector<8x32xf32>
    %584 = math.tanh %583 : vector<8x32xf32>
    %cst_197 = arith.constant 5.000000e-01 : f32
    %585 = vector.broadcast %cst_197 : f32 to vector<8x32xf32>
    %586 = arith.mulf %585, %584 : vector<8x32xf32>
    %cst_198 = arith.constant 5.000000e-01 : f32
    %587 = vector.broadcast %cst_198 : f32 to vector<8x32xf32>
    %588 = arith.addf %586, %587 : vector<8x32xf32>
    %589 = vector.extract_strided_slice %572 {offsets = [0, 64], sizes = [8, 32], strides = [1, 1]} : vector<8x128xf32> to vector<8x32xf32>
    %590 = math.tanh %589 : vector<8x32xf32>
    %591 = vector.extract_strided_slice %572 {offsets = [0, 96], sizes = [8, 32], strides = [1, 1]} : vector<8x128xf32> to vector<8x32xf32>
    %cst_199 = arith.constant 5.000000e-01 : f32
    %592 = vector.broadcast %cst_199 : f32 to vector<8x32xf32>
    %593 = arith.mulf %592, %591 : vector<8x32xf32>
    %594 = math.tanh %593 : vector<8x32xf32>
    %cst_200 = arith.constant 5.000000e-01 : f32
    %595 = vector.broadcast %cst_200 : f32 to vector<8x32xf32>
    %596 = arith.mulf %595, %594 : vector<8x32xf32>
    %cst_201 = arith.constant 5.000000e-01 : f32
    %597 = vector.broadcast %cst_201 : f32 to vector<8x32xf32>
    %598 = arith.addf %596, %597 : vector<8x32xf32>
    %599 = arith.mulf %588, %514 : vector<8x32xf32>
    %600 = arith.mulf %580, %590 : vector<8x32xf32>
    %601 = arith.addf %599, %600 : vector<8x32xf32>
    %602 = math.tanh %601 : vector<8x32xf32>
    %603 = arith.mulf %598, %602 : vector<8x32xf32>
    %604 = vector.broadcast %c5_i32 : i32 to vector<8x1xi32>
    %605 = arith.cmpi slt, %604, %0 : vector<8x1xi32>
    %606 = vector.shape_cast %605 : vector<8x1xi1> to vector<8x1xi1>
    %607 = vector.broadcast %606 : vector<8x1xi1> to vector<8x32xi1>
    %608 = vector.broadcast %527 : i32 to vector<8x1xi32>
    %609 = arith.cmpi slt, %608, %0 : vector<8x1xi32>
    %610 = vector.shape_cast %609 : vector<8x1xi1> to vector<8x1xi1>
    %611 = vector.broadcast %610 : vector<8x1xi1> to vector<8x32xi1>
    %612 = arith.select %607, %565, %511 : vector<8x32xi1>, vector<8x32xf32>
    %613 = arith.select %607, %563, %512 : vector<8x32xi1>, vector<8x32xf32>
    %614 = arith.select %611, %603, %513 : vector<8x32xi1>, vector<8x32xf32>
    %615 = arith.select %611, %601, %514 : vector<8x32xi1>, vector<8x32xf32>
    %cst_202 = arith.constant 0.000000e+00 : f32
    %616 = vector.broadcast %cst_202 : f32 to vector<8x32xf32>
    %617 = arith.select %607, %565, %616 : vector<8x32xi1>, vector<8x32xf32>
    %618 = arith.index_cast %c5_i32 : i32 to index
    %c0_203 = arith.constant 0 : index
    %c0_204 = arith.constant 0 : index
    %619 = vector.load %arg12[%618, %c0_203, %c0_204] : memref<8x8x64xf32, #tpu.memory_space<vmem>>, vector<1x8x32xf32>
    %620 = vector.shape_cast %619 : vector<1x8x32xf32> to vector<8x32xf32>
    %621 = vector.shape_cast %617 : vector<8x32xf32> to vector<1x8x32xf32>
    tpu.vector_store %arg12[%618, %c0_203, %c0_204], %621 {strides = array<i32>} : memref<8x8x64xf32, #tpu.memory_space<vmem>>, vector<1x8x32xf32>,
    %cst_205 = arith.constant 0.000000e+00 : f32
    %622 = vector.broadcast %cst_205 : f32 to vector<8x32xf32>
    %623 = arith.select %611, %603, %622 : vector<8x32xi1>, vector<8x32xf32>
    %624 = arith.index_cast %527 : i32 to index
    %c0_206 = arith.constant 0 : index
    %c32_207 = arith.constant 32 : index
    %625 = vector.load %arg12[%624, %c0_206, %c32_207] : memref<8x8x64xf32, #tpu.memory_space<vmem>>, vector<1x8x32xf32>
    %626 = vector.shape_cast %625 : vector<1x8x32xf32> to vector<8x32xf32>
    %627 = vector.shape_cast %623 : vector<8x32xf32> to vector<1x8x32xf32>
    tpu.vector_store %arg12[%624, %c0_206, %c32_207], %627 {strides = array<i32>} : memref<8x8x64xf32, #tpu.memory_space<vmem>>, vector<1x8x32xf32>,
    %c6_i32 = arith.constant 6 : i32
    %c7_i32_208 = arith.constant 7 : i32
    %628 = arith.subi %c7_i32_208, %c6_i32 : i32
    %629 = arith.truncf %612 : vector<8x32xf32> to vector<8x32xbf16>
    %cst_209 = arith.constant dense<0.000000e+00> : vector<8x128xf32>
    %630 = tpu.matmul %629, %19, %cst_209 {dimension_numbers = #tpu.dot_dimension_numbers<[1], [0], [0], [1], [0, 0, 1, 1], [], []>} : vector<8x32xbf16>, vector<32x128xbf16>, vector<8x128xf32> -> vector<8x128xf32>
    %631 = arith.index_cast %c6_i32 : i32 to index
    %c0_210 = arith.constant 0 : index
    %c0_211 = arith.constant 0 : index
    %632 = vector.load %arg15[%631, %c0_210, %c0_211] : memref<8x8x128xbf16, #tpu.memory_space<vmem>>, vector<1x8x128xbf16>
    %633 = vector.shape_cast %632 : vector<1x8x128xbf16> to vector<8x128xbf16>
    %634 = arith.extf %633 : vector<8x128xbf16> to vector<8x128xf32>
    %635 = arith.addf %630, %634 : vector<8x128xf32>
    %636 = vector.extract_strided_slice %635 {offsets = [0, 0], sizes = [8, 32], strides = [1, 1]} : vector<8x128xf32> to vector<8x32xf32>
    %cst_212 = arith.constant 5.000000e-01 : f32
    %637 = vector.broadcast %cst_212 : f32 to vector<8x32xf32>
    %638 = arith.mulf %637, %636 : vector<8x32xf32>
    %639 = math.tanh %638 : vector<8x32xf32>
    %cst_213 = arith.constant 5.000000e-01 : f32
    %640 = vector.broadcast %cst_213 : f32 to vector<8x32xf32>
    %641 = arith.mulf %640, %639 : vector<8x32xf32>
    %cst_214 = arith.constant 5.000000e-01 : f32
    %642 = vector.broadcast %cst_214 : f32 to vector<8x32xf32>
    %643 = arith.addf %641, %642 : vector<8x32xf32>
    %644 = vector.extract_strided_slice %635 {offsets = [0, 32], sizes = [8, 32], strides = [1, 1]} : vector<8x128xf32> to vector<8x32xf32>
    %cst_215 = arith.constant 5.000000e-01 : f32
    %645 = vector.broadcast %cst_215 : f32 to vector<8x32xf32>
    %646 = arith.mulf %645, %644 : vector<8x32xf32>
    %647 = math.tanh %646 : vector<8x32xf32>
    %cst_216 = arith.constant 5.000000e-01 : f32
    %648 = vector.broadcast %cst_216 : f32 to vector<8x32xf32>
    %649 = arith.mulf %648, %647 : vector<8x32xf32>
    %cst_217 = arith.constant 5.000000e-01 : f32
    %650 = vector.broadcast %cst_217 : f32 to vector<8x32xf32>
    %651 = arith.addf %649, %650 : vector<8x32xf32>
    %652 = vector.extract_strided_slice %635 {offsets = [0, 64], sizes = [8, 32], strides = [1, 1]} : vector<8x128xf32> to vector<8x32xf32>
    %653 = math.tanh %652 : vector<8x32xf32>
    %654 = vector.extract_strided_slice %635 {offsets = [0, 96], sizes = [8, 32], strides = [1, 1]} : vector<8x128xf32> to vector<8x32xf32>
    %cst_218 = arith.constant 5.000000e-01 : f32
    %655 = vector.broadcast %cst_218 : f32 to vector<8x32xf32>
    %656 = arith.mulf %655, %654 : vector<8x32xf32>
    %657 = math.tanh %656 : vector<8x32xf32>
    %cst_219 = arith.constant 5.000000e-01 : f32
    %658 = vector.broadcast %cst_219 : f32 to vector<8x32xf32>
    %659 = arith.mulf %658, %657 : vector<8x32xf32>
    %cst_220 = arith.constant 5.000000e-01 : f32
    %660 = vector.broadcast %cst_220 : f32 to vector<8x32xf32>
    %661 = arith.addf %659, %660 : vector<8x32xf32>
    %662 = arith.mulf %651, %613 : vector<8x32xf32>
    %663 = arith.mulf %643, %653 : vector<8x32xf32>
    %664 = arith.addf %662, %663 : vector<8x32xf32>
    %665 = math.tanh %664 : vector<8x32xf32>
    %666 = arith.mulf %661, %665 : vector<8x32xf32>
    %667 = arith.truncf %614 : vector<8x32xf32> to vector<8x32xbf16>
    %cst_221 = arith.constant dense<0.000000e+00> : vector<8x128xf32>
    %668 = tpu.matmul %667, %20, %cst_221 {dimension_numbers = #tpu.dot_dimension_numbers<[1], [0], [0], [1], [0, 0, 1, 1], [], []>} : vector<8x32xbf16>, vector<32x128xbf16>, vector<8x128xf32> -> vector<8x128xf32>
    %669 = arith.index_cast %628 : i32 to index
    %c0_222 = arith.constant 0 : index
    %c0_223 = arith.constant 0 : index
    %670 = vector.load %arg16[%669, %c0_222, %c0_223] : memref<8x8x128xbf16, #tpu.memory_space<vmem>>, vector<1x8x128xbf16>
    %671 = vector.shape_cast %670 : vector<1x8x128xbf16> to vector<8x128xbf16>
    %672 = arith.extf %671 : vector<8x128xbf16> to vector<8x128xf32>
    %673 = arith.addf %668, %672 : vector<8x128xf32>
    %674 = vector.extract_strided_slice %673 {offsets = [0, 0], sizes = [8, 32], strides = [1, 1]} : vector<8x128xf32> to vector<8x32xf32>
    %cst_224 = arith.constant 5.000000e-01 : f32
    %675 = vector.broadcast %cst_224 : f32 to vector<8x32xf32>
    %676 = arith.mulf %675, %674 : vector<8x32xf32>
    %677 = math.tanh %676 : vector<8x32xf32>
    %cst_225 = arith.constant 5.000000e-01 : f32
    %678 = vector.broadcast %cst_225 : f32 to vector<8x32xf32>
    %679 = arith.mulf %678, %677 : vector<8x32xf32>
    %cst_226 = arith.constant 5.000000e-01 : f32
    %680 = vector.broadcast %cst_226 : f32 to vector<8x32xf32>
    %681 = arith.addf %679, %680 : vector<8x32xf32>
    %682 = vector.extract_strided_slice %673 {offsets = [0, 32], sizes = [8, 32], strides = [1, 1]} : vector<8x128xf32> to vector<8x32xf32>
    %cst_227 = arith.constant 5.000000e-01 : f32
    %683 = vector.broadcast %cst_227 : f32 to vector<8x32xf32>
    %684 = arith.mulf %683, %682 : vector<8x32xf32>
    %685 = math.tanh %684 : vector<8x32xf32>
    %cst_228 = arith.constant 5.000000e-01 : f32
    %686 = vector.broadcast %cst_228 : f32 to vector<8x32xf32>
    %687 = arith.mulf %686, %685 : vector<8x32xf32>
    %cst_229 = arith.constant 5.000000e-01 : f32
    %688 = vector.broadcast %cst_229 : f32 to vector<8x32xf32>
    %689 = arith.addf %687, %688 : vector<8x32xf32>
    %690 = vector.extract_strided_slice %673 {offsets = [0, 64], sizes = [8, 32], strides = [1, 1]} : vector<8x128xf32> to vector<8x32xf32>
    %691 = math.tanh %690 : vector<8x32xf32>
    %692 = vector.extract_strided_slice %673 {offsets = [0, 96], sizes = [8, 32], strides = [1, 1]} : vector<8x128xf32> to vector<8x32xf32>
    %cst_230 = arith.constant 5.000000e-01 : f32
    %693 = vector.broadcast %cst_230 : f32 to vector<8x32xf32>
    %694 = arith.mulf %693, %692 : vector<8x32xf32>
    %695 = math.tanh %694 : vector<8x32xf32>
    %cst_231 = arith.constant 5.000000e-01 : f32
    %696 = vector.broadcast %cst_231 : f32 to vector<8x32xf32>
    %697 = arith.mulf %696, %695 : vector<8x32xf32>
    %cst_232 = arith.constant 5.000000e-01 : f32
    %698 = vector.broadcast %cst_232 : f32 to vector<8x32xf32>
    %699 = arith.addf %697, %698 : vector<8x32xf32>
    %700 = arith.mulf %689, %615 : vector<8x32xf32>
    %701 = arith.mulf %681, %691 : vector<8x32xf32>
    %702 = arith.addf %700, %701 : vector<8x32xf32>
    %703 = math.tanh %702 : vector<8x32xf32>
    %704 = arith.mulf %699, %703 : vector<8x32xf32>
    %705 = vector.broadcast %c6_i32 : i32 to vector<8x1xi32>
    %706 = arith.cmpi slt, %705, %0 : vector<8x1xi32>
    %707 = vector.shape_cast %706 : vector<8x1xi1> to vector<8x1xi1>
    %708 = vector.broadcast %707 : vector<8x1xi1> to vector<8x32xi1>
    %709 = vector.broadcast %628 : i32 to vector<8x1xi32>
    %710 = arith.cmpi slt, %709, %0 : vector<8x1xi32>
    %711 = vector.shape_cast %710 : vector<8x1xi1> to vector<8x1xi1>
    %712 = vector.broadcast %711 : vector<8x1xi1> to vector<8x32xi1>
    %713 = arith.select %708, %666, %612 : vector<8x32xi1>, vector<8x32xf32>
    %714 = arith.select %708, %664, %613 : vector<8x32xi1>, vector<8x32xf32>
    %715 = arith.select %712, %704, %614 : vector<8x32xi1>, vector<8x32xf32>
    %716 = arith.select %712, %702, %615 : vector<8x32xi1>, vector<8x32xf32>
    %cst_233 = arith.constant 0.000000e+00 : f32
    %717 = vector.broadcast %cst_233 : f32 to vector<8x32xf32>
    %718 = arith.select %708, %666, %717 : vector<8x32xi1>, vector<8x32xf32>
    %719 = arith.index_cast %c6_i32 : i32 to index
    %c0_234 = arith.constant 0 : index
    %c0_235 = arith.constant 0 : index
    %720 = vector.load %arg12[%719, %c0_234, %c0_235] : memref<8x8x64xf32, #tpu.memory_space<vmem>>, vector<1x8x32xf32>
    %721 = vector.shape_cast %720 : vector<1x8x32xf32> to vector<8x32xf32>
    %722 = vector.shape_cast %718 : vector<8x32xf32> to vector<1x8x32xf32>
    tpu.vector_store %arg12[%719, %c0_234, %c0_235], %722 {strides = array<i32>} : memref<8x8x64xf32, #tpu.memory_space<vmem>>, vector<1x8x32xf32>,
    %cst_236 = arith.constant 0.000000e+00 : f32
    %723 = vector.broadcast %cst_236 : f32 to vector<8x32xf32>
    %724 = arith.select %712, %704, %723 : vector<8x32xi1>, vector<8x32xf32>
    %725 = arith.index_cast %628 : i32 to index
    %c0_237 = arith.constant 0 : index
    %c32_238 = arith.constant 32 : index
    %726 = vector.load %arg12[%725, %c0_237, %c32_238] : memref<8x8x64xf32, #tpu.memory_space<vmem>>, vector<1x8x32xf32>
    %727 = vector.shape_cast %726 : vector<1x8x32xf32> to vector<8x32xf32>
    %728 = vector.shape_cast %724 : vector<8x32xf32> to vector<1x8x32xf32>
    tpu.vector_store %arg12[%725, %c0_237, %c32_238], %728 {strides = array<i32>} : memref<8x8x64xf32, #tpu.memory_space<vmem>>, vector<1x8x32xf32>,
    %c7_i32_239 = arith.constant 7 : i32
    %c7_i32_240 = arith.constant 7 : i32
    %729 = arith.subi %c7_i32_240, %c7_i32_239 : i32
    %730 = arith.truncf %713 : vector<8x32xf32> to vector<8x32xbf16>
    %cst_241 = arith.constant dense<0.000000e+00> : vector<8x128xf32>
    %731 = tpu.matmul %730, %19, %cst_241 {dimension_numbers = #tpu.dot_dimension_numbers<[1], [0], [0], [1], [0, 0, 1, 1], [], []>} : vector<8x32xbf16>, vector<32x128xbf16>, vector<8x128xf32> -> vector<8x128xf32>
    %732 = arith.index_cast %c7_i32_239 : i32 to index
    %c0_242 = arith.constant 0 : index
    %c0_243 = arith.constant 0 : index
    %733 = vector.load %arg15[%732, %c0_242, %c0_243] : memref<8x8x128xbf16, #tpu.memory_space<vmem>>, vector<1x8x128xbf16>
    %734 = vector.shape_cast %733 : vector<1x8x128xbf16> to vector<8x128xbf16>
    %735 = arith.extf %734 : vector<8x128xbf16> to vector<8x128xf32>
    %736 = arith.addf %731, %735 : vector<8x128xf32>
    %737 = vector.extract_strided_slice %736 {offsets = [0, 0], sizes = [8, 32], strides = [1, 1]} : vector<8x128xf32> to vector<8x32xf32>
    %cst_244 = arith.constant 5.000000e-01 : f32
    %738 = vector.broadcast %cst_244 : f32 to vector<8x32xf32>
    %739 = arith.mulf %738, %737 : vector<8x32xf32>
    %740 = math.tanh %739 : vector<8x32xf32>
    %cst_245 = arith.constant 5.000000e-01 : f32
    %741 = vector.broadcast %cst_245 : f32 to vector<8x32xf32>
    %742 = arith.mulf %741, %740 : vector<8x32xf32>
    %cst_246 = arith.constant 5.000000e-01 : f32
    %743 = vector.broadcast %cst_246 : f32 to vector<8x32xf32>
    %744 = arith.addf %742, %743 : vector<8x32xf32>
    %745 = vector.extract_strided_slice %736 {offsets = [0, 32], sizes = [8, 32], strides = [1, 1]} : vector<8x128xf32> to vector<8x32xf32>
    %cst_247 = arith.constant 5.000000e-01 : f32
    %746 = vector.broadcast %cst_247 : f32 to vector<8x32xf32>
    %747 = arith.mulf %746, %745 : vector<8x32xf32>
    %748 = math.tanh %747 : vector<8x32xf32>
    %cst_248 = arith.constant 5.000000e-01 : f32
    %749 = vector.broadcast %cst_248 : f32 to vector<8x32xf32>
    %750 = arith.mulf %749, %748 : vector<8x32xf32>
    %cst_249 = arith.constant 5.000000e-01 : f32
    %751 = vector.broadcast %cst_249 : f32 to vector<8x32xf32>
    %752 = arith.addf %750, %751 : vector<8x32xf32>
    %753 = vector.extract_strided_slice %736 {offsets = [0, 64], sizes = [8, 32], strides = [1, 1]} : vector<8x128xf32> to vector<8x32xf32>
    %754 = math.tanh %753 : vector<8x32xf32>
    %755 = vector.extract_strided_slice %736 {offsets = [0, 96], sizes = [8, 32], strides = [1, 1]} : vector<8x128xf32> to vector<8x32xf32>
    %cst_250 = arith.constant 5.000000e-01 : f32
    %756 = vector.broadcast %cst_250 : f32 to vector<8x32xf32>
    %757 = arith.mulf %756, %755 : vector<8x32xf32>
    %758 = math.tanh %757 : vector<8x32xf32>
    %cst_251 = arith.constant 5.000000e-01 : f32
    %759 = vector.broadcast %cst_251 : f32 to vector<8x32xf32>
    %760 = arith.mulf %759, %758 : vector<8x32xf32>
    %cst_252 = arith.constant 5.000000e-01 : f32
    %761 = vector.broadcast %cst_252 : f32 to vector<8x32xf32>
    %762 = arith.addf %760, %761 : vector<8x32xf32>
    %763 = arith.mulf %752, %714 : vector<8x32xf32>
    %764 = arith.mulf %744, %754 : vector<8x32xf32>
    %765 = arith.addf %763, %764 : vector<8x32xf32>
    %766 = math.tanh %765 : vector<8x32xf32>
    %767 = arith.mulf %762, %766 : vector<8x32xf32>
    %768 = arith.truncf %715 : vector<8x32xf32> to vector<8x32xbf16>
    %cst_253 = arith.constant dense<0.000000e+00> : vector<8x128xf32>
    %769 = tpu.matmul %768, %20, %cst_253 {dimension_numbers = #tpu.dot_dimension_numbers<[1], [0], [0], [1], [0, 0, 1, 1], [], []>} : vector<8x32xbf16>, vector<32x128xbf16>, vector<8x128xf32> -> vector<8x128xf32>
    %770 = arith.index_cast %729 : i32 to index
    %c0_254 = arith.constant 0 : index
    %c0_255 = arith.constant 0 : index
    %771 = vector.load %arg16[%770, %c0_254, %c0_255] : memref<8x8x128xbf16, #tpu.memory_space<vmem>>, vector<1x8x128xbf16>
    %772 = vector.shape_cast %771 : vector<1x8x128xbf16> to vector<8x128xbf16>
    %773 = arith.extf %772 : vector<8x128xbf16> to vector<8x128xf32>
    %774 = arith.addf %769, %773 : vector<8x128xf32>
    %775 = vector.extract_strided_slice %774 {offsets = [0, 0], sizes = [8, 32], strides = [1, 1]} : vector<8x128xf32> to vector<8x32xf32>
    %cst_256 = arith.constant 5.000000e-01 : f32
    %776 = vector.broadcast %cst_256 : f32 to vector<8x32xf32>
    %777 = arith.mulf %776, %775 : vector<8x32xf32>
    %778 = math.tanh %777 : vector<8x32xf32>
    %cst_257 = arith.constant 5.000000e-01 : f32
    %779 = vector.broadcast %cst_257 : f32 to vector<8x32xf32>
    %780 = arith.mulf %779, %778 : vector<8x32xf32>
    %cst_258 = arith.constant 5.000000e-01 : f32
    %781 = vector.broadcast %cst_258 : f32 to vector<8x32xf32>
    %782 = arith.addf %780, %781 : vector<8x32xf32>
    %783 = vector.extract_strided_slice %774 {offsets = [0, 32], sizes = [8, 32], strides = [1, 1]} : vector<8x128xf32> to vector<8x32xf32>
    %cst_259 = arith.constant 5.000000e-01 : f32
    %784 = vector.broadcast %cst_259 : f32 to vector<8x32xf32>
    %785 = arith.mulf %784, %783 : vector<8x32xf32>
    %786 = math.tanh %785 : vector<8x32xf32>
    %cst_260 = arith.constant 5.000000e-01 : f32
    %787 = vector.broadcast %cst_260 : f32 to vector<8x32xf32>
    %788 = arith.mulf %787, %786 : vector<8x32xf32>
    %cst_261 = arith.constant 5.000000e-01 : f32
    %789 = vector.broadcast %cst_261 : f32 to vector<8x32xf32>
    %790 = arith.addf %788, %789 : vector<8x32xf32>
    %791 = vector.extract_strided_slice %774 {offsets = [0, 64], sizes = [8, 32], strides = [1, 1]} : vector<8x128xf32> to vector<8x32xf32>
    %792 = math.tanh %791 : vector<8x32xf32>
    %793 = vector.extract_strided_slice %774 {offsets = [0, 96], sizes = [8, 32], strides = [1, 1]} : vector<8x128xf32> to vector<8x32xf32>
    %cst_262 = arith.constant 5.000000e-01 : f32
    %794 = vector.broadcast %cst_262 : f32 to vector<8x32xf32>
    %795 = arith.mulf %794, %793 : vector<8x32xf32>
    %796 = math.tanh %795 : vector<8x32xf32>
    %cst_263 = arith.constant 5.000000e-01 : f32
    %797 = vector.broadcast %cst_263 : f32 to vector<8x32xf32>
    %798 = arith.mulf %797, %796 : vector<8x32xf32>
    %cst_264 = arith.constant 5.000000e-01 : f32
    %799 = vector.broadcast %cst_264 : f32 to vector<8x32xf32>
    %800 = arith.addf %798, %799 : vector<8x32xf32>
    %801 = arith.mulf %790, %716 : vector<8x32xf32>
    %802 = arith.mulf %782, %792 : vector<8x32xf32>
    %803 = arith.addf %801, %802 : vector<8x32xf32>
    %804 = math.tanh %803 : vector<8x32xf32>
    %805 = arith.mulf %800, %804 : vector<8x32xf32>
    %806 = vector.broadcast %c7_i32_239 : i32 to vector<8x1xi32>
    %807 = arith.cmpi slt, %806, %0 : vector<8x1xi32>
    %808 = vector.shape_cast %807 : vector<8x1xi1> to vector<8x1xi1>
    %809 = vector.broadcast %808 : vector<8x1xi1> to vector<8x32xi1>
    %810 = vector.broadcast %729 : i32 to vector<8x1xi32>
    %811 = arith.cmpi slt, %810, %0 : vector<8x1xi32>
    %812 = vector.shape_cast %811 : vector<8x1xi1> to vector<8x1xi1>
    %813 = vector.broadcast %812 : vector<8x1xi1> to vector<8x32xi1>
    %814 = arith.select %809, %767, %713 : vector<8x32xi1>, vector<8x32xf32>
    %815 = arith.select %809, %765, %714 : vector<8x32xi1>, vector<8x32xf32>
    %816 = arith.select %813, %805, %715 : vector<8x32xi1>, vector<8x32xf32>
    %817 = arith.select %813, %803, %716 : vector<8x32xi1>, vector<8x32xf32>
    %cst_265 = arith.constant 0.000000e+00 : f32
    %818 = vector.broadcast %cst_265 : f32 to vector<8x32xf32>
    %819 = arith.select %809, %767, %818 : vector<8x32xi1>, vector<8x32xf32>
    %820 = arith.index_cast %c7_i32_239 : i32 to index
    %c0_266 = arith.constant 0 : index
    %c0_267 = arith.constant 0 : index
    %821 = vector.load %arg12[%820, %c0_266, %c0_267] : memref<8x8x64xf32, #tpu.memory_space<vmem>>, vector<1x8x32xf32>
    %822 = vector.shape_cast %821 : vector<1x8x32xf32> to vector<8x32xf32>
    %823 = vector.shape_cast %819 : vector<8x32xf32> to vector<1x8x32xf32>
    tpu.vector_store %arg12[%820, %c0_266, %c0_267], %823 {strides = array<i32>} : memref<8x8x64xf32, #tpu.memory_space<vmem>>, vector<1x8x32xf32>,
    %cst_268 = arith.constant 0.000000e+00 : f32
    %824 = vector.broadcast %cst_268 : f32 to vector<8x32xf32>
    %825 = arith.select %813, %805, %824 : vector<8x32xi1>, vector<8x32xf32>
    %826 = arith.index_cast %729 : i32 to index
    %c0_269 = arith.constant 0 : index
    %c32_270 = arith.constant 32 : index
    %827 = vector.load %arg12[%826, %c0_269, %c32_270] : memref<8x8x64xf32, #tpu.memory_space<vmem>>, vector<1x8x32xf32>
    %828 = vector.shape_cast %827 : vector<1x8x32xf32> to vector<8x32xf32>
    %829 = vector.shape_cast %825 : vector<8x32xf32> to vector<1x8x32xf32>
    tpu.vector_store %arg12[%826, %c0_269, %c32_270], %829 {strides = array<i32>} : memref<8x8x64xf32, #tpu.memory_space<vmem>>, vector<1x8x32xf32>,
    %c8_i32 = arith.constant 8 : i32
    %830 = tpu.concatenate %814, %815 in 0 : vector<8x32xf32>, vector<8x32xf32> -> vector<16x32xf32>
    %831 = arith.truncf %830 : vector<16x32xf32> to vector<16x32xbf16>
    %832 = tpu.concatenate %816, %817 in 0 : vector<8x32xf32>, vector<8x32xf32> -> vector<16x32xf32>
    %833 = arith.truncf %832 : vector<16x32xf32> to vector<16x32xbf16>
    %c0_271 = arith.constant 0 : index
    %c0_272 = arith.constant 0 : index
    %834 = vector.load %arg9[%c0_271, %c0_272] : memref<32x32xbf16, #tpu.memory_space<vmem>>, vector<32x32xbf16>
    %cst_273 = arith.constant dense<0.000000e+00> : vector<16x32xf32>
    %835 = tpu.matmul %831, %834, %cst_273 {dimension_numbers = #tpu.dot_dimension_numbers<[1], [0], [0], [1], [0, 0, 1, 1], [], []>} : vector<16x32xbf16>, vector<32x32xbf16>, vector<16x32xf32> -> vector<16x32xf32>
    %c0_274 = arith.constant 0 : index
    %c0_275 = arith.constant 0 : index
    %836 = vector.load %arg10[%c0_274, %c0_275] : memref<32x32xbf16, #tpu.memory_space<vmem>>, vector<32x32xbf16>
    %cst_276 = arith.constant dense<0.000000e+00> : vector<16x32xf32>
    %837 = tpu.matmul %833, %836, %cst_276 {dimension_numbers = #tpu.dot_dimension_numbers<[1], [0], [0], [1], [0, 0, 1, 1], [], []>} : vector<16x32xbf16>, vector<32x32xbf16>, vector<16x32xf32> -> vector<16x32xf32>
    %838 = arith.addf %835, %837 : vector<16x32xf32>
    %c0_277 = arith.constant 0 : index
    %c0_278 = arith.constant 0 : index
    %839 = vector.load %arg11[%c0_277, %c0_278] : memref<1x32xf32, #tpu.memory_space<vmem>>, vector<1x32xf32>
    %840 = vector.broadcast %839 : vector<1x32xf32> to vector<16x32xf32>
    %841 = arith.addf %838, %840 : vector<16x32xf32>
    %842 = math.tanh %841 : vector<16x32xf32>
    %843 = vector.extract_strided_slice %842 {offsets = [0, 0], sizes = [8, 32], strides = [1, 1]} : vector<16x32xf32> to vector<8x32xf32>
    %c0_279 = arith.constant 0 : index
    %c0_280 = arith.constant 0 : index
    %844 = vector.load %arg13[%c0_279, %c0_280] : memref<8x32xf32, #tpu.memory_space<vmem>>, vector<8x32xf32>
    tpu.vector_store %arg13[%c0_279, %c0_280], %843 {strides = array<i32>} : memref<8x32xf32, #tpu.memory_space<vmem>>, vector<8x32xf32>,
    %845 = vector.extract_strided_slice %842 {offsets = [8, 0], sizes = [8, 32], strides = [1, 1]} : vector<16x32xf32> to vector<8x32xf32>
    %c0_281 = arith.constant 0 : index
    %c0_282 = arith.constant 0 : index
    %846 = vector.load %arg14[%c0_281, %c0_282] : memref<8x32xf32, #tpu.memory_space<vmem>>, vector<8x32xf32>
    tpu.vector_store %arg14[%c0_281, %c0_282], %845 {strides = array<i32>} : memref<8x32xf32, #tpu.memory_space<vmem>>, vector<8x32xf32>,
    return
  }
  func.func @transform_0(%arg0: i32) -> (i32, i32, i32) {
    %c0_i32 = arith.constant 0 : i32
    %c0_i32_0 = arith.constant 0 : i32
    %c0_i32_1 = arith.constant 0 : i32
    return %c0_i32, %arg0, %c0_i32_0 : i32, i32, i32
  }
  func.func @transform_1(%arg0: i32) -> (i32, i32) {
    %c0_i32 = arith.constant 0 : i32
    %c0_i32_0 = arith.constant 0 : i32
    return %arg0, %c0_i32 : i32, i32
  }
  func.func @transform_2(%arg0: i32) -> (i32, i32) {
    %c0_i32 = arith.constant 0 : i32
    %c0_i32_0 = arith.constant 0 : i32
    %c0_i32_1 = arith.constant 0 : i32
    return %c0_i32, %c0_i32_0 : i32, i32
  }
  func.func @transform_3(%arg0: i32) -> (i32, i32) {
    %c0_i32 = arith.constant 0 : i32
    %c0_i32_0 = arith.constant 0 : i32
    %c0_i32_1 = arith.constant 0 : i32
    return %c0_i32, %c0_i32_0 : i32, i32
  }
  func.func @transform_4(%arg0: i32) -> (i32, i32) {
    %c0_i32 = arith.constant 0 : i32
    %c0_i32_0 = arith.constant 0 : i32
    %c0_i32_1 = arith.constant 0 : i32
    return %c0_i32, %c0_i32_0 : i32, i32
  }
  func.func @transform_5(%arg0: i32) -> (i32, i32) {
    %c0_i32 = arith.constant 0 : i32
    %c0_i32_0 = arith.constant 0 : i32
    %c0_i32_1 = arith.constant 0 : i32
    return %c0_i32, %c0_i32_0 : i32, i32
  }
  func.func @transform_6(%arg0: i32) -> (i32, i32) {
    %c0_i32 = arith.constant 0 : i32
    %c0_i32_0 = arith.constant 0 : i32
    %c0_i32_1 = arith.constant 0 : i32
    return %c0_i32, %c0_i32_0 : i32, i32
  }
  func.func @transform_7(%arg0: i32) -> (i32, i32) {
    %c0_i32 = arith.constant 0 : i32
    %c0_i32_0 = arith.constant 0 : i32
    %c0_i32_1 = arith.constant 0 : i32
    return %c0_i32, %c0_i32_0 : i32, i32
  }
  func.func @transform_8(%arg0: i32) -> (i32, i32) {
    %c0_i32 = arith.constant 0 : i32
    %c0_i32_0 = arith.constant 0 : i32
    %c0_i32_1 = arith.constant 0 : i32
    return %c0_i32, %c0_i32_0 : i32, i32
  }
  func.func @transform_9(%arg0: i32) -> (i32, i32) {
    %c0_i32 = arith.constant 0 : i32
    %c0_i32_0 = arith.constant 0 : i32
    %c0_i32_1 = arith.constant 0 : i32
    return %c0_i32, %c0_i32_0 : i32, i32
  }
  func.func @transform_10(%arg0: i32) -> (i32, i32) {
    %c0_i32 = arith.constant 0 : i32
    %c0_i32_0 = arith.constant 0 : i32
    %c0_i32_1 = arith.constant 0 : i32
    return %c0_i32, %c0_i32_0 : i32, i32
  }
  func.func @transform_11(%arg0: i32) -> (i32, i32, i32) {
    %c0_i32 = arith.constant 0 : i32
    %c0_i32_0 = arith.constant 0 : i32
    %c0_i32_1 = arith.constant 0 : i32
    return %c0_i32, %arg0, %c0_i32_0 : i32, i32, i32
  }
  func.func @transform_12(%arg0: i32) -> (i32, i32) {
    %c0_i32 = arith.constant 0 : i32
    %c0_i32_0 = arith.constant 0 : i32
    return %arg0, %c0_i32 : i32, i32
  }
  func.func @transform_13(%arg0: i32) -> (i32, i32) {
    %c0_i32 = arith.constant 0 : i32
    %c0_i32_0 = arith.constant 0 : i32
    return %arg0, %c0_i32 : i32, i32
  }
}

</mosaic_0001>

<bundles_post_ra>
// kernel: tpu_custom_call.1
= control target key start
LH: loop header
LB: loop body
LE: loop exit
PB: predicated region body
PF: predicated region fallthrough
CT: control target
= control target key end

     0   :  { %19 = vsyncpa [#allocation5], 0  ;;  %s3500_s0 = inlined_call_operand.hbm [shape: bf16[8,8,32], index: 0, kind: input, shape index: {}]   ;;  %s3501_s1 = inlined_call_operand.vmem [shape: s32[8,1], index: 1, kind: input, shape index: {}]   ;;  %s3502_s2 = inlined_call_operand.vmem [shape: bf16[32,128], index: 2, kind: input, shape index: {}]   ;;  %s3503_s3 = inlined_call_operand.hbm [shape: bf16[32,128], index: 3, kind: input, shape index: {}]   ;;  %s3504_s4 = inlined_call_operand.vmem [shape: f32[1,128], index: 4, kind: input, shape index: {}]   ;;  %s3505_s5 = inlined_call_operand.vmem [shape: f32[1,128], index: 5, kind: input, shape index: {}]   ;;  %s3506_s6 = inlined_call_operand.hbm [shape: bf16[32,128], index: 6, kind: input, shape index: {}]   ;;  %s3507_s7 = inlined_call_operand.vmem [shape: bf16[32,128], index: 7, kind: input, shape index: {}]   ;;  %s3508_s8 = inlined_call_operand.hbm [shape: bf16[32,32], index: 8, kind: input, shape index: {}]   ;;  %s3509_s9 = inlined_call_operand.hbm [shape: bf16[32,32], index: 9, kind: input, shape index: {}]   ;;  %s3510_s10 = inlined_call_operand.vmem [shape: f32[1,32], index: 10, kind: input, shape index: {}]   ;;  %s3511_s11 = inlined_call_operand.hbm [shape: f32[8,8,64], index: 11, kind: output, shape index: {0}]   ;;  %s3512_s12 = inlined_call_operand.hbm [shape: f32[8,32], index: 12, kind: output, shape index: {1}]   ;;  %s3513_s13 = inlined_call_operand.hbm [shape: f32[8,32], index: 13, kind: output, shape index: {2}]  }
   0x1   :  { %20 = vsyncpa [#allocation8], 0 }
   0x2   :  { %21 = vsyncpa [#allocation11], 0 }
   0x3   :  { %22 = vsyncpa [#allocation6], 0 }
   0x4   :  { %23 = vsyncpa [#allocation15], 0  ;;  %s2642_s25 = smov [#allocation7]   ;;  %s2643_s27 = smov [#allocation10]  }
   0x5   :  { %s45_s26 = sshll.u32 %s2642_s25, 4  ;;  %s75_s28 = sshll.u32 %s2643_s27, 4  ;;  %s46_s26 = int_to_ptr.vmem [resolvable:$true] %s45_s26  ;;  %s2728_s28 = int_to_ptr.vmem [resolvable:$true] %s75_s28 }
   0x6   :  { %s2456_s14 = scalar_lea.hbm %s3503_s3, 256 }
   0x7   :  { %p2457_p0 = scmp.ne.s32.totalorder %s3503_s3, %s2456_s14  ;;  %p2460_p1 = scmp.lt.u32.totalorder %s2456_s14, %s3503_s3 }
   0x9   :  { %p2462_p2 = pnand %p2460_p1, %p2457_p0 }
   0xb   :  { %2465 = shalt.err (!%p2462_p2)
}
   0xc   :  { %s2466_s19 = scalar_lea.vmem %s46_s26, 256  ;;  %p2471_p4 = scmp.lt.s32.totalorder %s46_s26, %s46_s26 }
   0xd   :  { %p2467_p3 = scmp.ne.s32.totalorder %s46_s26, %s2466_s19  ;;  %p2472_p5 = scmp.lt.s32.totalorder %s2466_s19, %s2466_s19 }
   0xf   :  { %p2473_p6 = por %p2472_p5, %p2471_p4 }
  0x11   :  { %p2474_p7 = pnand %p2473_p6, %p2467_p3 }
  0x13   :  { %2477 = shalt.err (!%p2474_p7)
}
  0x14   :  { %s2644_s20 = smov 64   ;;  %s2645_s21 = smov 4  }
  0x15   :  { %51 = dma.hbm_to_vmem [thread:$0]  %s3503_s3, 256, %s46_s26, [#allocation8], %s2644_s20, %s2644_s20, %s2645_s21  }
  0x16   :  { %s2478_s27 = scalar_lea.hbm %s3508_s8, 256 }
  0x17   :  { %p2479_p8 = scmp.ne.s32.totalorder %s3508_s8, %s2478_s27  ;;  %p2482_p9 = scmp.lt.u32.totalorder %s2478_s27, %s3508_s8 }
  0x19   :  { %p2484_p10 = pnand %p2482_p9, %p2479_p8 }
  0x1b   :  { %2487 = shalt.err (!%p2484_p10)
}
  0x1c   :  { %s2488_s16 = scalar_lea.vmem %s2728_s28, 256  ;;  %p2493_p12 = scmp.lt.s32.totalorder %s2728_s28, %s2728_s28 }
  0x1d   :  { %p2489_p11 = scmp.ne.s32.totalorder %s2728_s28, %s2488_s16  ;;  %p2494_p13 = scmp.lt.s32.totalorder %s2488_s16, %s2488_s16 }
  0x1f   :  { %p2495_p0 = por %p2494_p13, %p2493_p12 }
  0x21   :  { %p2496_p1 = pnand %p2495_p0, %p2489_p11 }
  0x23   :  { %2499 = shalt.err (!%p2496_p1)
}
  0x24   :  { %81 = dma.hbm_to_vmem [thread:$0]  %s3508_s8, 256, %s2728_s28, [#allocation11], %s2644_s20, %s2644_s20, %s2645_s21  }
  0x25   :  { %s2646_s17 = smov [#allocation4]   ;;  %s2647_s19 = smov [#allocation9]  }
  0x26   :  { %s29_s18 = sshll.u32 %s2646_s17, 4  ;;  %s61_s22 = sshll.u32 %s2647_s19, 4  ;;  %s30_s18 = int_to_ptr.vmem [resolvable:$true] %s29_s18  ;;  %s2765_s22 = int_to_ptr.vmem [resolvable:$true] %s61_s22 }
  0x27   :  { %s2500_s25 = scalar_lea.hbm %s3500_s0, 512 }
  0x28   :  { %p2501_p2 = scmp.ne.s32.totalorder %s3500_s0, %s2500_s25  ;;  %p2504_p3 = scmp.lt.u32.totalorder %s2500_s25, %s3500_s0 }
  0x2a   :  { %p2506_p4 = pnand %p2504_p3, %p2501_p2 }
  0x2c   :  { %2509 = shalt.err (!%p2506_p4)
}
  0x2d   :  { %s2510_s8 = scalar_lea.vmem %s30_s18, 512  ;;  %p2515_p6 = scmp.lt.s32.totalorder %s30_s18, %s30_s18 }
  0x2e   :  { %p2511_p5 = scmp.ne.s32.totalorder %s30_s18, %s2510_s8  ;;  %p2516_p7 = scmp.lt.s32.totalorder %s2510_s8, %s2510_s8 }
  0x30   :  { %p2517_p8 = por %p2516_p7, %p2515_p6 }
  0x32   :  { %p2518_p9 = pnand %p2517_p8, %p2511_p5 }
  0x34   :  { %2521 = shalt.err (!%p2518_p9)
}
  0x35   :  { %35 = dma.hbm_to_vmem [thread:$0]  %s3500_s0, 512, %s30_s18, [#allocation5], %s2644_s20, %s2644_s20, %s2645_s21  }
  0x36   :  { %s2522_s26 = scalar_lea.hbm %s3506_s6, 256 }
  0x37   :  { %p2523_p10 = scmp.ne.s32.totalorder %s3506_s6, %s2522_s26  ;;  %p2526_p11 = scmp.lt.u32.totalorder %s2522_s26, %s3506_s6 }
  0x39   :  { %p2528_p12 = pnand %p2526_p11, %p2523_p10 }
  0x3b   :  { %2531 = shalt.err (!%p2528_p12)
}
  0x3c   :  { %s2532_s25 = scalar_lea.vmem %s2765_s22, 256  ;;  %p2537_p0 = scmp.lt.s32.totalorder %s2765_s22, %s2765_s22 }
  0x3d   :  { %p2533_p13 = scmp.ne.s32.totalorder %s2765_s22, %s2532_s25  ;;  %p2538_p1 = scmp.lt.s32.totalorder %s2532_s25, %s2532_s25 }
  0x3f   :  { %p2539_p2 = por %p2538_p1, %p2537_p0 }
  0x41   :  { %p2540_p3 = pnand %p2539_p2, %p2533_p13 }
  0x43   :  { %2543 = shalt.err (!%p2540_p3)
}
  0x44   :  { %67 = dma.hbm_to_vmem [thread:$0]  %s3506_s6, 256, %s2765_s22, [#allocation8], %s2644_s20, %s2644_s20, %s2645_s21  }
  0x45   :  { %s2648_s27 = smov [#allocation12]   ;;  %s2544_s8 = scalar_lea.hbm %s3509_s9, 256 }
  0x46   :  { %s87_s29 = sshll.u32 %s2648_s27, 4  ;;  %p2545_p4 = scmp.ne.s32.totalorder %s3509_s9, %s2544_s8  ;;  %s88_s29 = int_to_ptr.vmem [resolvable:$true] %s87_s29 }
  0x47   :  { %p2548_p5 = scmp.lt.u32.totalorder %s2544_s8, %s3509_s9 }
  0x49   :  { %p2550_p6 = pnand %p2548_p5, %p2545_p4 }
  0x4b   :  { %2553 = shalt.err (!%p2550_p6)
}
  0x4c   :  { %s2554_s26 = scalar_lea.vmem %s88_s29, 256  ;;  %p2559_p8 = scmp.lt.s32.totalorder %s88_s29, %s88_s29 }
  0x4d   :  { %p2555_p7 = scmp.ne.s32.totalorder %s88_s29, %s2554_s26  ;;  %p2560_p9 = scmp.lt.s32.totalorder %s2554_s26, %s2554_s26 }
  0x4f   :  { %p2561_p10 = por %p2560_p9, %p2559_p8 }
  0x51   :  { %p2562_p11 = pnand %p2561_p10, %p2555_p7 }
  0x53   :  { %2565 = shalt.err (!%p2562_p11)
}
  0x54   :  { %93 = dma.hbm_to_vmem [thread:$0]  %s3509_s9, 256, %s88_s29, [#allocation11], %s2644_s20, %s2644_s20, %s2645_s21  }
  0x55   :  { %2632 = dma.done.wait [#allocation5], 512  }
  0x56   :  { %2633 = vsyncadd [#allocation5], 4294966784 }
  0x57   :  { %2634 = dma.done.wait [#allocation8], 512  }
  0x58   :  { %2635 = vsyncadd [#allocation8], 4294966784 }
  0x59   :  { %2636 = dma.done.wait [#allocation11], 512  }
  0x5a   :  { %2637 = vsyncadd [#allocation11], 4294966784  ;;  %v2649_v0 = vmov 0   ;;  %v2336_v1 = vld [vmem:[%s3502_s2] sm:$0xff]   ;;  %v2338_v3 = vld [vmem:[%s3502_s2 + $0x8] sm:$0xff]   ;;  %vm164_vm0 = vcmask 261120  }
  0x5b   :  { %2329 = vset.pattern.permute.xlu0 %v2649_v0  ;;  %2330 = vset.pattern.permute.xlu1 %v2649_v0  ;;  %v2337_v2 = vld [vmem:[#allocation7] sm:$0xff]   ;;  %v2339_v4 = vld [vmem:[#allocation7 + $0x8] sm:$0xff]   ;;  %v2827_v7 = vld [vmem:[#allocation9] sm:$0xff]   ;;  %v2650_v8 = vmov 0.0   ;;  %vm2651_vm1 = vmmov 0  }
  0x5c   :  { %2145 = vmatprep.subr.bf16.mxu0 %v2336_v1  ;;  %2157 = vmatprep.subr.bf16.mxu1 %v2337_v2  ;;  %v2340_v5 = vld [vmem:[#allocation4] sm:$0xff]   ;;  %v2341_v6 = vld [vmem:[#allocation4 + $0x8] sm:$0xff]   ;;  %v2343_v9 = vld [vmem:[#allocation4 + $0x10] sm:$0xff]  }
  0x5d   :  { %2146 = vmatpush3.bf16.msra.mxu0 %v2336_v1  ;;  %2158 = vmatpush3.bf16.msra.mxu1 %v2337_v2  ;;  %v2834_v10 = vld [vmem:[%s3507_s7] sm:$0xff]   ;;  %v2837_v11 = vld [vmem:[#allocation9 + $0x8] sm:$0xff]   ;;  %v2844_v12 = vld [vmem:[%s3507_s7 + $0x8] sm:$0xff]  }
  0x5e   :  { %2147 = vmatprep.subr.bf16.mxu0 %v2338_v3  ;;  %2159 = vmatprep.subr.bf16.mxu1 %v2339_v4  ;;  %v2344_v13 = vld [vmem:[#allocation4 + $0x18] sm:$0xff]   ;;  %v1958_v14 = vld [vmem:[%s3504_s4] ss:$0 sm:$0xff] }
  0x5f   :  { %2149 = vmatprep.mubr.msk.bf16.mxu0 %vm164_vm0, %v2340_v5  ;;  %2161 = vmatprep.mubr.msk.bf16.mxu1 %vm164_vm0, %v2340_v5  ;;  %v1969_v18 = vld [vmem:[%s3505_s5] ss:$0 sm:$0xff] }
  0x61   :  { %2148 = vmatpush3.bf16.msra.mxu0 %v2338_v3  ;;  %2160 = vmatpush3.bf16.msra.mxu1 %v2339_v4 }
  0x62   :  { %2169 = vmatprep.subr.bf16.mxu0 %v2650_v8  ;;  %2177 = vmatprep.subr.bf16.mxu1 %v2650_v8 }
  0x64   :  { %2150 = vmatmul.mubr.msk.bf16.vlgmr.msra.gmra.mrb[0].mxu0 %vm164_vm0, %v2341_v6  ;;  %2162 = vmatmul.mubr.msk.bf16.vlgmr.msra.gmra.mrb[0].mxu1 %vm164_vm0, %v2341_v6 }
  0x65   :  { %2170 = vmatpush3.bf16.msra.mxu0 %v2827_v7  ;;  %2165 = vmatprep.mubr.msk.bf16.mxu1 %vm164_vm0, %v2343_v9 }
  0x66   :  { %2153 = vmatprep.mubr.msk.bf16.mxu0 %vm164_vm0, %v2343_v9  ;;  %2178 = vmatpush3.bf16.msra.mxu1 %v2834_v10 }
  0x67   :  { %2171 = vmatprep.subr.bf16.mxu0 %v2650_v8  ;;  %2179 = vmatprep.subr.bf16.mxu1 %v2650_v8 }
  0x69   :  { %2172 = vmatpush3.bf16.msra.mxu0 %v2837_v11 }
  0x6a   :  { %2185 = vmatprep.subr.bf16.mxu0 %v2650_v8  ;;  %2180 = vmatpush3.bf16.msra.mxu1 %v2844_v12 }
  0x6b   :  { %2193 = vmatprep.subr.bf16.mxu1 %v2650_v8 }
  0x6c   :  { %2154 = vmatmul.mubr.msk.bf16.gmra.mrb[4].mxu0 %vm164_vm0, %v2344_v13  ;;  %2166 = vmatmul.mubr.msk.bf16.gmra.mrb[4].mxu1 %vm164_vm0, %v2344_v13  ;;  %v2891_v13 = vld [vmem:[%s3501_s1] sm:$0xff]  ;;  %s2652_s1 = smov 32  }
  0x6d   :  { %2173 = vmatprep.mubr.msk.bf16.mxu0 %vm2651_vm1, %v2650_v8  ;;  %2181 = vmatprep.mubr.msk.bf16.mxu1 %vm2651_vm1, %v2650_v8  ;;  %vm574_vm2 = vcmp.gt.s32.totalorder %v2891_v13, 0  ;;  %vm580_vm3 = vcmp.gt.s32.totalorder %v2891_v13, 7  ;;  %vm746_vm6 = vcmp.gt.s32.totalorder %v2891_v13, 1  ;;  %vm752_vm7 = vcmp.gt.s32.totalorder %v2891_v13, 6 }
  0x6e   :  { %vm920_vm10 = vcmp.gt.s32.totalorder %v2891_v13, 2  ;;  %vm926_vm11 = vcmp.gt.s32.totalorder %v2891_v13, 5  ;;  %vm1094_vm14 = vcmp.gt.s32.totalorder %v2891_v13, 3  ;;  %vm1100_vm15 = vcmp.gt.s32.totalorder %v2891_v13, 4 }
  0x74   :  { %2174 = vmatmul.mubr.bf16.vlgmr.msra.gmra.mrb[8].mxu0 %v2649_v0  ;;  %2182 = vmatmul.mubr.bf16.vlgmr.msra.gmra.mrb[8].mxu1 %v2649_v0 }
  0x75   :  { %2186 = vmatpush3.bf16.msra.mxu0 %v2827_v7  ;;  %2189 = vmatprep.mubr.msk.bf16.mxu0 %vm2651_vm1, %v2650_v8 }
  0x76   :  { %2187 = vmatprep.subr.bf16.mxu0 %v2650_v8  ;;  %2194 = vmatpush3.bf16.msra.mxu1 %v2834_v10 }
  0x77   :  { %2197 = vmatprep.mubr.msk.bf16.mxu1 %vm2651_vm1, %v2650_v8  ;;  %2195 = vmatprep.subr.bf16.mxu1 %v2650_v8 }
  0x79   :  { %2188 = vmatpush3.bf16.msra.mxu0 %v2837_v11 }
  0x7a   :  { %2201 = vmatprep.subr.bf16.mxu0 %v2650_v8  ;;  %2196 = vmatpush3.bf16.msra.mxu1 %v2844_v12 }
  0x7b   :  { %2209 = vmatprep.subr.bf16.mxu1 %v2650_v8 }
 0x137   :  { %v2151_v15 = vpop.f32.mrb[0].mxu0  ;;  %v2163_v17 = vpop.f32.mrb[0].mxu1 }
 0x138   :  { %v220_v16 = vadd.f32 %v2151_v15, %v1958_v14  ;;  %v211_v19 = vpop.f32.mrb[1].mxu0  ;;  %v299_v21 = vpop.f32.mrb[1].mxu1  ;;  %v308_v26 = vadd.f32 %v2163_v17, %v1969_v18  ;;  %v575_v15 = vsel %vm574_vm2, 1, %v2649_v0 }
 0x139   :  { %v212_v20 = vadd.f32 %v1958_v14, %v211_v19  ;;  %v2152_v22 = vpop.f32.mrb[2].mxu0  ;;  %v2164_v24 = vpop.f32.mrb[2].mxu1  ;;  %v300_v30 = vadd.f32 %v1969_v18, %v299_v21 }
 0x13a   :  { %v223_v23 = vadd.f32 %v2152_v22, %v1958_v14  ;;  %v214_v25 = vpop.f32.mrb[3].mxu0  ;;  %v311_v27 = vadd.f32 %v2164_v24, %v1969_v18  ;;  %v302_v29 = vpop.f32.mrb[3].mxu1 }
 0x13b   :  { %v215_v28 = vadd.f32 %v1958_v14, %v214_v25  ;;  %v303_v32 = vadd.f32 %v1969_v18, %v302_v29 }
 0x13c   :  { %v2041_v31 = vpack.c.bf16 %v223_v23, %v220_v16  ;;  %v2061_v33 = vpack.c.bf16 %v311_v27, %v308_v26 }
 0x13d   :  { %v2036_v34 = vpack.c.bf16 %v215_v28, %v212_v20  ;;  %v2056_v35 = vpack.c.bf16 %v303_v32, %v300_v30  ;;  %v581_v28 = vsel %vm580_vm3, 1, %v2649_v0 }
 0x13e   :  { %2073 = vst [vmem:[#allocation2 + $0x8] sm:$0xff] %v2041_v31   ;;  %2076 = vst [vmem:[#allocation3 + $0x8] sm:$0xff] %v2061_v33  }
 0x13f   :  { %2037 = vst [vmem:[#allocation2] sm:$0xff] %v2036_v34   ;;  %v2155_v36 = vpop.f32.mrb[4].mxu0  ;;  %2057 = vst [vmem:[#allocation3] sm:$0xff] %v2056_v35   ;;  %v2167_v37 = vpop.f32.mrb[4].mxu1 }
 0x140   :  { %v236_v38 = vadd.f32 %v2155_v36, %v1958_v14  ;;  %v227_v39 = vpop.f32.mrb[5].mxu0  ;;  %v315_v40 = vpop.f32.mrb[5].mxu1  ;;  %v324_v46 = vadd.f32 %v2167_v37, %v1969_v18 }
 0x141   :  { %v228_v41 = vadd.f32 %v1958_v14, %v227_v39  ;;  %v2156_v42 = vpop.f32.mrb[6].mxu0  ;;  %v2168_v43 = vpop.f32.mrb[6].mxu1  ;;  %v316_v50 = vadd.f32 %v1969_v18, %v315_v40 }
 0x142   :  { %v239_v44 = vadd.f32 %v2156_v42, %v1958_v14  ;;  %v230_v45 = vpop.f32.mrb[7].mxu0  ;;  %v327_v47 = vadd.f32 %v2168_v43, %v1969_v18  ;;  %v318_v48 = vpop.f32.mrb[7].mxu1 }
 0x143   :  { %v231_v49 = vadd.f32 %v1958_v14, %v230_v45  ;;  %v319_v52 = vadd.f32 %v1969_v18, %v318_v48 }
 0x144   :  { %v2051_v51 = vpack.c.bf16 %v239_v44, %v236_v38  ;;  %v2071_v53 = vpack.c.bf16 %v327_v47, %v324_v46 }
 0x145   :  { %v2046_v54 = vpack.c.bf16 %v231_v49, %v228_v41  ;;  %v2066_v55 = vpack.c.bf16 %v319_v52, %v316_v50 }
 0x146   :  { %2075 = vst [vmem:[#allocation2 + $0x18] sm:$0xff] %v2051_v51   ;;  %v2881_v56 = vld [vmem:[#allocation2] sm:$0xff]   ;;  %2078 = vst [vmem:[#allocation3 + $0x18] sm:$0xff] %v2071_v53  }
 0x147   :  { %2074 = vst [vmem:[#allocation2 + $0x10] sm:$0xff] %v2046_v54   ;;  %v419_v57 = vunpack.c.l.bf16 %v2881_v56  ;;  %v469_v58 = vpop.f32.mrb[8].mxu0  ;;  %2077 = vst [vmem:[#allocation3 + $0x10] sm:$0xff] %v2066_v55   ;;  %v546_v60 = vpop.f32.mrb[8].mxu1  ;;  %v605_v49 = vunpack.c.h.bf16 %v2881_v56 }
 0x148   :  { %v2175_v59 = vpop.f32.mrb[9].mxu0  ;;  %v2183_v63 = vpop.f32.mrb[9].mxu1 }
 0x149   :  { %v470_v61 = vadd.f32 %v469_v58, %v419_v57  ;;  %v472_v62 = vpop.f32.mrb[10].mxu0  ;;  %v549_v2 = vpop.f32.mrb[10].mxu1 }
 0x14a   :  { %v2176_v1 = vpop.f32.mrb[11].mxu0  ;;  %v2184_v3 = vpop.f32.mrb[11].mxu1 }
 0x14b   :  { %2352 = vtanh.f32 %v470_v61  ;;  %v475_v16 = vmul.f32 0.5, %v470_v61 }
 0x14d   :  { %v2884_v4 = vld [vmem:[#allocation3 + $0x18] sm:$0xff]  }
 0x14e   :  { %v499_v5 = vunpack.c.h.bf16 %v2884_v4  ;;  %v677_v55 = vunpack.c.l.bf16 %v2884_v4 }
 0x150   :  { %v547_v6 = vadd.f32 %v546_v60, %v499_v5 }
 0x152   :  { %2354 = vtanh.f32 %v547_v6  ;;  %v552_v17 = vmul.f32 0.5, %v547_v6 }
 0x153   :  { %2356 = vtanh.f32 %v475_v16 }
 0x154   :  { %2358 = vtanh.f32 %v552_v17 }
 0x155   :  { %v2353_v9 = vpop.eup %2352 }
 0x156   :  { %482 = vrot.lane.b32.xlu0 %v2353_v9, %s2644_s20 }
 0x15c   :  { %v2355_v14 = vpop.eup %2354 }
 0x15d   :  { %559 = vrot.lane.b32.xlu0 %v2355_v14, %s2644_s20  ;;  %v2357_v18 = vpop.eup %2356 }
 0x15e   :  { %v477_v19 = vmul.f32 0.5, %v2357_v18  ;;  %v2359_v21 = vpop.eup %2358 }
 0x15f   :  { %v554_v24 = vmul.f32 0.5, %v2359_v21 }
 0x160   :  { %v478_v20 = vadd.f32 0.5, %v477_v19  ;;  %v753_v19 = vsel %vm752_vm7, 1, %v2649_v0 }
 0x161   :  { %577 = vperm.xlu0 %2329, %v575_v15   ;;  %v555_v25 = vadd.f32 0.5, %v554_v24  ;;  %v747_v15 = vsel %vm746_vm6, 1, %v2649_v0 }
 0x162   :  { %v480_v29 = vmul.f32 0.0, %v478_v20 }
 0x163   :  { %v557_v32 = vmul.f32 0.0, %v555_v25 }
 0x1c8   :  { %v483_v22 = vpop.permute.xlu0 %482 }
 0x1c9   :  { %v485_v23 = vmul.f32 %v483_v22, %v478_v20 }
 0x1cb   :  { %487 = vrot.lane.b32.xlu1 %v485_v23, %s2652_s1 }
 0x1cf   :  { %v560_v26 = vpop.permute.xlu0 %559 }
 0x1d0   :  { %v562_v27 = vmul.f32 %v560_v26, %v555_v25 }
 0x1d2   :  { %564 = vrot.lane.b32.xlu1 %v562_v27, %s2652_s1 }
 0x1d6   :  { %583 = vperm.xlu1 %2330, %v581_v28  }
 0x1e0   :  { %v2910_v38 = vpop.permute.xlu0 %577 }
 0x1e1   :  { %vm579_vm4 = vcmp.eq.s32.totalorder %v2910_v38, 1 }
 0x23d   :  { %v488_v30 = vpop.permute.xlu1 %487 }
 0x23e   :  { %v2900_v31 = vadd.f32 %v488_v30, %v480_v29 }
 0x240   :  { %2360 = vtanh.f32 %v2900_v31 }
 0x244   :  { %v565_v33 = vpop.permute.xlu1 %564 }
 0x245   :  { %v2903_v34 = vadd.f32 %v565_v33, %v557_v32 }
 0x247   :  { %2362 = vtanh.f32 %v2903_v34 }
 0x24a   :  { %v2361_v35 = vpop.eup %2360 }
 0x24b   :  { %493 = vrot.lane.b32.xlu1 %v2361_v35, %s2644_s20 }
 0x251   :  { %v2363_v36 = vpop.eup %2362 }
 0x252   :  { %570 = vrot.lane.b32.xlu0 %v2363_v36, %s2644_s20 }
 0x255   :  { %v2908_v37 = vpop.permute.xlu1 %583 }
 0x256   :  { %vm585_vm5 = vcmp.eq.s32.totalorder %v2908_v37, 1 }
 0x257   :  { %v2964_v24 = vsel %vm585_vm5, %v2903_v34, 0.0 }
 0x2bd   :  { %v494_v39 = vpop.permute.xlu1 %493 }
 0x2be   :  { %v496_v40 = vmul.f32 %v494_v39, %v478_v20  ;;  %v2955_v20 = vsel %vm579_vm4, %v2900_v31, 0.0 }
 0x2c0   :  { %v2915_v41 = vsel %vm579_vm4, %v496_v40, 0.0 }
 0x2c1   :  { %v602_v42 = vpack.c.bf16 %v2915_v41, %v2915_v41 }
 0x2c3   :  { %607 = vrot.lane.b32.xlu1 %v602_v42, %s2652_s1 }
 0x2c4   :  { %v571_v43 = vpop.permute.xlu0 %570 }
 0x2c5   :  { %v573_v44 = vmul.f32 %v571_v43, %v555_v25 }
 0x2c7   :  { %v2923_v45 = vsel %vm585_vm5, %v573_v44, 0.0 }
 0x2c8   :  { %v674_v46 = vpack.c.bf16 %v2923_v45, %v2923_v45 }
 0x2ca   :  { %679 = vrot.lane.b32.xlu0 %v674_v46, %s2652_s1  ;;  %v3014_v46 = vld [vmem:[#allocation2 + $0x8] sm:$0xff]  }
 0x335   :  { %v608_v47 = vpop.permute.xlu1 %607 }
 0x336   :  { %2190 = vmatmul.mubr.msk.bf16.vlgmr.msra.gmra.mrb[12].mxu0 %vm164_vm0, %v608_v47  ;;  %v779_v47 = vunpack.c.l.bf16 %v3014_v46 }
 0x337   :  { %2202 = vmatpush3.bf16.msra.mxu0 %v2827_v7  ;;  %2205 = vmatprep.mubr.msk.bf16.mxu0 %vm2651_vm1, %v2650_v8 }
 0x338   :  { %2203 = vmatprep.subr.bf16.mxu0 %v2650_v8 }
 0x33b   :  { %2204 = vmatpush3.bf16.msra.mxu0 %v2837_v11 }
 0x33c   :  { %2217 = vmatprep.subr.bf16.mxu0 %v2650_v8  ;;  %v680_v48 = vpop.permute.xlu0 %679 }
 0x33d   :  { %2198 = vmatmul.mubr.msk.bf16.vlgmr.msra.gmra.mrb[12].mxu1 %vm164_vm0, %v680_v48 }
 0x33e   :  { %2210 = vmatpush3.bf16.msra.mxu1 %v2834_v10  ;;  %2213 = vmatprep.mubr.msk.bf16.mxu1 %vm2651_vm1, %v2650_v8 }
 0x33f   :  { %2211 = vmatprep.subr.bf16.mxu1 %v2650_v8 }
 0x342   :  { %2212 = vmatpush3.bf16.msra.mxu1 %v2844_v12 }
 0x343   :  { %2225 = vmatprep.subr.bf16.mxu1 %v2650_v8 }
 0x409   :  { %v646_v50 = vpop.f32.mrb[12].mxu0 }
 0x40a   :  { %v647_v51 = vadd.f32 %v646_v50, %v605_v49  ;;  %v2191_v52 = vpop.f32.mrb[13].mxu0 }
 0x40b   :  { %v649_v53 = vpop.f32.mrb[14].mxu0 }
 0x40c   :  { %2364 = vtanh.f32 %v647_v51  ;;  %v2192_v54 = vpop.f32.mrb[15].mxu0  ;;  %v652_v56 = vmul.f32 0.5, %v647_v51  ;;  %v3017_v53 = vld [vmem:[#allocation3 + $0x10] sm:$0xff]  }
 0x40d   :  { %v851_v54 = vunpack.c.h.bf16 %v3017_v53 }
 0x410   :  { %v718_v57 = vpop.f32.mrb[12].mxu1 }
 0x411   :  { %v719_v58 = vadd.f32 %v718_v57, %v677_v55  ;;  %v2199_v59 = vpop.f32.mrb[13].mxu1 }
 0x412   :  { %v721_v60 = vpop.f32.mrb[14].mxu1 }
 0x413   :  { %2366 = vtanh.f32 %v719_v58  ;;  %v2200_v61 = vpop.f32.mrb[15].mxu1  ;;  %v724_v1 = vmul.f32 0.5, %v719_v58 }
 0x414   :  { %2368 = vtanh.f32 %v652_v56 }
 0x415   :  { %2370 = vtanh.f32 %v724_v1 }
 0x416   :  { %v2365_v62 = vpop.eup %2364 }
 0x417   :  { %659 = vrot.lane.b32.xlu1 %v2365_v62, %s2644_s20 }
 0x41d   :  { %v2367_v63 = vpop.eup %2366 }
 0x41e   :  { %731 = vrot.lane.b32.xlu0 %v2367_v63, %s2644_s20  ;;  %v2369_v2 = vpop.eup %2368 }
 0x41f   :  { %v654_v3 = vmul.f32 0.5, %v2369_v2  ;;  %v2371_v4 = vpop.eup %2370 }
 0x420   :  { %v726_v14 = vmul.f32 0.5, %v2371_v4 }
 0x421   :  { %v655_v5 = vadd.f32 0.5, %v654_v3 }
 0x422   :  { %v727_v16 = vadd.f32 0.5, %v726_v14  ;;  %v921_v14 = vsel %vm920_vm10, 1, %v2649_v0 }
 0x423   :  { %v657_v21 = vmul.f32 %v655_v5, %v2955_v20 }
 0x424   :  { %v729_v25 = vmul.f32 %v727_v16, %v2964_v24 }
 0x489   :  { %v660_v6 = vpop.permute.xlu1 %659 }
 0x48a   :  { %v662_v9 = vmul.f32 %v660_v6, %v655_v5 }
 0x48c   :  { %664 = vrot.lane.b32.xlu1 %v662_v9, %s2652_s1 }
 0x490   :  { %749 = vperm.xlu1 %2330, %v747_v15   ;;  %v732_v17 = vpop.permute.xlu0 %731 }
 0x491   :  { %v734_v18 = vmul.f32 %v732_v17, %v727_v16 }
 0x493   :  { %736 = vrot.lane.b32.xlu0 %v734_v18, %s2652_s1  ;;  %v927_v18 = vsel %vm926_vm11, 1, %v2649_v0 }
 0x497   :  { %755 = vperm.xlu0 %2329, %v753_v19  }
 0x4fe   :  { %v665_v22 = vpop.permute.xlu1 %664 }
 0x4ff   :  { %v2958_v23 = vadd.f32 %v665_v22, %v657_v21 }
 0x501   :  { %2372 = vtanh.f32 %v2958_v23 }
 0x505   :  { %v737_v26 = vpop.permute.xlu0 %736 }
 0x506   :  { %v2967_v27 = vadd.f32 %v737_v26, %v729_v25 }
 0x508   :  { %2374 = vtanh.f32 %v2967_v27 }
 0x50b   :  { %v2373_v28 = vpop.eup %2372 }
 0x50c   :  { %670 = vrot.lane.b32.xlu1 %v2373_v28, %s2644_s20 }
 0x50f   :  { %v2972_v30 = vpop.permute.xlu1 %749 }
 0x510   :  { %vm751_vm8 = vcmp.eq.s32.totalorder %v2972_v30, 1 }
 0x511   :  { %v3032_v19 = vsel %vm751_vm8, %v2958_v23, %v2955_v20 }
 0x512   :  { %v2375_v29 = vpop.eup %2374 }
 0x513   :  { %742 = vrot.lane.b32.xlu0 %v2375_v29, %s2644_s20 }
 0x516   :  { %v2983_v34 = vpop.permute.xlu0 %755 }
 0x517   :  { %vm757_vm9 = vcmp.eq.s32.totalorder %v2983_v34, 1 }
 0x518   :  { %v3042_v26 = vsel %vm757_vm9, %v2967_v27, %v2964_v24 }
 0x57e   :  { %v671_v31 = vpop.permute.xlu1 %670 }
 0x57f   :  { %v2974_v32 = vmul.f32 %v671_v31, %v655_v5 }
 0x581   :  { %v2981_v33 = vsel %vm751_vm8, %v2974_v32, %v2915_v41 }
 0x582   :  { %v776_v35 = vpack.c.bf16 %v2981_v33, %v2981_v33 }
 0x584   :  { %781 = vrot.lane.b32.xlu1 %v776_v35, %s2652_s1 }
 0x585   :  { %v743_v36 = vpop.permute.xlu0 %742 }
 0x586   :  { %v2988_v39 = vmul.f32 %v743_v36, %v727_v16 }
 0x588   :  { %v2995_v40 = vsel %vm757_vm9, %v2988_v39, %v2923_v45 }
 0x589   :  { %v848_v42 = vpack.c.bf16 %v2995_v40, %v2995_v40 }
 0x58b   :  { %853 = vrot.lane.b32.xlu0 %v848_v42, %s2652_s1 }
 0x5f6   :  { %v782_v43 = vpop.permute.xlu1 %781 }
 0x5f7   :  { %2206 = vmatmul.mubr.msk.bf16.vlgmr.msra.gmra.mrb[16].mxu0 %vm164_vm0, %v782_v43 }
 0x5f8   :  { %2218 = vmatpush3.bf16.msra.mxu0 %v2827_v7  ;;  %2221 = vmatprep.mubr.msk.bf16.mxu0 %vm2651_vm1, %v2650_v8 }
 0x5f9   :  { %2219 = vmatprep.subr.bf16.mxu0 %v2650_v8 }
 0x5fc   :  { %2220 = vmatpush3.bf16.msra.mxu0 %v2837_v11 }
 0x5fd   :  { %2233 = vmatprep.subr.bf16.mxu0 %v2650_v8  ;;  %v854_v44 = vpop.permute.xlu0 %853 }
 0x5fe   :  { %2214 = vmatmul.mubr.msk.bf16.vlgmr.msra.gmra.mrb[16].mxu1 %vm164_vm0, %v854_v44 }
 0x5ff   :  { %2226 = vmatpush3.bf16.msra.mxu1 %v2834_v10  ;;  %2229 = vmatprep.mubr.msk.bf16.mxu1 %vm2651_vm1, %v2650_v8 }
 0x600   :  { %2227 = vmatprep.subr.bf16.mxu1 %v2650_v8 }
 0x603   :  { %2228 = vmatpush3.bf16.msra.mxu1 %v2844_v12 }
 0x604   :  { %2241 = vmatprep.subr.bf16.mxu1 %v2650_v8 }
 0x6ca   :  { %v820_v48 = vpop.f32.mrb[16].mxu0 }
 0x6cb   :  { %v821_v49 = vadd.f32 %v820_v48, %v779_v47  ;;  %v2207_v50 = vpop.f32.mrb[17].mxu0 }
 0x6cc   :  { %v823_v51 = vpop.f32.mrb[18].mxu0  ;;  %v953_v50 = vunpack.c.h.bf16 %v3014_v46 }
 0x6cd   :  { %2376 = vtanh.f32 %v821_v49  ;;  %v2208_v52 = vpop.f32.mrb[19].mxu0  ;;  %v826_v63 = vmul.f32 0.5, %v821_v49 }
 0x6d1   :  { %v892_v55 = vpop.f32.mrb[16].mxu1 }
 0x6d2   :  { %v893_v57 = vadd.f32 %v892_v55, %v851_v54  ;;  %v2215_v58 = vpop.f32.mrb[17].mxu1 }
 0x6d3   :  { %v895_v59 = vpop.f32.mrb[18].mxu1  ;;  %v1025_v58 = vunpack.c.l.bf16 %v3017_v53 }
 0x6d4   :  { %2378 = vtanh.f32 %v893_v57  ;;  %v2216_v60 = vpop.f32.mrb[19].mxu1  ;;  %v898_v56 = vmul.f32 0.5, %v893_v57 }
 0x6d5   :  { %2380 = vtanh.f32 %v826_v63 }
 0x6d6   :  { %2382 = vtanh.f32 %v898_v56 }
 0x6d7   :  { %v2377_v61 = vpop.eup %2376 }
 0x6d8   :  { %833 = vrot.lane.b32.xlu1 %v2377_v61, %s2644_s20 }
 0x6de   :  { %v2379_v62 = vpop.eup %2378 }
 0x6df   :  { %905 = vrot.lane.b32.xlu0 %v2379_v62, %s2644_s20  ;;  %v2381_v1 = vpop.eup %2380 }
 0x6e0   :  { %v828_v2 = vmul.f32 0.5, %v2381_v1  ;;  %v2383_v5 = vpop.eup %2382 }
 0x6e1   :  { %v900_v9 = vmul.f32 0.5, %v2383_v5 }
 0x6e2   :  { %v829_v3 = vadd.f32 0.5, %v828_v2 }
 0x6e3   :  { %v901_v15 = vadd.f32 0.5, %v900_v9 }
 0x6e4   :  { %v831_v21 = vmul.f32 %v829_v3, %v3032_v19 }
 0x6e5   :  { %v903_v28 = vmul.f32 %v901_v15, %v3042_v26 }
 0x74a   :  { %v834_v4 = vpop.permute.xlu1 %833 }
 0x74b   :  { %v836_v6 = vmul.f32 %v834_v4, %v829_v3 }
 0x74d   :  { %838 = vrot.lane.b32.xlu1 %v836_v6, %s2652_s1 }
 0x751   :  { %923 = vperm.xlu1 %2330, %v921_v14   ;;  %v906_v16 = vpop.permute.xlu0 %905 }
 0x752   :  { %v908_v17 = vmul.f32 %v906_v16, %v901_v15 }
 0x754   :  { %910 = vrot.lane.b32.xlu0 %v908_v17, %s2652_s1 }
 0x758   :  { %929 = vperm.xlu0 %2329, %v927_v18  }
 0x7bf   :  { %v839_v22 = vpop.permute.xlu1 %838 }
 0x7c0   :  { %v3035_v25 = vadd.f32 %v839_v22, %v831_v21  ;;  %v1101_v21 = vsel %vm1100_vm15, 1, %v2649_v0 }
 0x7c2   :  { %2384 = vtanh.f32 %v3035_v25 }
 0x7c6   :  { %v911_v29 = vpop.permute.xlu0 %910 }
 0x7c7   :  { %v3045_v31 = vadd.f32 %v911_v29, %v903_v28 }
 0x7c9   :  { %2386 = vtanh.f32 %v3045_v31 }
 0x7cc   :  { %v2385_v20 = vpop.eup %2384 }
 0x7cd   :  { %844 = vrot.lane.b32.xlu1 %v2385_v20, %s2644_s20 }
 0x7d0   :  { %v3050_v35 = vpop.permute.xlu1 %923 }
 0x7d1   :  { %vm925_vm12 = vcmp.eq.s32.totalorder %v3050_v35, 1 }
 0x7d2   :  { %v3106_v22 = vsel %vm925_vm12, %v3035_v25, %v3032_v19 }
 0x7d3   :  { %v2387_v23 = vpop.eup %2386 }
 0x7d4   :  { %916 = vrot.lane.b32.xlu0 %v2387_v23, %s2644_s20 }
 0x7d7   :  { %v3061_v27 = vpop.permute.xlu0 %929 }
 0x7d8   :  { %vm931_vm13 = vcmp.eq.s32.totalorder %v3061_v27, 1 }
 0x7d9   :  { %v3116_v13 = vsel %vm931_vm13, %v3045_v31, %v3042_v26 }
 0x83f   :  { %v845_v36 = vpop.permute.xlu1 %844 }
 0x840   :  { %v3052_v42 = vmul.f32 %v845_v36, %v829_v3 }
 0x842   :  { %v3059_v24 = vsel %vm925_vm12, %v3052_v42, %v2981_v33 }
 0x843   :  { %v950_v43 = vpack.c.bf16 %v3059_v24, %v3059_v24 }
 0x845   :  { %955 = vrot.lane.b32.xlu1 %v950_v43, %s2652_s1 }
 0x846   :  { %v917_v44 = vpop.permute.xlu0 %916 }
 0x847   :  { %v3066_v47 = vmul.f32 %v917_v44, %v901_v15  ;;  %v1095_v15 = vsel %vm1094_vm14, 1, %v2649_v0 }
 0x849   :  { %v3073_v48 = vsel %vm931_vm13, %v3066_v47, %v2995_v40 }
 0x84a   :  { %v1022_v33 = vpack.c.bf16 %v3073_v48, %v3073_v48 }
 0x84c   :  { %1027 = vrot.lane.b32.xlu0 %v1022_v33, %s2652_s1 }
 0x8b7   :  { %v956_v49 = vpop.permute.xlu1 %955 }
 0x8b8   :  { %2222 = vmatmul.mubr.msk.bf16.vlgmr.msra.gmra.mrb[20].mxu0 %vm164_vm0, %v956_v49 }
 0x8b9   :  { %2234 = vmatpush3.bf16.msra.mxu0 %v2827_v7  ;;  %2237 = vmatprep.mubr.msk.bf16.mxu0 %vm2651_vm1, %v2650_v8 }
 0x8ba   :  { %2235 = vmatprep.subr.bf16.mxu0 %v2650_v8 }
 0x8bd   :  { %2236 = vmatpush3.bf16.msra.mxu0 %v2837_v11 }
 0x8be   :  { %2249 = vmatprep.subr.bf16.mxu0 %v2650_v8  ;;  %v1028_v40 = vpop.permute.xlu0 %1027 }
 0x8bf   :  { %2230 = vmatmul.mubr.msk.bf16.vlgmr.msra.gmra.mrb[20].mxu1 %vm164_vm0, %v1028_v40 }
 0x8c0   :  { %2242 = vmatpush3.bf16.msra.mxu1 %v2834_v10  ;;  %2245 = vmatprep.mubr.msk.bf16.mxu1 %vm2651_vm1, %v2650_v8 }
 0x8c1   :  { %2243 = vmatprep.subr.bf16.mxu1 %v2650_v8 }
 0x8c4   :  { %2244 = vmatpush3.bf16.msra.mxu1 %v2844_v12 }
 0x8c5   :  { %2257 = vmatprep.subr.bf16.mxu1 %v2650_v8 }
 0x98b   :  { %v994_v51 = vpop.f32.mrb[20].mxu0 }
 0x98c   :  { %v995_v52 = vadd.f32 %v994_v51, %v953_v50  ;;  %v2223_v54 = vpop.f32.mrb[21].mxu0 }
 0x98d   :  { %v997_v55 = vpop.f32.mrb[22].mxu0  ;;  %v3166_v54 = vld [vmem:[#allocation2 + $0x10] sm:$0xff]  }
 0x98e   :  { %2388 = vtanh.f32 %v995_v52  ;;  %v2224_v57 = vpop.f32.mrb[23].mxu0  ;;  %v1000_v46 = vmul.f32 0.5, %v995_v52  ;;  %v1127_v55 = vunpack.c.l.bf16 %v3166_v54 }
 0x992   :  { %v1066_v59 = vpop.f32.mrb[20].mxu1 }
 0x993   :  { %v1067_v60 = vadd.f32 %v1066_v59, %v1025_v58  ;;  %v2231_v61 = vpop.f32.mrb[21].mxu1 }
 0x994   :  { %v1069_v62 = vpop.f32.mrb[22].mxu1 }
 0x995   :  { %2390 = vtanh.f32 %v1067_v60  ;;  %v2232_v63 = vpop.f32.mrb[23].mxu1  ;;  %v1072_v2 = vmul.f32 0.5, %v1067_v60  ;;  %v3169_v62 = vld [vmem:[#allocation3 + $0x8] sm:$0xff]  }
 0x996   :  { %2392 = vtanh.f32 %v1000_v46  ;;  %v1199_v63 = vunpack.c.h.bf16 %v3169_v62 }
 0x997   :  { %2394 = vtanh.f32 %v1072_v2 }
 0x998   :  { %v2389_v56 = vpop.eup %2388 }
 0x999   :  { %1007 = vrot.lane.b32.xlu1 %v2389_v56, %s2644_s20 }
 0x99f   :  { %v2391_v1 = vpop.eup %2390 }
 0x9a0   :  { %1079 = vrot.lane.b32.xlu0 %v2391_v1, %s2644_s20  ;;  %v2393_v3 = vpop.eup %2392 }
 0x9a1   :  { %v1002_v5 = vmul.f32 0.5, %v2393_v3  ;;  %v2395_v53 = vpop.eup %2394 }
 0x9a2   :  { %v1074_v14 = vmul.f32 0.5, %v2395_v53 }
 0x9a3   :  { %v1003_v4 = vadd.f32 0.5, %v1002_v5 }
 0x9a4   :  { %v1075_v16 = vadd.f32 0.5, %v1074_v14 }
 0x9a5   :  { %v1005_v28 = vmul.f32 %v1003_v4, %v3106_v22 }
 0x9a6   :  { %v1077_v0 = vmul.f32 %v1075_v16, %v3116_v13 }
 0xa0b   :  { %v1008_v6 = vpop.permute.xlu1 %1007 }
 0xa0c   :  { %v1010_v9 = vmul.f32 %v1008_v6, %v1003_v4 }
 0xa0e   :  { %1012 = vrot.lane.b32.xlu1 %v1010_v9, %s2652_s1 }
 0xa12   :  { %1097 = vperm.xlu1 %2330, %v1095_v15   ;;  %v1080_v17 = vpop.permute.xlu0 %1079 }
 0xa13   :  { %v1082_v18 = vmul.f32 %v1080_v17, %v1075_v16 }
 0xa15   :  { %1084 = vrot.lane.b32.xlu0 %v1082_v18, %s2652_s1 }
 0xa19   :  { %1103 = vperm.xlu0 %2329, %v1101_v21  }
 0xa80   :  { %v1013_v29 = vpop.permute.xlu1 %1012 }
 0xa81   :  { %v3109_v20 = vadd.f32 %v1013_v29, %v1005_v28 }
 0xa83   :  { %2396 = vtanh.f32 %v3109_v20 }
 0xa87   :  { %v1085_v23 = vpop.permute.xlu0 %1084 }
 0xa88   :  { %v3119_v36 = vadd.f32 %v1085_v23, %v1077_v0 }
 0xa8a   :  { %2398 = vtanh.f32 %v3119_v36 }
 0xa8d   :  { %v2397_v19 = vpop.eup %2396 }
 0xa8e   :  { %1018 = vrot.lane.b32.xlu1 %v2397_v19, %s2644_s20 }
 0xa91   :  { %v3124_v43 = vpop.permute.xlu1 %1097 }
 0xa92   :  { %vm1099_vm2 = vcmp.eq.s32.totalorder %v3124_v43, 1 }
 0xa93   :  { %v3180_v23 = vsel %vm1099_vm2, %v3109_v20, %v3106_v22 }
 0xa94   :  { %v2399_v25 = vpop.eup %2398 }
 0xa95   :  { %1090 = vrot.lane.b32.xlu0 %v2399_v25, %s2644_s20 }
 0xa98   :  { %v3135_v31 = vpop.permute.xlu0 %1103 }
 0xa99   :  { %vm1105_vm3 = vcmp.eq.s32.totalorder %v3135_v31, 1 }
 0xb00   :  { %v1019_v44 = vpop.permute.xlu1 %1018 }
 0xb01   :  { %v3126_v33 = vmul.f32 %v1019_v44, %v1003_v4 }
 0xb03   :  { %v3133_v26 = vsel %vm1099_vm2, %v3126_v33, %v3059_v24 }
 0xb04   :  { %v1124_v49 = vpack.c.bf16 %v3133_v26, %v3133_v26 }
 0xb06   :  { %1129 = vrot.lane.b32.xlu1 %v1124_v49, %s2652_s1  ;;  %v3190_v49 = vsel %vm1105_vm3, %v3119_v36, %v3116_v13 }
 0xb07   :  { %v1091_v40 = vpop.permute.xlu0 %1090 }
 0xb08   :  { %v3140_v50 = vmul.f32 %v1091_v40, %v1075_v16 }
 0xb0a   :  { %v3147_v51 = vsel %vm1105_vm3, %v3140_v50, %v3073_v48 }
 0xb0b   :  { %v1196_v24 = vpack.c.bf16 %v3147_v51, %v3147_v51 }
 0xb0d   :  { %1201 = vrot.lane.b32.xlu0 %v1196_v24, %s2652_s1 }
 0xb78   :  { %v1130_v52 = vpop.permute.xlu1 %1129 }
 0xb79   :  { %2238 = vmatmul.mubr.msk.bf16.vlgmr.msra.gmra.mrb[24].mxu0 %vm164_vm0, %v1130_v52 }
 0xb7a   :  { %2250 = vmatpush3.bf16.msra.mxu0 %v2827_v7  ;;  %2253 = vmatprep.mubr.msk.bf16.mxu0 %vm2651_vm1, %v2650_v8 }
 0xb7b   :  { %2251 = vmatprep.subr.bf16.mxu0 %v2650_v8 }
 0xb7e   :  { %2252 = vmatpush3.bf16.msra.mxu0 %v2837_v11 }
 0xb7f   :  { %2265 = vmatprep.subr.bf16.mxu0 %v2650_v8  ;;  %v1202_v48 = vpop.permute.xlu0 %1201 }
 0xb80   :  { %2246 = vmatmul.mubr.msk.bf16.vlgmr.msra.gmra.mrb[24].mxu1 %vm164_vm0, %v1202_v48 }
 0xb81   :  { %2258 = vmatpush3.bf16.msra.mxu1 %v2834_v10  ;;  %2261 = vmatprep.mubr.msk.bf16.mxu1 %vm2651_vm1, %v2650_v8 }
 0xb82   :  { %2259 = vmatprep.subr.bf16.mxu1 %v2650_v8 }
 0xb85   :  { %2260 = vmatpush3.bf16.msra.mxu1 %v2844_v12 }
 0xb86   :  { %2273 = vmatprep.subr.bf16.mxu1 %v2650_v8 }
 0xc4c   :  { %v1168_v57 = vpop.f32.mrb[24].mxu0 }
 0xc4d   :  { %v1169_v58 = vadd.f32 %v1168_v57, %v1127_v55  ;;  %v2239_v59 = vpop.f32.mrb[25].mxu0 }
 0xc4e   :  { %v1171_v60 = vpop.f32.mrb[26].mxu0 }
 0xc4f   :  { %2400 = vtanh.f32 %v1169_v58  ;;  %v2240_v61 = vpop.f32.mrb[27].mxu0  ;;  %v1174_v53 = vmul.f32 0.5, %v1169_v58 }
 0xc53   :  { %v1240_v56 = vpop.f32.mrb[24].mxu1 }
 0xc54   :  { %v1241_v1 = vadd.f32 %v1240_v56, %v1199_v63  ;;  %v2247_v46 = vpop.f32.mrb[25].mxu1 }
 0xc55   :  { %v1243_v2 = vpop.f32.mrb[26].mxu1  ;;  %v1359_v46 = vunpack.c.l.bf16 %v3169_v62 }
 0xc56   :  { %2402 = vtanh.f32 %v1241_v1  ;;  %v2248_v3 = vpop.f32.mrb[27].mxu1  ;;  %v1246_v6 = vmul.f32 0.5, %v1241_v1 }
 0xc57   :  { %2404 = vtanh.f32 %v1174_v53 }
 0xc58   :  { %2406 = vtanh.f32 %v1246_v6 }
 0xc59   :  { %v2401_v5 = vpop.eup %2400 }
 0xc5a   :  { %1181 = vrot.lane.b32.xlu1 %v2401_v5, %s2644_s20 }
 0xc60   :  { %v2403_v4 = vpop.eup %2402 }
 0xc61   :  { %1253 = vrot.lane.b32.xlu0 %v2403_v4, %s2644_s20  ;;  %v2405_v9 = vpop.eup %2404 }
 0xc62   :  { %v1176_v14 = vmul.f32 0.5, %v2405_v9  ;;  %v2407_v16 = vpop.eup %2406 }
 0xc63   :  { %v1248_v21 = vmul.f32 0.5, %v2407_v16 }
 0xc64   :  { %v1177_v15 = vadd.f32 0.5, %v1176_v14 }
 0xc65   :  { %v1249_v28 = vadd.f32 0.5, %v1248_v21 }
 0xc66   :  { %v1179_v19 = vmul.f32 %v1177_v15, %v3180_v23 }
 0xc67   :  { %v1251_v40 = vmul.f32 %v1249_v28, %v3190_v49 }
 0xccc   :  { %v1182_v17 = vpop.permute.xlu1 %1181 }
 0xccd   :  { %v1184_v18 = vmul.f32 %v1182_v17, %v1177_v15 }
 0xccf   :  { %1186 = vrot.lane.b32.xlu1 %v1184_v18, %s2652_s1 }
 0xcd3   :  { %v1254_v29 = vpop.permute.xlu0 %1253 }
 0xcd4   :  { %v1256_v0 = vmul.f32 %v1254_v29, %v1249_v28 }
 0xcd6   :  { %1258 = vrot.lane.b32.xlu0 %v1256_v0, %s2652_s1 }
 0xd41   :  { %v1187_v25 = vpop.permute.xlu1 %1186 }
 0xd42   :  { %v3183_v44 = vadd.f32 %v1187_v25, %v1179_v19 }
 0xd44   :  { %2408 = vtanh.f32 %v3183_v44  ;;  %v3244_v0 = vsel %vm1105_vm3, %v3183_v44, %v3180_v23 }
 0xd48   :  { %v1259_v24 = vpop.permute.xlu0 %1258 }
 0xd49   :  { %v3193_v52 = vadd.f32 %v1259_v24, %v1251_v40 }
 0xd4b   :  { %2410 = vtanh.f32 %v3193_v52  ;;  %v3254_v24 = vsel %vm1099_vm2, %v3193_v52, %v3190_v49 }
 0xd4e   :  { %v2409_v22 = vpop.eup %2408 }
 0xd4f   :  { %1192 = vrot.lane.b32.xlu1 %v2409_v22, %s2644_s20 }
 0xd55   :  { %v2411_v20 = vpop.eup %2410 }
 0xd56   :  { %1264 = vrot.lane.b32.xlu0 %v2411_v20, %s2644_s20 }
 0xdc1   :  { %v1193_v48 = vpop.permute.xlu1 %1192 }
 0xdc2   :  { %v3198_v55 = vmul.f32 %v1193_v48, %v1177_v15 }
 0xdc4   :  { %v3204_v13 = vsel %vm1105_vm3, %v3198_v55, %v3133_v26 }
 0xdc5   :  { %v1284_v36 = vpack.c.bf16 %v3204_v13, %v3204_v13 }
 0xdc7   :  { %1289 = vrot.lane.b32.xlu1 %v1284_v36, %s2652_s1 }
 0xdc8   :  { %v1265_v57 = vpop.permute.xlu0 %1264 }
 0xdc9   :  { %v3209_v58 = vmul.f32 %v1265_v57, %v1249_v28 }
 0xdcb   :  { %v3215_v59 = vsel %vm1099_vm2, %v3209_v58, %v3147_v51 }
 0xdcc   :  { %v1356_v60 = vpack.c.bf16 %v3215_v59, %v3215_v59 }
 0xdce   :  { %1361 = vrot.lane.b32.xlu0 %v1356_v60, %s2652_s1 }
 0xe39   :  { %v1290_v26 = vpop.permute.xlu1 %1289 }
 0xe3a   :  { %2254 = vmatmul.mubr.msk.bf16.vlgmr.msra.gmra.mrb[28].mxu0 %vm164_vm0, %v1290_v26 }
 0xe3b   :  { %2266 = vmatpush3.bf16.msra.mxu0 %v2827_v7  ;;  %2269 = vmatprep.mubr.msk.bf16.mxu0 %vm2651_vm1, %v2650_v8  ;;  %v1287_v7 = vunpack.c.h.bf16 %v3166_v54 }
 0xe3c   :  { %2267 = vmatprep.subr.bf16.mxu0 %v2650_v8 }
 0xe3f   :  { %2268 = vmatpush3.bf16.msra.mxu0 %v2837_v11 }
 0xe40   :  { %2281 = vmatprep.subr.bf16.mxu0 %v2650_v8  ;;  %v1362_v51 = vpop.permute.xlu0 %1361 }
 0xe41   :  { %2262 = vmatmul.mubr.msk.bf16.vlgmr.msra.gmra.mrb[28].mxu1 %vm164_vm0, %v1362_v51 }
 0xe42   :  { %2274 = vmatpush3.bf16.msra.mxu1 %v2834_v10  ;;  %2277 = vmatprep.mubr.msk.bf16.mxu1 %vm2651_vm1, %v2650_v8 }
 0xe43   :  { %2275 = vmatprep.subr.bf16.mxu1 %v2650_v8 }
 0xe46   :  { %2276 = vmatpush3.bf16.msra.mxu1 %v2844_v12 }
 0xe47   :  { %2289 = vmatprep.subr.bf16.mxu1 %v2650_v8 }
 0xf0d   :  { %v1328_v61 = vpop.f32.mrb[28].mxu0 }
 0xf0e   :  { %v1329_v11 = vadd.f32 %v1328_v61, %v1287_v7  ;;  %v2255_v63 = vpop.f32.mrb[29].mxu0  ;;  %v2452_v61 = vld [vmem:[#allocation9] sm:$0xff]  }
 0xf0f   :  { %v1331_v56 = vpop.f32.mrb[30].mxu0  ;;  %v2454_v63 = vld [vmem:[%s3507_s7] sm:$0xff]  }
 0xf10   :  { %2412 = vtanh.f32 %v1329_v11  ;;  %v2256_v1 = vpop.f32.mrb[31].mxu0  ;;  %v1334_v54 = vmul.f32 0.5, %v1329_v11  ;;  %v2453_v11 = vld [vmem:[#allocation9 + $0x8] sm:$0xff]   ;;  %v2455_v56 = vld [vmem:[%s3507_s7 + $0x8] sm:$0xff]   ;;  %s2653_s7 = smov [#allocation13]  }
 0xf11   :  { %v3300_v1 = vld [vmem:[#allocation2 + $0x18] sm:$0xff]  }
 0xf14   :  { %v1400_v10 = vpop.f32.mrb[28].mxu1 }
 0xf15   :  { %v1401_v2 = vadd.f32 %v1400_v10, %v1359_v46  ;;  %v2263_v3 = vpop.f32.mrb[29].mxu1  ;;  %v1447_v46 = vunpack.c.l.bf16 %v3300_v1 }
 0xf16   :  { %v1403_v5 = vpop.f32.mrb[30].mxu1 }
 0xf17   :  { %2414 = vtanh.f32 %v1401_v2  ;;  %v2264_v4 = vpop.f32.mrb[31].mxu1  ;;  %v1406_v6 = vmul.f32 0.5, %v1401_v2 }
 0xf18   :  { %2416 = vtanh.f32 %v1334_v54 }
 0xf19   :  { %2418 = vtanh.f32 %v1406_v6 }
 0xf1a   :  { %v2413_v53 = vpop.eup %2412 }
 0xf1b   :  { %1341 = vrot.lane.b32.xlu1 %v2413_v53, %s2644_s20  ;;  %v3303_v53 = vld [vmem:[#allocation3] sm:$0xff]  }
 0xf21   :  { %v2415_v12 = vpop.eup %2414 }
 0xf22   :  { %1413 = vrot.lane.b32.xlu0 %v2415_v12, %s2644_s20  ;;  %v2417_v9 = vpop.eup %2416  ;;  %v1519_v12 = vunpack.c.h.bf16 %v3303_v53 }
 0xf23   :  { %v1336_v14 = vmul.f32 0.5, %v2417_v9  ;;  %v2419_v62 = vpop.eup %2418 }
 0xf24   :  { %v1408_v18 = vmul.f32 0.5, %v2419_v62 }
 0xf25   :  { %v1337_v15 = vadd.f32 0.5, %v1336_v14 }
 0xf26   :  { %v1409_v21 = vadd.f32 0.5, %v1408_v18 }
 0xf27   :  { %v1339_v19 = vmul.f32 %v1337_v15, %v3244_v0 }
 0xf28   :  { %v1411_v22 = vmul.f32 %v1409_v21, %v3254_v24 }
 0xf8d   :  { %v1342_v16 = vpop.permute.xlu1 %1341 }
 0xf8e   :  { %v1344_v17 = vmul.f32 %v1342_v16, %v1337_v15 }
 0xf90   :  { %1346 = vrot.lane.b32.xlu1 %v1344_v17, %s2652_s1 }
 0xf94   :  { %v1414_v28 = vpop.permute.xlu0 %1413 }
 0xf95   :  { %v1416_v29 = vmul.f32 %v1414_v28, %v1409_v21 }
 0xf97   :  { %1418 = vrot.lane.b32.xlu0 %v1416_v29, %s2652_s1 }
0x1002   :  { %v1347_v25 = vpop.permute.xlu1 %1346 }
0x1003   :  { %v3247_v40 = vadd.f32 %v1347_v25, %v1339_v19 }
0x1005   :  { %2420 = vtanh.f32 %v3247_v40 }
0x1009   :  { %v1419_v20 = vpop.permute.xlu0 %1418 }
0x100a   :  { %v3257_v48 = vadd.f32 %v1419_v20, %v1411_v22 }
0x100c   :  { %2422 = vtanh.f32 %v3257_v48 }
0x100f   :  { %v2421_v23 = vpop.eup %2420 }
0x1010   :  { %1352 = vrot.lane.b32.xlu1 %v2421_v23, %s2644_s20 }
0x1016   :  { %v2423_v44 = vpop.eup %2422 }
0x1017   :  { %1424 = vrot.lane.b32.xlu0 %v2423_v44, %s2644_s20 }
0x1082   :  { %v1353_v36 = vpop.permute.xlu1 %1352 }
0x1083   :  { %v3262_v57 = vmul.f32 %v1353_v36, %v1337_v15 }
0x1085   :  { %v3268_v49 = vsel %vm931_vm13, %v3262_v57, %v3204_v13  ;;  %v1432_v43 = vsel %vm931_vm13, %v3262_v57, 0.0 }
0x1086   :  { %v1444_v52 = vpack.c.bf16 %v3268_v49, %v3268_v49 }
0x1088   :  { %1449 = vrot.lane.b32.xlu1 %v1444_v52, %s2652_s1  ;;  %v3314_v52 = vsel %vm931_vm13, %v3247_v40, %v3244_v0 }
0x1089   :  { %v1425_v60 = vpop.permute.xlu0 %1424 }
0x108a   :  { %v3273_v26 = vmul.f32 %v1425_v60, %v1409_v21 }
0x108c   :  { %v3279_v51 = vsel %vm925_vm12, %v3273_v26, %v3215_v59 }
0x108d   :  { %v1516_v7 = vpack.c.bf16 %v3279_v51, %v3279_v51 }
0x108f   :  { %1521 = vrot.lane.b32.xlu0 %v1516_v7, %s2652_s1 }
0x10fa   :  { %v1450_v13 = vpop.permute.xlu1 %1449 }
0x10fb   :  { %2270 = vmatmul.mubr.msk.bf16.vlgmr.msra.gmra.mrb[32].mxu0 %vm164_vm0, %v1450_v13 }
0x10fc   :  { %2282 = vmatpush3.bf16.msra.mxu0 %v2452_v61  ;;  %2285 = vmatprep.mubr.msk.bf16.mxu0 %vm2651_vm1, %v2650_v8  ;;  %v3321_v61 = vsel %vm925_vm12, %v3257_v48, %v3254_v24 }
0x10fd   :  { %2283 = vmatprep.subr.bf16.mxu0 %v2650_v8 }
0x1100   :  { %2284 = vmatpush3.bf16.msra.mxu0 %v2453_v11 }
0x1101   :  { %2297 = vmatprep.subr.bf16.mxu0 %v2650_v8  ;;  %v1522_v59 = vpop.permute.xlu0 %1521 }
0x1102   :  { %2278 = vmatmul.mubr.msk.bf16.vlgmr.msra.gmra.mrb[32].mxu1 %vm164_vm0, %v1522_v59 }
0x1103   :  { %2290 = vmatpush3.bf16.msra.mxu1 %v2454_v63  ;;  %2293 = vmatprep.mubr.msk.bf16.mxu1 %vm2651_vm1, %v2650_v8 }
0x1104   :  { %2291 = vmatprep.subr.bf16.mxu1 %v2650_v8 }
0x1107   :  { %2292 = vmatpush3.bf16.msra.mxu1 %v2455_v56 }
0x1108   :  { %2305 = vmatprep.subr.bf16.mxu1 %v2650_v8 }
0x11ce   :  { %v1488_v10 = vpop.f32.mrb[32].mxu0 }
0x11cf   :  { %v1489_v2 = vadd.f32 %v1488_v10, %v1447_v46  ;;  %v2271_v3 = vpop.f32.mrb[33].mxu0 }
0x11d0   :  { %v1491_v5 = vpop.f32.mrb[34].mxu0 }
0x11d1   :  { %2424 = vtanh.f32 %v1489_v2  ;;  %v2272_v4 = vpop.f32.mrb[35].mxu0  ;;  %v1494_v17 = vmul.f32 0.5, %v1489_v2 }
0x11d5   :  { %v1560_v54 = vpop.f32.mrb[32].mxu1 }
0x11d6   :  { %v1561_v6 = vadd.f32 %v1560_v54, %v1519_v12  ;;  %v2279_v9 = vpop.f32.mrb[33].mxu1 }
0x11d7   :  { %v1563_v14 = vpop.f32.mrb[34].mxu1 }
0x11d8   :  { %2426 = vtanh.f32 %v1561_v6  ;;  %v2280_v15 = vpop.f32.mrb[35].mxu1  ;;  %v1566_v18 = vmul.f32 0.5, %v1561_v6 }
0x11d9   :  { %2428 = vtanh.f32 %v1494_v17  ;;  %v1678_v15 = vunpack.c.l.bf16 %v3303_v53 }
0x11da   :  { %2430 = vtanh.f32 %v1566_v18 }
0x11db   :  { %v2425_v62 = vpop.eup %2424 }
0x11dc   :  { %1501 = vrot.lane.b32.xlu1 %v2425_v62, %s2644_s20 }
0x11e2   :  { %v2427_v16 = vpop.eup %2426 }
0x11e3   :  { %1573 = vrot.lane.b32.xlu0 %v2427_v16, %s2644_s20  ;;  %v2429_v21 = vpop.eup %2428 }
0x11e4   :  { %v1496_v28 = vmul.f32 0.5, %v2429_v21  ;;  %v2431_v19 = vpop.eup %2430 }
0x11e5   :  { %v1568_v20 = vmul.f32 0.5, %v2431_v19 }
0x11e6   :  { %v1497_v29 = vadd.f32 0.5, %v1496_v28 }
0x11e7   :  { %v1569_v23 = vadd.f32 0.5, %v1568_v20 }
0x11e8   :  { %v1499_v60 = vmul.f32 %v1497_v29, %v3314_v52 }
0x11e9   :  { %v1571_v11 = vmul.f32 %v1569_v23, %v3321_v61 }
0x124e   :  { %v1502_v25 = vpop.permute.xlu1 %1501 }
0x124f   :  { %v1504_v22 = vmul.f32 %v1502_v25, %v1497_v29 }
0x1251   :  { %1506 = vrot.lane.b32.xlu1 %v1504_v22, %s2652_s1 }
0x1255   :  { %v1574_v44 = vpop.permute.xlu0 %1573 }
0x1256   :  { %v1576_v36 = vmul.f32 %v1574_v44, %v1569_v23 }
0x1258   :  { %1578 = vrot.lane.b32.xlu0 %v1576_v36, %s2652_s1 }
0x12c3   :  { %v1507_v7 = vpop.permute.xlu1 %1506 }
0x12c4   :  { %v1509_v13 = vadd.f32 %v1507_v7, %v1499_v60 }
0x12c6   :  { %2432 = vtanh.f32 %v1509_v13 }
0x12ca   :  { %v1579_v59 = vpop.permute.xlu0 %1578 }
0x12cb   :  { %v1581_v63 = vadd.f32 %v1579_v59, %v1571_v11  ;;  %v1589_v59 = vsel %vm757_vm9, %v1509_v13, %v3314_v52 }
0x12cd   :  { %2434 = vtanh.f32 %v1581_v63 }
0x12d0   :  { %v2433_v56 = vpop.eup %2432 }
0x12d1   :  { %1512 = vrot.lane.b32.xlu1 %v2433_v56, %s2644_s20 }
0x12d7   :  { %v2435_v0 = vpop.eup %2434 }
0x12d8   :  { %1584 = vrot.lane.b32.xlu0 %v2435_v0, %s2644_s20 }
0x1343   :  { %v1513_v40 = vpop.permute.xlu1 %1512 }
0x1344   :  { %v3326_v46 = vmul.f32 %v1513_v40, %v1497_v29 }
0x1346   :  { %v3332_v24 = vsel %vm757_vm9, %v3326_v46, %v3268_v49 }
0x1347   :  { %v1604_v48 = vpack.c.bf16 %v3332_v24, %v3332_v24 }
0x1349   :  { %1609 = vrot.lane.b32.xlu1 %v1604_v48, %s2652_s1  ;;  %v1591_v48 = vsel %vm751_vm8, %v1581_v63, %v3321_v61  ;;  %v2348_v61 = vld [vmem:[#allocation10] sm:$0xff]   ;;  %v2349_v63 = vld [vmem:[#allocation12] sm:$0xff]  }
0x134a   :  { %v1585_v10 = vpop.permute.xlu0 %1584 }
0x134b   :  { %v3337_v2 = vmul.f32 %v1585_v10, %v1569_v23 }
0x134d   :  { %v3343_v3 = vsel %vm751_vm8, %v3337_v2, %v3279_v51  ;;  %v1607_v51 = vunpack.c.h.bf16 %v3300_v1 }
0x134e   :  { %v1676_v5 = vpack.c.bf16 %v3343_v3, %v3343_v3 }
0x1350   :  { %1680 = vrot.lane.b32.xlu0 %v1676_v5, %s2652_s1 }
0x13bb   :  { %v1610_v49 = vpop.permute.xlu1 %1609 }
0x13bc   :  { %2286 = vmatmul.mubr.msk.bf16.vlgmr.msra.gmra.mrb[36].mxu0 %vm164_vm0, %v1610_v49 }
0x13bd   :  { %2301 = vmatprep.mubr.msk.bf16.mxu0 %vm2651_vm1, %v2650_v8  ;;  %2298 = vmatpush3.bf16.msra.mxu0 %v2349_v63 }
0x13be   :  { %2299 = vmatprep.subr.bf16.mxu0 %v2650_v8 }
0x13c2   :  { %v1681_v4 = vpop.permute.xlu0 %1680 }
0x13c3   :  { %2294 = vmatmul.mubr.msk.bf16.vlgmr.msra.gmra.mrb[36].mxu1 %vm164_vm0, %v1681_v4 }
0x13c4   :  { %2309 = vmatprep.mubr.msk.bf16.mxu1 %vm2651_vm1, %v2650_v8  ;;  %2306 = vmatpush3.bf16.msra.mxu1 %v2348_v61  ;;  %vm600_vm1 = vcmask 523520  }
0x13c5   :  { %2307 = vmatprep.subr.bf16.mxu1 %v2650_v8 }
0x148f   :  { %v1648_v12 = vpop.f32.mrb[36].mxu0 }
0x1490   :  { %v1649_v54 = vadd.f32 %v1648_v12, %v1607_v51  ;;  %v2287_v6 = vpop.f32.mrb[37].mxu0 }
0x1491   :  { %v1651_v9 = vpop.f32.mrb[38].mxu0  ;;  %v2351_v6 = vld [vmem:[#allocation12 + $0x8] sm:$0xff]  }
0x1492   :  { %2436 = vtanh.f32 %v1649_v54  ;;  %v2288_v14 = vpop.f32.mrb[39].mxu0  ;;  %v1654_v1 = vmul.f32 0.5, %v1649_v54  ;;  %v2350_v54 = vld [vmem:[#allocation10 + $0x8] sm:$0xff]   ;;  %2300 = vmatpush3.bf16.msra.mxu0 %v2351_v6 }
0x1493   :  { %2308 = vmatpush3.bf16.msra.mxu1 %v2350_v54 }
0x1496   :  { %v1719_v62 = vpop.f32.mrb[36].mxu1 }
0x1497   :  { %v1720_v16 = vadd.f32 %v1719_v62, %v1678_v15  ;;  %v2295_v17 = vpop.f32.mrb[37].mxu1 }
0x1498   :  { %v1722_v18 = vpop.f32.mrb[38].mxu1 }
0x1499   :  { %2438 = vtanh.f32 %v1720_v16  ;;  %v2296_v21 = vpop.f32.mrb[39].mxu1  ;;  %v1725_v19 = vmul.f32 0.5, %v1720_v16 }
0x149a   :  { %2440 = vtanh.f32 %v1654_v1  ;;  %v943_v1 = vsel %vm931_vm13, %v3066_v47, 0.0  ;;  %v1278_v47 = vsel %vm1099_vm2, %v3209_v58, 0.0  ;;  %v1598_v58 = vsel %vm751_vm8, %v3337_v2, 0.0 }
0x149b   :  { %2442 = vtanh.f32 %v1725_v19 }
0x149c   :  { %v2437_v28 = vpop.eup %2436 }
0x149d   :  { %1661 = vrot.lane.b32.xlu1 %v2437_v28, %s2644_s20 }
0x14a3   :  { %v2439_v29 = vpop.eup %2438 }
0x14a4   :  { %1732 = vrot.lane.b32.xlu0 %v2439_v29, %s2644_s20  ;;  %v2441_v25 = vpop.eup %2440 }
0x14a5   :  { %v1656_v22 = vmul.f32 0.5, %v2441_v25  ;;  %v2443_v53 = vpop.eup %2442 }
0x14a6   :  { %v1727_v36 = vmul.f32 0.5, %v2443_v53 }
0x14a7   :  { %v1657_v20 = vadd.f32 0.5, %v1656_v22 }
0x14a8   :  { %v1728_v60 = vadd.f32 0.5, %v1727_v36 }
0x14a9   :  { %v1659_v56 = vmul.f32 %v1657_v20, %v1589_v59 }
0x14aa   :  { %v1730_v10 = vmul.f32 %v1728_v60, %v1591_v48 }
0x150f   :  { %v1662_v23 = vpop.permute.xlu1 %1661 }
0x1510   :  { %v1664_v44 = vmul.f32 %v1662_v23, %v1657_v20 }
0x1512   :  { %1666 = vrot.lane.b32.xlu1 %v1664_v44, %s2652_s1 }
0x1516   :  { %v1733_v7 = vpop.permute.xlu0 %1732 }
0x1517   :  { %v1735_v11 = vmul.f32 %v1733_v7, %v1728_v60 }
0x1519   :  { %1737 = vrot.lane.b32.xlu0 %v1735_v11, %s2652_s1 }
0x1584   :  { %v1667_v0 = vpop.permute.xlu1 %1666 }
0x1585   :  { %v1669_v40 = vadd.f32 %v1667_v0, %v1659_v56 }
0x1587   :  { %2444 = vtanh.f32 %v1669_v40  ;;  %v1748_v4 = vsel %vm585_vm5, %v1669_v40, %v1589_v59 }
0x158b   :  { %v1738_v5 = vpop.permute.xlu0 %1737 }
0x158c   :  { %v1740_v49 = vadd.f32 %v1738_v5, %v1730_v10 }
0x158e   :  { %2446 = vtanh.f32 %v1740_v49  ;;  %v1750_v51 = vsel %vm579_vm4, %v1740_v49, %v1591_v48 }
0x158f   :  { %v2331_v12 = vpack.i.bf16 %v1750_v51, %v1748_v4 }
0x1591   :  { %v2445_v52 = vpop.eup %2444 }
0x1592   :  { %1672 = vrot.lane.b32.xlu1 %v2445_v52, %s2644_s20 }
0x1596   :  { %2332 = vrot.lane.b32.xlu1 %v2331_v12, %s2644_s20 }
0x1598   :  { %v2447_v13 = vpop.eup %2446 }
0x1599   :  { %1743 = vrot.lane.b32.xlu0 %v2447_v13, %s2644_s20 }
0x1604   :  { %v1673_v9 = vpop.permute.xlu1 %1672 }
0x1605   :  { %v1675_v14 = vmul.f32 %v1673_v9, %v1657_v20 }
0x1607   :  { %v1747_v16 = vsel %vm585_vm5, %v1675_v14, %v3332_v24  ;;  %v769_v24 = vsel %vm757_vm9, %v2988_v39, 0.0  ;;  %v1117_v39 = vsel %vm1105_vm3, %v3140_v50, 0.0  ;;  %v1438_v50 = vsel %vm925_vm12, %v3273_v26, 0.0 }
0x1608   :  { %v2333_v15 = vpop.permute.xlu1 %2332  ;;  %v1751_v30 = vsel %vm585_vm5, %v1675_v14, 0.0 }
0x1609   :  { %v2334_v62 = vunpack.i.l.bf16 %v2333_v15  ;;  %v2335_v28 = vunpack.i.h.bf16 %v2333_v15 }
0x160b   :  { %v1767_v17 = vpack.c.bf16 %v2334_v62, %v1747_v16  ;;  %v1744_v18 = vpop.permute.xlu0 %1743 }
0x160c   :  { %v1746_v21 = vmul.f32 %v1744_v18, %v1728_v60 }
0x160d   :  { %1841 = vrot.lane.b32.xlu1 %v1767_v17, %s2652_s1 }
0x160e   :  { %v1749_v8 = vsel %vm579_vm4, %v1746_v21, %v3343_v3  ;;  %v1757_v35 = vsel %vm579_vm4, %v1746_v21, 0.0 }
0x160f   :  { %v1772_v29 = vpack.c.bf16 %v2335_v28, %v1749_v8 }
0x1611   :  { %596 = vrot.lane.b32.xlu1 %v2923_v45, %s2644_s20  ;;  %1782 = vrot.lane.b32.xlu0 %v1772_v29, %s2652_s1  ;;  %v762_v45 = vsel %vm751_vm8, %v2974_v32, 0.0  ;;  %v1110_v32 = vsel %vm1099_vm2, %v3126_v33, 0.0  ;;  %v1592_v33 = vsel %vm757_vm9, %v3326_v46, 0.0 }
0x1615   :  { %771 = vrot.lane.b32.xlu1 %v769_v24, %s2644_s20  ;;  %591 = vrot.lane.b32.xlu0 %v2915_v41, %s2652_s1  ;;  %v936_v41 = vsel %vm925_vm12, %v3052_v42, 0.0  ;;  %v1272_v42 = vsel %vm1105_vm3, %v3198_v55, 0.0 }
0x1619   :  { %945 = vrot.lane.b32.xlu1 %v943_v1, %s2644_s20  ;;  %764 = vrot.lane.b32.xlu0 %v762_v45, %s2652_s1 }
0x161d   :  { %1119 = vrot.lane.b32.xlu1 %v1117_v39, %s2644_s20  ;;  %938 = vrot.lane.b32.xlu0 %v936_v41, %s2652_s1 }
0x1621   :  { %1280 = vrot.lane.b32.xlu1 %v1278_v47, %s2644_s20  ;;  %1112 = vrot.lane.b32.xlu0 %v1110_v32, %s2652_s1 }
0x1625   :  { %1440 = vrot.lane.b32.xlu1 %v1438_v50, %s2644_s20  ;;  %1274 = vrot.lane.b32.xlu0 %v1272_v42, %s2652_s1 }
0x1629   :  { %1600 = vrot.lane.b32.xlu1 %v1598_v58, %s2644_s20  ;;  %1434 = vrot.lane.b32.xlu0 %v1432_v43, %s2652_s1 }
0x162d   :  { %1759 = vrot.lane.b32.xlu1 %v1757_v35, %s2644_s20  ;;  %1594 = vrot.lane.b32.xlu0 %v1592_v33, %s2652_s1  ;;  %s1917_s20 = sshll.u32 %s2653_s7, 4  ;;  %s1918_s20 = int_to_ptr.vmem [resolvable:$true] %s1917_s20 }
0x162e   :  { %s2566_s15 = scalar_lea.vmem %s1918_s20, 1024  ;;  %p2571_p13 = scmp.lt.s32.totalorder %s1918_s20, %s1918_s20 }
0x162f   :  { %p2567_p12 = scmp.ne.s32.totalorder %s1918_s20, %s2566_s15  ;;  %p2572_p0 = scmp.lt.s32.totalorder %s2566_s15, %s2566_s15 }
0x1631   :  { %1753 = vrot.lane.b32.xlu0 %v1751_v30, %s2652_s1  ;;  %p2573_p1 = por %p2572_p0, %p2571_p13 }
0x1633   :  { %p2574_p2 = pnand %p2573_p1, %p2567_p12 }
0x167f   :  { %v1842_v27 = vpop.permute.xlu1 %1841 }
0x1680   :  { %2310 = vmatmul.mubr.msk.bf16.vlgmr.msra.gmra.mrb[40].mxu1 %vm164_vm0, %v1842_v27 }
0x1683   :  { %v597_v31 = vpop.permute.xlu1 %596  ;;  %v1783_v38 = vpop.permute.xlu0 %1782 }
0x1684   :  { %601 = vst.msk [vmem:[#allocation13 + $0x38] sm:$0xff] %vm600_vm1, %v597_v31  ;;  %2302 = vmatmul.mubr.msk.bf16.vlgmr.msra.gmra.mrb[40].mxu0 %vm164_vm0, %v1783_v38 }
0x1687   :  { %v772_v55 = vpop.permute.xlu1 %771  ;;  %v592_v34 = vpop.permute.xlu0 %591 }
0x1688   :  { %775 = vst.msk [vmem:[#allocation13 + $0x30] sm:$0xff] %vm600_vm1, %v772_v55 }
0x1689   :  { %594 = vst.msk [vmem:[#allocation13] sm:$0xff] %vm164_vm0, %v592_v34 }
0x168b   :  { %v946_v37 = vpop.permute.xlu1 %945  ;;  %v765_v57 = vpop.permute.xlu0 %764 }
0x168c   :  { %949 = vst.msk [vmem:[#allocation13 + $0x28] sm:$0xff] %vm600_vm1, %v946_v37 }
0x168d   :  { %768 = vst.msk [vmem:[#allocation13 + $0x8] sm:$0xff] %vm164_vm0, %v765_v57 }
0x168f   :  { %v1120_v26 = vpop.permute.xlu1 %1119  ;;  %v939_v46 = vpop.permute.xlu0 %938 }
0x1690   :  { %1123 = vst.msk [vmem:[#allocation13 + $0x20] sm:$0xff] %vm600_vm1, %v1120_v26 }
0x1691   :  { %942 = vst.msk [vmem:[#allocation13 + $0x10] sm:$0xff] %vm164_vm0, %v939_v46 }
0x1693   :  { %v1281_v2 = vpop.permute.xlu1 %1280  ;;  %v1113_v3 = vpop.permute.xlu0 %1112 }
0x1694   :  { %1116 = vst.msk [vmem:[#allocation13 + $0x18] sm:$0xff] %vm164_vm0, %v1113_v3 }
0x1695   :  { %1283 = vst.msk [vmem:[#allocation13 + $0x18] sm:$0xff] %vm600_vm1, %v1281_v2 }
0x1697   :  { %v1441_v19 = vpop.permute.xlu1 %1440  ;;  %v1275_v25 = vpop.permute.xlu0 %1274 }
0x1698   :  { %1443 = vst.msk [vmem:[#allocation13 + $0x10] sm:$0xff] %vm600_vm1, %v1441_v19 }
0x1699   :  { %1277 = vst.msk [vmem:[#allocation13 + $0x20] sm:$0xff] %vm164_vm0, %v1275_v25 }
0x169b   :  { %v1601_v22 = vpop.permute.xlu1 %1600  ;;  %v1435_v20 = vpop.permute.xlu0 %1434 }
0x169c   :  { %1603 = vst.msk [vmem:[#allocation13 + $0x8] sm:$0xff] %vm600_vm1, %v1601_v22 }
0x169d   :  { %1437 = vst.msk [vmem:[#allocation13 + $0x28] sm:$0xff] %vm164_vm0, %v1435_v20 }
0x169f   :  { %v1760_v53 = vpop.permute.xlu1 %1759  ;;  %v1595_v23 = vpop.permute.xlu0 %1594 }
0x16a0   :  { %1762 = vst.msk [vmem:[#allocation13] sm:$0xff] %vm600_vm1, %v1760_v53 }
0x16a1   :  { %1597 = vst.msk [vmem:[#allocation13 + $0x30] sm:$0xff] %vm164_vm0, %v1595_v23 }
0x16a3   :  { %v1754_v44 = vpop.permute.xlu0 %1753 }
0x16a4   :  { %1756 = vst.msk [vmem:[#allocation13 + $0x38] sm:$0xff] %vm164_vm0, %v1754_v44 }
0x16a5   :  { %2577 = shalt.err (!%p2574_p2)
}
0x16a6   :  { %s2578_s26 = scalar_lea.hbm %s3511_s11, 1024 }
0x16a7   :  { %p2579_p3 = scmp.ne.s32.totalorder %s3511_s11, %s2578_s26  ;;  %p2582_p4 = scmp.lt.u32.totalorder %s2578_s26, %s3511_s11 }
0x16a9   :  { %p2584_p5 = pnand %p2582_p4, %p2579_p3 }
0x16ab   :  { %2587 = shalt.err (!%p2584_p5)
}
0x16ac   :  { %s2654_s23 = smov 128   ;;  %s2655_s24 = smov 8   ;;  %v2016_v56 = vld [vmem:[%s3510_s10] ss:$0 sm:$0xff] }
0x16ad   :  { %1923 = dma.vmem_to_hbm [thread:$0]  %s1918_s20, 1024, %s3511_s11, [#allocation6], %s2654_s23, %s2654_s23, %s2655_s24  }
0x16ae   :  { %s2656_s0 = smov [#allocation14]   ;;  %s2657_s18 = smov [#allocation16]  }
0x16af   :  { %s1930_s11 = sshll.u32 %s2656_s0, 4  ;;  %s1940_s27 = sshll.u32 %s2657_s18, 4  ;;  %s1931_s11 = int_to_ptr.vmem [resolvable:$true] %s1930_s11  ;;  %s1941_s27 = int_to_ptr.vmem [resolvable:$true] %s1940_s27 }
0x16b0   :  { %s2588_s10 = scalar_lea.vmem %s1931_s11, 128  ;;  %p2593_p7 = scmp.lt.s32.totalorder %s1931_s11, %s1931_s11 }
0x16b1   :  { %p2589_p6 = scmp.ne.s32.totalorder %s1931_s11, %s2588_s10  ;;  %p2594_p8 = scmp.lt.s32.totalorder %s2588_s10, %s2588_s10 }
0x16b3   :  { %p2595_p9 = por %p2594_p8, %p2593_p7 }
0x16b5   :  { %p2596_p10 = pnand %p2595_p9, %p2589_p6 }
0x1753   :  { %v1892_v36 = vpop.f32.mrb[40].mxu1 }
0x1754   :  { %v2311_v60 = vpop.f32.mrb[41].mxu1 }
0x1755   :  { %v1895_v7 = vpop.f32.mrb[42].mxu1 }
0x1756   :  { %v2312_v11 = vpop.f32.mrb[43].mxu1 }
0x1757   :  { %v1833_v59 = vpop.f32.mrb[40].mxu0 }
0x1758   :  { %v1893_v0 = vadd.f32 %v1892_v36, %v1833_v59  ;;  %v2303_v40 = vpop.f32.mrb[41].mxu0 }
0x1759   :  { %v1836_v48 = vpop.f32.mrb[42].mxu0 }
0x175a   :  { %v1906_v10 = vadd.f32 %v2016_v56, %v1893_v0  ;;  %v1896_v5 = vadd.f32 %v1895_v7, %v1836_v48  ;;  %v2304_v49 = vpop.f32.mrb[43].mxu0 }
0x175c   :  { %2448 = vtanh.f32 %v1906_v10  ;;  %v1907_v4 = vadd.f32 %v2016_v56, %v1896_v5 }
0x175e   :  { %2450 = vtanh.f32 %v1907_v4 }
0x1766   :  { %v2449_v51 = vpop.eup %2448 }
0x1767   :  { %1910 = vst.msk [vmem:[#allocation14] sm:$0xff] %vm164_vm0, %v2449_v51 }
0x1768   :  { %v2451_v12 = vpop.eup %2450 }
0x1769   :  { %2599 = shalt.err (!%p2596_p10)
}
0x176a   :  { %s2600_s5 = scalar_lea.hbm %s3512_s12, 128 }
0x176b   :  { %p2601_p11 = scmp.ne.s32.totalorder %s3512_s12, %s2600_s5  ;;  %p2604_p12 = scmp.lt.u32.totalorder %s2600_s5, %s3512_s12 }
0x176d   :  { %p2606_p13 = pnand %p2604_p12, %p2601_p11 }
0x176f   :  { %2609 = shalt.err (!%p2606_p13)
}
0x1770   :  { %1933 = dma.vmem_to_hbm [thread:$0]  %s1931_s11, 128, %s3512_s12, [#allocation15]   ;;  %1911 = vst.msk [vmem:[#allocation16] sm:$0xff] %vm164_vm0, %v2451_v12 }
0x1771   :  { %s2610_s20 = scalar_lea.vmem %s1941_s27, 128  ;;  %p2615_p1 = scmp.lt.s32.totalorder %s1941_s27, %s1941_s27 }
0x1772   :  { %p2611_p0 = scmp.ne.s32.totalorder %s1941_s27, %s2610_s20  ;;  %p2616_p2 = scmp.lt.s32.totalorder %s2610_s20, %s2610_s20 }
0x1774   :  { %p2617_p3 = por %p2616_p2, %p2615_p1 }
0x1776   :  { %p2618_p4 = pnand %p2617_p3, %p2611_p0 }
0x1778   :  { %2621 = shalt.err (!%p2618_p4)
}
0x1779   :  { %s2622_s3 = scalar_lea.hbm %s3513_s13, 128 }
0x177a   :  { %p2623_p5 = scmp.ne.s32.totalorder %s3513_s13, %s2622_s3  ;;  %p2626_p6 = scmp.lt.u32.totalorder %s2622_s3, %s3513_s13 }
0x177c   :  { %p2628_p7 = pnand %p2626_p6, %p2623_p5 }
0x177e   :  { %2631 = shalt.err (!%p2628_p7)
}
0x177f   :  { %1943 = dma.vmem_to_hbm [thread:$0]  %s1941_s27, 128, %s3513_s13, [#allocation15]  }
0x1780   :  { %2638 = dma.done.wait [#allocation6], 1024  }
0x1781   :  { %2639 = vsyncadd [#allocation6], 4294966272 }
0x1782   :  { %2640 = dma.done.wait [#allocation15], 256  }
0x1783   :  { %2641 = vsyncadd [#allocation15], 4294967040 }
0x1784   :  { %1953 = vsyncpa [#allocation5], 1 }
0x1785   :  { %1954 = vsyncpa [#allocation8], 1 }
0x1786   :  { %1955 = vsyncpa [#allocation11], 1 }
0x1787   :  { %1956 = vsyncpa [#allocation6], 1 }
0x1788   :  { %1957 = vsyncpa [#allocation15], 1 }

</bundles_post_ra>
